<compile_context>
chip_gen: v7x
topology: tpu7x:2x2x1
jax: 0.10.0
libtpu: 0.0.40
codegen_flags: <defaults>
</compile_context>

<pallas_src>
import functools

import jax
import jax.numpy as jnp
from jax.experimental import pallas as pl
from jax.experimental.pallas import tpu as pltpu


# ---------------------------------------------------------------------------
# Kernel
# ---------------------------------------------------------------------------
def _cf_kernel(*args, num_cf: int, d_pad: int, h_true: int, h_pad: int,
               has_cond: bool):
    f32 = jnp.float32

    # ---- unpack refs (order must match wrapper) ----------------------------
    it = iter(args)
    nxt = lambda: next(it)
    x_ref = nxt()
    cond_ref = nxt() if has_cond else None
    fi_w1 = nxt(); fi_b1 = nxt(); fi_g = nxt(); fi_be = nxt()
    fi_w2 = nxt(); fi_b2 = nxt()
    g_w1x = nxt()
    g_w1c = nxt() if has_cond else None
    g_b1 = nxt(); g_g1 = nxt(); g_be1 = nxt()
    g_w2 = nxt(); g_b2 = nxt(); g_g2 = nxt(); g_be2 = nxt()
    g_w3 = nxt(); g_b3 = nxt()
    op_w1 = nxt(); op_b1 = nxt(); op_g = nxt(); op_be = nxt()
    op_w2 = nxt(); op_b2 = nxt()
    imp_ref = nxt(); deltas_ref = nxt(); cf_ref = nxt(); out_ref = nxt()
    cf_rows_ref = nxt()                       # VMEM scratch [K*TB, Dp]

    x = x_ref[...]
    tb = x.shape[0]

    # Lane mask for masked LayerNorm when the hidden dim is lane-padded.
    if h_pad != h_true:
        lane = jax.lax.broadcasted_iota(jnp.int32, (1, h_pad), 1)
        hmask = (lane < h_true).astype(f32)
    else:
        hmask = None

    def ln_relu(h, g, b):
        # Mask BOTH mean and variance so the result never depends on the
        # padded lanes (robust even if padded h lanes are non-zero).
        hm = h if hmask is None else h * hmask
        mean = jnp.sum(hm, axis=-1, keepdims=True) * (1.0 / h_true)
        c = h - mean
        cm = c if hmask is None else c * hmask
        var = jnp.sum(cm * cm, axis=-1, keepdims=True) * (1.0 / h_true)
        y = c * jax.lax.rsqrt(var + 1e-5) * g + b
        return jnp.maximum(y, 0.0)

    # ---- feature_importance: Linear -> LN -> ReLU -> Linear -> Sigmoid ----
    h = jnp.dot(x, fi_w1[...], preferred_element_type=f32) + fi_b1[...]
    h = ln_relu(h, fi_g[...], fi_be[...])
    imp = jax.nn.sigmoid(
        jnp.dot(h, fi_w2[...], preferred_element_type=f32) + fi_b2[...])
    imp_ref[...] = imp

    # ---- generator: (x | cond) -> (Linear LN ReLU) x2 -> Linear(K*Dp) -----
    h1 = jnp.dot(x, g_w1x[...], preferred_element_type=f32) + g_b1[...]
    if has_cond:
        h1 = h1 + jnp.dot(cond_ref[...], g_w1c[...], preferred_element_type=f32)
    h1 = ln_relu(h1, g_g1[...], g_be1[...])
    h2 = jnp.dot(h1, g_w2[...], preferred_element_type=f32) + g_b2[...]
    h2 = ln_relu(h2, g_g2[...], g_be2[...])
    deltas = jnp.dot(h2, g_w3[...], preferred_element_type=f32) + g_b3[...]   # [TB, K*Dp]
    deltas_ref[...] = deltas

    # ---- counterfactuals: per-k, 128-aligned slices, no big temporaries ---
    for k in range(num_cf):
        lo = k * d_pad
        cf_k = x + imp * deltas[:, lo:lo + d_pad]          # [TB, Dp]
        cf_ref[:, lo:lo + d_pad] = cf_k                    # output slab piece
        cf_rows_ref[k * tb:(k + 1) * tb, :] = cf_k         # rows for batched predictor

    # ---- outcome_predictor: all K counterfactuals in ONE large-M pass -----
    cf_rows = cf_rows_ref[...]                             # [K*TB, Dp]
    oh = jnp.dot(cf_rows, op_w1[...], preferred_element_type=f32) + op_b1[...]
    oh = ln_relu(oh, op_g[...], op_be[...])
    out_rows = jnp.dot(oh, op_w2[...], preferred_element_type=f32) + op_b2[...]  # [K*TB, Dp]

    # Store outcomes per-k directly (full-width unmasked stores).
    for k in range(num_cf):
        out_ref[:, k * d_pad:(k + 1) * d_pad] = out_rows[k * tb:(k + 1) * tb, :]


# ---------------------------------------------------------------------------
# Parameters (true / unpadded shapes; weights [in, out], biases [1, out])
# ---------------------------------------------------------------------------
def init_params(key, input_dim, hidden_dim, num_cf):
    ks = jax.random.split(key, 16)
    n = lambda k, shape, s=0.05: (s * jax.random.normal(k, shape)).astype(jnp.float32)
    return {
        # feature_importance
        "fi_w1": n(ks[0], (input_dim, hidden_dim)),
        "fi_b1": n(ks[1], (1, hidden_dim)),
        "fi_g": jnp.ones((1, hidden_dim), jnp.float32),
        "fi_be": jnp.zeros((1, hidden_dim), jnp.float32),
        "fi_w2": n(ks[2], (hidden_dim, input_dim)),
        "fi_b2": n(ks[3], (1, input_dim)),
        # generator
        "g_w1": n(ks[4], (2 * input_dim, hidden_dim)),
        "g_b1": n(ks[5], (1, hidden_dim)),
        "g_g1": jnp.ones((1, hidden_dim), jnp.float32),
        "g_be1": jnp.zeros((1, hidden_dim), jnp.float32),
        "g_w2": n(ks[6], (hidden_dim, hidden_dim)),
        "g_b2": n(ks[7], (1, hidden_dim)),
        "g_g2": jnp.ones((1, hidden_dim), jnp.float32),
        "g_be2": jnp.zeros((1, hidden_dim), jnp.float32),
        "g_w3": n(ks[8], (hidden_dim, input_dim * num_cf)),
        "g_b3": n(ks[9], (1, input_dim * num_cf)),
        # outcome_predictor
        "op_w1": n(ks[10], (input_dim, hidden_dim)),
        "op_b1": n(ks[11], (1, hidden_dim)),
        "op_g": jnp.ones((1, hidden_dim), jnp.float32),
        "op_be": jnp.zeros((1, hidden_dim), jnp.float32),
        "op_w2": n(ks[12], (hidden_dim, input_dim)),
        "op_b2": n(ks[13], (1, input_dim)),
    }


def _param_order(has_cond):
    order = ["fi_w1", "fi_b1", "fi_g", "fi_be", "fi_w2", "fi_b2", "g_w1x"]
    if has_cond:
        order.append("g_w1c")
    order += ["g_b1", "g_g1", "g_be1", "g_w2", "g_b2", "g_g2", "g_be2",
              "g_w3", "g_b3",
              "op_w1", "op_b1", "op_g", "op_be", "op_w2", "op_b2"]
    return order


# ---------------------------------------------------------------------------
# Wrapper: lane/sublane padding + batch grid
# ---------------------------------------------------------------------------
def _round_up(n, m):
    return ((n + m - 1) // m) * m


def _pad2(a, rows, cols):
    pr, pc = rows - a.shape[0], cols - a.shape[1]
    if pr == 0 and pc == 0:
        return a
    return jnp.pad(a, ((0, pr), (0, pc)))


def _pad_params(p, D, H, K, Dp, Hp, has_cond):
    out = {
        "fi_w1": _pad2(p["fi_w1"], Dp, Hp),
        "fi_b1": _pad2(p["fi_b1"], 1, Hp),
        "fi_g": _pad2(p["fi_g"], 1, Hp),
        "fi_be": _pad2(p["fi_be"], 1, Hp),
        "fi_w2": _pad2(p["fi_w2"], Hp, Dp),
        "fi_b2": _pad2(p["fi_b2"], 1, Dp),
        # split generator first layer into x-half / cond-half (no lane concat)
        "g_w1x": _pad2(p["g_w1"][:D], Dp, Hp),
        "g_b1": _pad2(p["g_b1"], 1, Hp),
        "g_g1": _pad2(p["g_g1"], 1, Hp),
        "g_be1": _pad2(p["g_be1"], 1, Hp),
        "g_w2": _pad2(p["g_w2"], Hp, Hp),
        "g_b2": _pad2(p["g_b2"], 1, Hp),
        "g_g2": _pad2(p["g_g2"], 1, Hp),
        "g_be2": _pad2(p["g_be2"], 1, Hp),
        "op_w1": _pad2(p["op_w1"], Dp, Hp),
        "op_b1": _pad2(p["op_b1"], 1, Hp),
        "op_g": _pad2(p["op_g"], 1, Hp),
        "op_be": _pad2(p["op_be"], 1, Hp),
        "op_w2": _pad2(p["op_w2"], Hp, Dp),
        "op_b2": _pad2(p["op_b2"], 1, Dp),
    }
    if has_cond:
        out["g_w1c"] = _pad2(p["g_w1"][D:], Dp, Hp)
    # g_w3: pad each per-k column block from D to Dp (K-major lane layout preserved)
    w3 = p["g_w3"].reshape(H, K, D)
    out["g_w3"] = jnp.pad(w3, ((0, Hp - H), (0, 0), (0, Dp - D))).reshape(Hp, K * Dp)
    b3 = p["g_b3"].reshape(1, K, D)
    out["g_b3"] = jnp.pad(b3, ((0, 0), (0, 0), (0, Dp - D))).reshape(1, K * Dp)
    return out


def counterfactual_generator_forward(x, params, num_cf, condition=None, *, batch_tile=256):
    """Pallas forward pass. x: [B, D] float32. Returns dict like the torch module."""
    B, D = x.shape
    H = params["fi_w1"].shape[1]
    K = num_cf
    has_cond = condition is not None

    Dp = _round_up(D, 128)
    Hp = _round_up(H, 128)

    # Balanced batch tiling: minimize padded rows while staying <= batch_tile.
    # TODO(synk): on v7x, prefer an even grid length when >1 tile so both
    # TensorCores get work from the "parallel" batch axis.
    n_tiles = -(-B // batch_tile)
    TB = _round_up(-(-B // n_tiles), 8)
    Bp = _round_up(B, TB)
    grid = (Bp // TB,)

    xp = _pad2(x.astype(jnp.float32), Bp, Dp)
    act_inputs = [xp]
    if has_cond:
        act_inputs.append(_pad2(condition.astype(jnp.float32), Bp, Dp))

    pp = _pad_params(params, D, H, K, Dp, Hp, has_cond)
    order = _param_order(has_cond)

    kernel = functools.partial(_cf_kernel, num_cf=K, d_pad=Dp,
                               h_true=H, h_pad=Hp, has_cond=has_cond)

    row_spec = pl.BlockSpec((TB, Dp), lambda i: (i, 0))
    slab_spec = pl.BlockSpec((TB, K * Dp), lambda i: (i, 0))

    out_shapes = (
        jax.ShapeDtypeStruct((Bp, Dp), jnp.float32),          # importance
        jax.ShapeDtypeStruct((Bp, K * Dp), jnp.float32),      # deltas (flat, padded)
        jax.ShapeDtypeStruct((Bp, K * Dp), jnp.float32),      # counterfactuals
        jax.ShapeDtypeStruct((Bp, K * Dp), jnp.float32),      # outcomes
    )

    weight_elems = sum(int(pp[n].size) for n in order)
    flops = 2 * Bp * ((2 + (1 if has_cond else 0)) * Dp * Hp + Hp * Dp
                      + Hp * Hp + Hp * K * Dp + K * (Dp * Hp + Hp * Dp))
    bytes_accessed = 4 * ((1 + len(act_inputs)) * Bp * Dp + 3 * Bp * K * Dp + weight_elems)
    cost = pl.CostEstimate(flops=flops, transcendentals=Bp * Dp,
                           bytes_accessed=bytes_accessed)

    def _vmem_limit(weight_bufs):
        b = 4
        w = weight_elems * b * weight_bufs
        ins = len(act_inputs) * 2 * TB * Dp * b
        outs = 2 * (TB * Dp + 3 * TB * K * Dp) * b
        scratch = K * TB * Dp * b
        live = (K * TB * Hp + K * TB * Dp + 3 * TB * Hp + 2 * TB * K * Dp) * b
        need = int((w + ins + outs + scratch + live) * 1.25) + (4 << 20)
        return int(min(100 << 20, max(32 << 20, need)))

    def _run(weight_bufs):
        if weight_bufs == 1:
            w_specs = [pl.BlockSpec(pp[n].shape, lambda i: (0, 0),
                                    pipeline_mode=pl.Buffered(1)) for n in order]
        else:
            w_specs = [pl.BlockSpec(pp[n].shape, lambda i: (0, 0)) for n in order]
        return pl.pallas_call(
            kernel,
            out_shape=out_shapes,
            grid=grid,
            in_specs=[row_spec] * len(act_inputs) + w_specs,
            out_specs=(row_spec, slab_spec, slab_spec, slab_spec),
            scratch_shapes=[pltpu.VMEM((K * TB, Dp), jnp.float32)],
            compiler_params=pltpu.CompilerParams(
                dimension_semantics=("parallel",),
                vmem_limit_bytes=_vmem_limit(weight_bufs),
            ),
            cost_estimate=cost,
        )(*act_inputs, *[pp[n] for n in order])

    try:
        imp, deltas_f, cf_f, out_f = _run(1)      # single-buffered weights
    except Exception:
        imp, deltas_f, cf_f, out_f = _run(2)      # fallback: default double-buffering

    return {
        "counterfactuals": cf_f[:B].reshape(B, K, Dp)[:, :, :D],
        "outcomes": out_f[:B].reshape(B, K, Dp)[:, :, :D],
        "importance": imp[:B, :D],
        "deltas": deltas_f[:B].reshape(B, K, Dp)[:, :, :D],
    }


# ---------------------------------------------------------------------------
# Pure-JAX reference (unpadded) for correctness checking
# ---------------------------------------------------------------------------
def _reference_forward(x, params, num_cf, condition=None):
    B, D = x.shape
    if condition is None:
        condition = jnp.zeros_like(x)
    p = params

    def ln(h, g, b):
        mu = jnp.mean(h, axis=-1, keepdims=True)
        var = jnp.mean((h - mu) ** 2, axis=-1, keepdims=True)
        return (h - mu) / jnp.sqrt(var + 1e-5) * g + b

    h = jnp.maximum(ln(x @ p["fi_w1"] + p["fi_b1"], p["fi_g"], p["fi_be"]), 0.0)
    imp = jax.nn.sigmoid(h @ p["fi_w2"] + p["fi_b2"])

    gi = jnp.concatenate([x, condition], axis=-1)
    h1 = jnp.maximum(ln(gi @ p["g_w1"] + p["g_b1"], p["g_g1"], p["g_be1"]), 0.0)
    h2 = jnp.maximum(ln(h1 @ p["g_w2"] + p["g_b2"], p["g_g2"], p["g_be2"]), 0.0)
    deltas = (h2 @ p["g_w3"] + p["g_b3"]).reshape(B, num_cf, D)

    cf = x[:, None, :] + imp[:, None, :] * deltas
    cf_flat = cf.reshape(-1, D)
    oh = jnp.maximum(ln(cf_flat @ p["op_w1"] + p["op_b1"], p["op_g"], p["op_be"]), 0.0)
    outcomes = (oh @ p["op_w2"] + p["op_b2"]).reshape(B, num_cf, D)

    return {"counterfactuals": cf, "outcomes": outcomes, "importance": imp, "deltas": deltas}


if __name__ == "__main__":
    B, D, H, K = 4, 32, 32, 5

    key = jax.random.PRNGKey(0)
    k_param, k_x, k_c = jax.random.split(key, 3)
    params = init_params(k_param, input_dim=D, hidden_dim=H, num_cf=K)
    x = jax.random.normal(k_x, (B, D), dtype=jnp.float32)
    cond = jax.random.normal(k_c, (B, D), dtype=jnp.float32)

    # with conditioning
    out = counterfactual_generator_forward(x, params, num_cf=K, condition=cond)
    jax.block_until_ready(out)
    ref = _reference_forward(x, params, num_cf=K, condition=cond)
    for name in ("importance", "deltas", "counterfactuals", "outcomes"):
        assert out[name].shape == ref[name].shape, name
        assert jnp.allclose(out[name], ref[name], atol=1e-4, rtol=1e-4), name

    # without conditioning (condition=None fast path: cond dot / DMA skipped)
    out0 = counterfactual_generator_forward(x, params, num_cf=K, condition=None)
    jax.block_until_ready(out0)
    ref0 = _reference_forward(x, params, num_cf=K, condition=None)
    for name in ("importance", "deltas", "counterfactuals", "outcomes"):
        assert out0[name].shape == ref0[name].shape, name
        assert jnp.allclose(out0[name], ref0[name], atol=1e-4, rtol=1e-4), name

    print("KERNEL_OK")
</pallas_src>

<mosaic_0001>
module attributes {stable_mosaic.version = 11 : i64} {
  func.func @_cf_kernel(%arg0: i32, %arg1: memref<8x128xf32, #tpu.memory_space<vmem>>, %arg2: memref<8x128xf32, #tpu.memory_space<vmem>>, %arg3: memref<128x128xf32, #tpu.memory_space<vmem>>, %arg4: memref<1x128xf32, #tpu.memory_space<vmem>>, %arg5: memref<1x128xf32, #tpu.memory_space<vmem>>, %arg6: memref<1x128xf32, #tpu.memory_space<vmem>>, %arg7: memref<128x128xf32, #tpu.memory_space<vmem>>, %arg8: memref<1x128xf32, #tpu.memory_space<vmem>>, %arg9: memref<128x128xf32, #tpu.memory_space<vmem>>, %arg10: memref<128x128xf32, #tpu.memory_space<vmem>>, %arg11: memref<1x128xf32, #tpu.memory_space<vmem>>, %arg12: memref<1x128xf32, #tpu.memory_space<vmem>>, %arg13: memref<1x128xf32, #tpu.memory_space<vmem>>, %arg14: memref<128x128xf32, #tpu.memory_space<vmem>>, %arg15: memref<1x128xf32, #tpu.memory_space<vmem>>, %arg16: memref<1x128xf32, #tpu.memory_space<vmem>>, %arg17: memref<1x128xf32, #tpu.memory_space<vmem>>, %arg18: memref<128x640xf32, #tpu.memory_space<vmem>>, %arg19: memref<1x640xf32, #tpu.memory_space<vmem>>, %arg20: memref<128x128xf32, #tpu.memory_space<vmem>>, %arg21: memref<1x128xf32, #tpu.memory_space<vmem>>, %arg22: memref<1x128xf32, #tpu.memory_space<vmem>>, %arg23: memref<1x128xf32, #tpu.memory_space<vmem>>, %arg24: memref<128x128xf32, #tpu.memory_space<vmem>>, %arg25: memref<1x128xf32, #tpu.memory_space<vmem>>, %arg26: memref<8x128xf32, #tpu.memory_space<vmem>>, %arg27: memref<8x640xf32, #tpu.memory_space<vmem>>, %arg28: memref<8x640xf32, #tpu.memory_space<vmem>>, %arg29: memref<8x640xf32, #tpu.memory_space<vmem>>, %arg30: memref<40x128xf32, #tpu.memory_space<vmem>>) attributes {dimension_semantics = [#tpu.dimension_semantics<parallel>], iteration_bounds = array<i64: 1>, scalar_prefetch = 0 : i64, scratch_operands = 1 : i64, tpu.core_type = #tpu.core_type<tc>, window_params = [{transform_indices = @transform_0, window_bounds = array<i64: 8, 128>}, {transform_indices = @transform_1, window_bounds = array<i64: 8, 128>}, {pipeline_mode = #tpu.pipeline_mode<synchronous>, transform_indices = @transform_2, window_bounds = array<i64: 128, 128>}, {pipeline_mode = #tpu.pipeline_mode<synchronous>, transform_indices = @transform_3, window_bounds = array<i64: 1, 128>}, {pipeline_mode = #tpu.pipeline_mode<synchronous>, transform_indices = @transform_4, window_bounds = array<i64: 1, 128>}, {pipeline_mode = #tpu.pipeline_mode<synchronous>, transform_indices = @transform_5, window_bounds = array<i64: 1, 128>}, {pipeline_mode = #tpu.pipeline_mode<synchronous>, transform_indices = @transform_6, window_bounds = array<i64: 128, 128>}, {pipeline_mode = #tpu.pipeline_mode<synchronous>, transform_indices = @transform_7, window_bounds = array<i64: 1, 128>}, {pipeline_mode = #tpu.pipeline_mode<synchronous>, transform_indices = @transform_8, window_bounds = array<i64: 128, 128>}, {pipeline_mode = #tpu.pipeline_mode<synchronous>, transform_indices = @transform_9, window_bounds = array<i64: 128, 128>}, {pipeline_mode = #tpu.pipeline_mode<synchronous>, transform_indices = @transform_10, window_bounds = array<i64: 1, 128>}, {pipeline_mode = #tpu.pipeline_mode<synchronous>, transform_indices = @transform_11, window_bounds = array<i64: 1, 128>}, {pipeline_mode = #tpu.pipeline_mode<synchronous>, transform_indices = @transform_12, window_bounds = array<i64: 1, 128>}, {pipeline_mode = #tpu.pipeline_mode<synchronous>, transform_indices = @transform_13, window_bounds = array<i64: 128, 128>}, {pipeline_mode = #tpu.pipeline_mode<synchronous>, transform_indices = @transform_14, window_bounds = array<i64: 1, 128>}, {pipeline_mode = #tpu.pipeline_mode<synchronous>, transform_indices = @transform_15, window_bounds = array<i64: 1, 128>}, {pipeline_mode = #tpu.pipeline_mode<synchronous>, transform_indices = @transform_16, window_bounds = array<i64: 1, 128>}, {pipeline_mode = #tpu.pipeline_mode<synchronous>, transform_indices = @transform_17, window_bounds = array<i64: 128, 640>}, {pipeline_mode = #tpu.pipeline_mode<synchronous>, transform_indices = @transform_18, window_bounds = array<i64: 1, 640>}, {pipeline_mode = #tpu.pipeline_mode<synchronous>, transform_indices = @transform_19, window_bounds = array<i64: 128, 128>}, {pipeline_mode = #tpu.pipeline_mode<synchronous>, transform_indices = @transform_20, window_bounds = array<i64: 1, 128>}, {pipeline_mode = #tpu.pipeline_mode<synchronous>, transform_indices = @transform_21, window_bounds = array<i64: 1, 128>}, {pipeline_mode = #tpu.pipeline_mode<synchronous>, transform_indices = @transform_22, window_bounds = array<i64: 1, 128>}, {pipeline_mode = #tpu.pipeline_mode<synchronous>, transform_indices = @transform_23, window_bounds = array<i64: 128, 128>}, {pipeline_mode = #tpu.pipeline_mode<synchronous>, transform_indices = @transform_24, window_bounds = array<i64: 1, 128>}, {transform_indices = @transform_25, window_bounds = array<i64: 8, 128>}, {transform_indices = @transform_26, window_bounds = array<i64: 8, 640>}, {transform_indices = @transform_27, window_bounds = array<i64: 8, 640>}, {transform_indices = @transform_28, window_bounds = array<i64: 8, 640>}]} {
    %c0 = arith.constant 0 : index
    %c0_0 = arith.constant 0 : index
    %0 = vector.load %arg1[%c0, %c0_0] : memref<8x128xf32, #tpu.memory_space<vmem>>, vector<8x128xf32>
    %1 = tpu.iota {dimensions = array<i32: 1>} : vector<1x128xi32>
    %c32_i32 = arith.constant 32 : i32
    %2 = vector.broadcast %c32_i32 : i32 to vector<1x128xi32>
    %3 = arith.cmpi slt, %1, %2 : vector<1x128xi32>
    %4 = arith.extui %3 : vector<1x128xi1> to vector<1x128xi32>
    %5 = arith.sitofp %4 : vector<1x128xi32> to vector<1x128xf32>
    %c0_1 = arith.constant 0 : index
    %c0_2 = arith.constant 0 : index
    %6 = vector.load %arg3[%c0_1, %c0_2] : memref<128x128xf32, #tpu.memory_space<vmem>>, vector<128x128xf32>
    %cst = arith.constant dense<0.000000e+00> : vector<8x128xf32>
    %7 = tpu.matmul %0, %6, %cst {dimension_numbers = #tpu.dot_dimension_numbers<[1], [0], [0], [1], [0, 0, 1, 1], [], []>} : vector<8x128xf32>, vector<128x128xf32>, vector<8x128xf32> -> vector<8x128xf32>
    %c0_3 = arith.constant 0 : index
    %c0_4 = arith.constant 0 : index
    %8 = vector.load %arg4[%c0_3, %c0_4] : memref<1x128xf32, #tpu.memory_space<vmem>>, vector<1x128xf32>
    %9 = vector.broadcast %8 : vector<1x128xf32> to vector<8x128xf32>
    %10 = arith.addf %7, %9 : vector<8x128xf32>
    %c0_5 = arith.constant 0 : index
    %c0_6 = arith.constant 0 : index
    %11 = vector.load %arg5[%c0_5, %c0_6] : memref<1x128xf32, #tpu.memory_space<vmem>>, vector<1x128xf32>
    %c0_7 = arith.constant 0 : index
    %c0_8 = arith.constant 0 : index
    %12 = vector.load %arg6[%c0_7, %c0_8] : memref<1x128xf32, #tpu.memory_space<vmem>>, vector<1x128xf32>
    %13 = vector.broadcast %5 : vector<1x128xf32> to vector<8x128xf32>
    %14 = arith.mulf %10, %13 : vector<8x128xf32>
    %cst_9 = arith.constant dense<0.000000e+00> : vector<8xf32>
    %15 = vector.multi_reduction <add>, %14, %cst_9 [1] : vector<8x128xf32> to vector<8xf32>
    %16 = vector.shape_cast %15 : vector<8xf32> to vector<8x1xf32>
    %cst_10 = arith.constant 3.125000e-02 : f32
    %17 = vector.broadcast %cst_10 : f32 to vector<8x1xf32>
    %18 = arith.mulf %16, %17 : vector<8x1xf32>
    %19 = vector.broadcast %18 : vector<8x1xf32> to vector<8x128xf32>
    %20 = arith.subf %10, %19 : vector<8x128xf32>
    %21 = vector.broadcast %5 : vector<1x128xf32> to vector<8x128xf32>
    %22 = arith.mulf %20, %21 : vector<8x128xf32>
    %23 = arith.mulf %22, %22 : vector<8x128xf32>
    %cst_11 = arith.constant dense<0.000000e+00> : vector<8xf32>
    %24 = vector.multi_reduction <add>, %23, %cst_11 [1] : vector<8x128xf32> to vector<8xf32>
    %25 = vector.shape_cast %24 : vector<8xf32> to vector<8x1xf32>
    %cst_12 = arith.constant 3.125000e-02 : f32
    %26 = vector.broadcast %cst_12 : f32 to vector<8x1xf32>
    %27 = arith.mulf %25, %26 : vector<8x1xf32>
    %cst_13 = arith.constant 9.99999974E-6 : f32
    %28 = vector.broadcast %cst_13 : f32 to vector<8x1xf32>
    %29 = arith.addf %27, %28 : vector<8x1xf32>
    %30 = math.rsqrt %29 : vector<8x1xf32>
    %31 = vector.broadcast %30 : vector<8x1xf32> to vector<8x128xf32>
    %32 = arith.mulf %20, %31 : vector<8x128xf32>
    %33 = vector.broadcast %11 : vector<1x128xf32> to vector<8x128xf32>
    %34 = arith.mulf %32, %33 : vector<8x128xf32>
    %35 = vector.broadcast %12 : vector<1x128xf32> to vector<8x128xf32>
    %36 = arith.addf %34, %35 : vector<8x128xf32>
    %cst_14 = arith.constant 0.000000e+00 : f32
    %37 = vector.broadcast %cst_14 : f32 to vector<8x128xf32>
    %38 = arith.maximumf %36, %37 : vector<8x128xf32>
    %c0_15 = arith.constant 0 : index
    %c0_16 = arith.constant 0 : index
    %39 = vector.load %arg7[%c0_15, %c0_16] : memref<128x128xf32, #tpu.memory_space<vmem>>, vector<128x128xf32>
    %cst_17 = arith.constant dense<0.000000e+00> : vector<8x128xf32>
    %40 = tpu.matmul %38, %39, %cst_17 {dimension_numbers = #tpu.dot_dimension_numbers<[1], [0], [0], [1], [0, 0, 1, 1], [], []>} : vector<8x128xf32>, vector<128x128xf32>, vector<8x128xf32> -> vector<8x128xf32>
    %c0_18 = arith.constant 0 : index
    %c0_19 = arith.constant 0 : index
    %41 = vector.load %arg8[%c0_18, %c0_19] : memref<1x128xf32, #tpu.memory_space<vmem>>, vector<1x128xf32>
    %42 = vector.broadcast %41 : vector<1x128xf32> to vector<8x128xf32>
    %43 = arith.addf %40, %42 : vector<8x128xf32>
    %44 = arith.negf %43 : vector<8x128xf32>
    %45 = math.exp %44 : vector<8x128xf32>
    %cst_20 = arith.constant 1.000000e+00 : f32
    %46 = vector.broadcast %cst_20 : f32 to vector<8x128xf32>
    %47 = arith.addf %46, %45 : vector<8x128xf32>
    %48 = arith.divf %46, %47 : vector<8x128xf32>
    %c0_21 = arith.constant 0 : index
    %c0_22 = arith.constant 0 : index
    %49 = vector.load %arg26[%c0_21, %c0_22] : memref<8x128xf32, #tpu.memory_space<vmem>>, vector<8x128xf32>
    tpu.vector_store %arg26[%c0_21, %c0_22], %48 {strides = array<i32>} : memref<8x128xf32, #tpu.memory_space<vmem>>, vector<8x128xf32>,
    %c0_23 = arith.constant 0 : index
    %c0_24 = arith.constant 0 : index
    %50 = vector.load %arg9[%c0_23, %c0_24] : memref<128x128xf32, #tpu.memory_space<vmem>>, vector<128x128xf32>
    %cst_25 = arith.constant dense<0.000000e+00> : vector<8x128xf32>
    %51 = tpu.matmul %0, %50, %cst_25 {dimension_numbers = #tpu.dot_dimension_numbers<[1], [0], [0], [1], [0, 0, 1, 1], [], []>} : vector<8x128xf32>, vector<128x128xf32>, vector<8x128xf32> -> vector<8x128xf32>
    %c0_26 = arith.constant 0 : index
    %c0_27 = arith.constant 0 : index
    %52 = vector.load %arg11[%c0_26, %c0_27] : memref<1x128xf32, #tpu.memory_space<vmem>>, vector<1x128xf32>
    %53 = vector.broadcast %52 : vector<1x128xf32> to vector<8x128xf32>
    %54 = arith.addf %51, %53 : vector<8x128xf32>
    %c0_28 = arith.constant 0 : index
    %c0_29 = arith.constant 0 : index
    %55 = vector.load %arg2[%c0_28, %c0_29] : memref<8x128xf32, #tpu.memory_space<vmem>>, vector<8x128xf32>
    %c0_30 = arith.constant 0 : index
    %c0_31 = arith.constant 0 : index
    %56 = vector.load %arg10[%c0_30, %c0_31] : memref<128x128xf32, #tpu.memory_space<vmem>>, vector<128x128xf32>
    %cst_32 = arith.constant dense<0.000000e+00> : vector<8x128xf32>
    %57 = tpu.matmul %55, %56, %cst_32 {dimension_numbers = #tpu.dot_dimension_numbers<[1], [0], [0], [1], [0, 0, 1, 1], [], []>} : vector<8x128xf32>, vector<128x128xf32>, vector<8x128xf32> -> vector<8x128xf32>
    %58 = arith.addf %54, %57 : vector<8x128xf32>
    %c0_33 = arith.constant 0 : index
    %c0_34 = arith.constant 0 : index
    %59 = vector.load %arg12[%c0_33, %c0_34] : memref<1x128xf32, #tpu.memory_space<vmem>>, vector<1x128xf32>
    %c0_35 = arith.constant 0 : index
    %c0_36 = arith.constant 0 : index
    %60 = vector.load %arg13[%c0_35, %c0_36] : memref<1x128xf32, #tpu.memory_space<vmem>>, vector<1x128xf32>
    %61 = vector.broadcast %5 : vector<1x128xf32> to vector<8x128xf32>
    %62 = arith.mulf %58, %61 : vector<8x128xf32>
    %cst_37 = arith.constant dense<0.000000e+00> : vector<8xf32>
    %63 = vector.multi_reduction <add>, %62, %cst_37 [1] : vector<8x128xf32> to vector<8xf32>
    %64 = vector.shape_cast %63 : vector<8xf32> to vector<8x1xf32>
    %cst_38 = arith.constant 3.125000e-02 : f32
    %65 = vector.broadcast %cst_38 : f32 to vector<8x1xf32>
    %66 = arith.mulf %64, %65 : vector<8x1xf32>
    %67 = vector.broadcast %66 : vector<8x1xf32> to vector<8x128xf32>
    %68 = arith.subf %58, %67 : vector<8x128xf32>
    %69 = vector.broadcast %5 : vector<1x128xf32> to vector<8x128xf32>
    %70 = arith.mulf %68, %69 : vector<8x128xf32>
    %71 = arith.mulf %70, %70 : vector<8x128xf32>
    %cst_39 = arith.constant dense<0.000000e+00> : vector<8xf32>
    %72 = vector.multi_reduction <add>, %71, %cst_39 [1] : vector<8x128xf32> to vector<8xf32>
    %73 = vector.shape_cast %72 : vector<8xf32> to vector<8x1xf32>
    %cst_40 = arith.constant 3.125000e-02 : f32
    %74 = vector.broadcast %cst_40 : f32 to vector<8x1xf32>
    %75 = arith.mulf %73, %74 : vector<8x1xf32>
    %cst_41 = arith.constant 9.99999974E-6 : f32
    %76 = vector.broadcast %cst_41 : f32 to vector<8x1xf32>
    %77 = arith.addf %75, %76 : vector<8x1xf32>
    %78 = math.rsqrt %77 : vector<8x1xf32>
    %79 = vector.broadcast %78 : vector<8x1xf32> to vector<8x128xf32>
    %80 = arith.mulf %68, %79 : vector<8x128xf32>
    %81 = vector.broadcast %59 : vector<1x128xf32> to vector<8x128xf32>
    %82 = arith.mulf %80, %81 : vector<8x128xf32>
    %83 = vector.broadcast %60 : vector<1x128xf32> to vector<8x128xf32>
    %84 = arith.addf %82, %83 : vector<8x128xf32>
    %cst_42 = arith.constant 0.000000e+00 : f32
    %85 = vector.broadcast %cst_42 : f32 to vector<8x128xf32>
    %86 = arith.maximumf %84, %85 : vector<8x128xf32>
    %c0_43 = arith.constant 0 : index
    %c0_44 = arith.constant 0 : index
    %87 = vector.load %arg14[%c0_43, %c0_44] : memref<128x128xf32, #tpu.memory_space<vmem>>, vector<128x128xf32>
    %cst_45 = arith.constant dense<0.000000e+00> : vector<8x128xf32>
    %88 = tpu.matmul %86, %87, %cst_45 {dimension_numbers = #tpu.dot_dimension_numbers<[1], [0], [0], [1], [0, 0, 1, 1], [], []>} : vector<8x128xf32>, vector<128x128xf32>, vector<8x128xf32> -> vector<8x128xf32>
    %c0_46 = arith.constant 0 : index
    %c0_47 = arith.constant 0 : index
    %89 = vector.load %arg15[%c0_46, %c0_47] : memref<1x128xf32, #tpu.memory_space<vmem>>, vector<1x128xf32>
    %90 = vector.broadcast %89 : vector<1x128xf32> to vector<8x128xf32>
    %91 = arith.addf %88, %90 : vector<8x128xf32>
    %c0_48 = arith.constant 0 : index
    %c0_49 = arith.constant 0 : index
    %92 = vector.load %arg16[%c0_48, %c0_49] : memref<1x128xf32, #tpu.memory_space<vmem>>, vector<1x128xf32>
    %c0_50 = arith.constant 0 : index
    %c0_51 = arith.constant 0 : index
    %93 = vector.load %arg17[%c0_50, %c0_51] : memref<1x128xf32, #tpu.memory_space<vmem>>, vector<1x128xf32>
    %94 = vector.broadcast %5 : vector<1x128xf32> to vector<8x128xf32>
    %95 = arith.mulf %91, %94 : vector<8x128xf32>
    %cst_52 = arith.constant dense<0.000000e+00> : vector<8xf32>
    %96 = vector.multi_reduction <add>, %95, %cst_52 [1] : vector<8x128xf32> to vector<8xf32>
    %97 = vector.shape_cast %96 : vector<8xf32> to vector<8x1xf32>
    %cst_53 = arith.constant 3.125000e-02 : f32
    %98 = vector.broadcast %cst_53 : f32 to vector<8x1xf32>
    %99 = arith.mulf %97, %98 : vector<8x1xf32>
    %100 = vector.broadcast %99 : vector<8x1xf32> to vector<8x128xf32>
    %101 = arith.subf %91, %100 : vector<8x128xf32>
    %102 = vector.broadcast %5 : vector<1x128xf32> to vector<8x128xf32>
    %103 = arith.mulf %101, %102 : vector<8x128xf32>
    %104 = arith.mulf %103, %103 : vector<8x128xf32>
    %cst_54 = arith.constant dense<0.000000e+00> : vector<8xf32>
    %105 = vector.multi_reduction <add>, %104, %cst_54 [1] : vector<8x128xf32> to vector<8xf32>
    %106 = vector.shape_cast %105 : vector<8xf32> to vector<8x1xf32>
    %cst_55 = arith.constant 3.125000e-02 : f32
    %107 = vector.broadcast %cst_55 : f32 to vector<8x1xf32>
    %108 = arith.mulf %106, %107 : vector<8x1xf32>
    %cst_56 = arith.constant 9.99999974E-6 : f32
    %109 = vector.broadcast %cst_56 : f32 to vector<8x1xf32>
    %110 = arith.addf %108, %109 : vector<8x1xf32>
    %111 = math.rsqrt %110 : vector<8x1xf32>
    %112 = vector.broadcast %111 : vector<8x1xf32> to vector<8x128xf32>
    %113 = arith.mulf %101, %112 : vector<8x128xf32>
    %114 = vector.broadcast %92 : vector<1x128xf32> to vector<8x128xf32>
    %115 = arith.mulf %113, %114 : vector<8x128xf32>
    %116 = vector.broadcast %93 : vector<1x128xf32> to vector<8x128xf32>
    %117 = arith.addf %115, %116 : vector<8x128xf32>
    %cst_57 = arith.constant 0.000000e+00 : f32
    %118 = vector.broadcast %cst_57 : f32 to vector<8x128xf32>
    %119 = arith.maximumf %117, %118 : vector<8x128xf32>
    %c0_58 = arith.constant 0 : index
    %c0_59 = arith.constant 0 : index
    %120 = vector.load %arg18[%c0_58, %c0_59] : memref<128x640xf32, #tpu.memory_space<vmem>>, vector<128x640xf32>
    %cst_60 = arith.constant dense<0.000000e+00> : vector<8x640xf32>
    %121 = tpu.matmul %119, %120, %cst_60 {dimension_numbers = #tpu.dot_dimension_numbers<[1], [0], [0], [1], [0, 0, 1, 1], [], []>} : vector<8x128xf32>, vector<128x640xf32>, vector<8x640xf32> -> vector<8x640xf32>
    %c0_61 = arith.constant 0 : index
    %c0_62 = arith.constant 0 : index
    %122 = vector.load %arg19[%c0_61, %c0_62] : memref<1x640xf32, #tpu.memory_space<vmem>>, vector<1x640xf32>
    %123 = vector.broadcast %122 : vector<1x640xf32> to vector<8x640xf32>
    %124 = arith.addf %121, %123 : vector<8x640xf32>
    %c0_63 = arith.constant 0 : index
    %c0_64 = arith.constant 0 : index
    %125 = vector.load %arg27[%c0_63, %c0_64] : memref<8x640xf32, #tpu.memory_space<vmem>>, vector<8x640xf32>
    tpu.vector_store %arg27[%c0_63, %c0_64], %124 {strides = array<i32>} : memref<8x640xf32, #tpu.memory_space<vmem>>, vector<8x640xf32>,
    %126 = vector.extract_strided_slice %124 {offsets = [0, 0], sizes = [8, 128], strides = [1, 1]} : vector<8x640xf32> to vector<8x128xf32>
    %127 = arith.mulf %48, %126 : vector<8x128xf32>
    %128 = arith.addf %0, %127 : vector<8x128xf32>
    %c0_65 = arith.constant 0 : index
    %c0_66 = arith.constant 0 : index
    %129 = vector.load %arg28[%c0_65, %c0_66] : memref<8x640xf32, #tpu.memory_space<vmem>>, vector<8x128xf32>
    tpu.vector_store %arg28[%c0_65, %c0_66], %128 {strides = array<i32>} : memref<8x640xf32, #tpu.memory_space<vmem>>, vector<8x128xf32>,
    %c0_67 = arith.constant 0 : index
    %c0_68 = arith.constant 0 : index
    %130 = vector.load %arg30[%c0_67, %c0_68] : memref<40x128xf32, #tpu.memory_space<vmem>>, vector<8x128xf32>
    tpu.vector_store %arg30[%c0_67, %c0_68], %128 {strides = array<i32>} : memref<40x128xf32, #tpu.memory_space<vmem>>, vector<8x128xf32>,
    %131 = vector.extract_strided_slice %124 {offsets = [0, 128], sizes = [8, 128], strides = [1, 1]} : vector<8x640xf32> to vector<8x128xf32>
    %132 = arith.mulf %48, %131 : vector<8x128xf32>
    %133 = arith.addf %0, %132 : vector<8x128xf32>
    %c0_69 = arith.constant 0 : index
    %c128 = arith.constant 128 : index
    %134 = vector.load %arg28[%c0_69, %c128] : memref<8x640xf32, #tpu.memory_space<vmem>>, vector<8x128xf32>
    tpu.vector_store %arg28[%c0_69, %c128], %133 {strides = array<i32>} : memref<8x640xf32, #tpu.memory_space<vmem>>, vector<8x128xf32>,
    %c8 = arith.constant 8 : index
    %c0_70 = arith.constant 0 : index
    %135 = vector.load %arg30[%c8, %c0_70] : memref<40x128xf32, #tpu.memory_space<vmem>>, vector<8x128xf32>
    tpu.vector_store %arg30[%c8, %c0_70], %133 {strides = array<i32>} : memref<40x128xf32, #tpu.memory_space<vmem>>, vector<8x128xf32>,
    %136 = vector.extract_strided_slice %124 {offsets = [0, 256], sizes = [8, 128], strides = [1, 1]} : vector<8x640xf32> to vector<8x128xf32>
    %137 = arith.mulf %48, %136 : vector<8x128xf32>
    %138 = arith.addf %0, %137 : vector<8x128xf32>
    %c0_71 = arith.constant 0 : index
    %c256 = arith.constant 256 : index
    %139 = vector.load %arg28[%c0_71, %c256] : memref<8x640xf32, #tpu.memory_space<vmem>>, vector<8x128xf32>
    tpu.vector_store %arg28[%c0_71, %c256], %138 {strides = array<i32>} : memref<8x640xf32, #tpu.memory_space<vmem>>, vector<8x128xf32>,
    %c16 = arith.constant 16 : index
    %c0_72 = arith.constant 0 : index
    %140 = vector.load %arg30[%c16, %c0_72] : memref<40x128xf32, #tpu.memory_space<vmem>>, vector<8x128xf32>
    tpu.vector_store %arg30[%c16, %c0_72], %138 {strides = array<i32>} : memref<40x128xf32, #tpu.memory_space<vmem>>, vector<8x128xf32>,
    %141 = vector.extract_strided_slice %124 {offsets = [0, 384], sizes = [8, 128], strides = [1, 1]} : vector<8x640xf32> to vector<8x128xf32>
    %142 = arith.mulf %48, %141 : vector<8x128xf32>
    %143 = arith.addf %0, %142 : vector<8x128xf32>
    %c0_73 = arith.constant 0 : index
    %c384 = arith.constant 384 : index
    %144 = vector.load %arg28[%c0_73, %c384] : memref<8x640xf32, #tpu.memory_space<vmem>>, vector<8x128xf32>
    tpu.vector_store %arg28[%c0_73, %c384], %143 {strides = array<i32>} : memref<8x640xf32, #tpu.memory_space<vmem>>, vector<8x128xf32>,
    %c24 = arith.constant 24 : index
    %c0_74 = arith.constant 0 : index
    %145 = vector.load %arg30[%c24, %c0_74] : memref<40x128xf32, #tpu.memory_space<vmem>>, vector<8x128xf32>
    tpu.vector_store %arg30[%c24, %c0_74], %143 {strides = array<i32>} : memref<40x128xf32, #tpu.memory_space<vmem>>, vector<8x128xf32>,
    %146 = vector.extract_strided_slice %124 {offsets = [0, 512], sizes = [8, 128], strides = [1, 1]} : vector<8x640xf32> to vector<8x128xf32>
    %147 = arith.mulf %48, %146 : vector<8x128xf32>
    %148 = arith.addf %0, %147 : vector<8x128xf32>
    %c0_75 = arith.constant 0 : index
    %c512 = arith.constant 512 : index
    %149 = vector.load %arg28[%c0_75, %c512] : memref<8x640xf32, #tpu.memory_space<vmem>>, vector<8x128xf32>
    tpu.vector_store %arg28[%c0_75, %c512], %148 {strides = array<i32>} : memref<8x640xf32, #tpu.memory_space<vmem>>, vector<8x128xf32>,
    %c32 = arith.constant 32 : index
    %c0_76 = arith.constant 0 : index
    %150 = vector.load %arg30[%c32, %c0_76] : memref<40x128xf32, #tpu.memory_space<vmem>>, vector<8x128xf32>
    tpu.vector_store %arg30[%c32, %c0_76], %148 {strides = array<i32>} : memref<40x128xf32, #tpu.memory_space<vmem>>, vector<8x128xf32>,
    %c0_77 = arith.constant 0 : index
    %c0_78 = arith.constant 0 : index
    %151 = vector.load %arg30[%c0_77, %c0_78] : memref<40x128xf32, #tpu.memory_space<vmem>>, vector<40x128xf32>
    %c0_79 = arith.constant 0 : index
    %c0_80 = arith.constant 0 : index
    %152 = vector.load %arg20[%c0_79, %c0_80] : memref<128x128xf32, #tpu.memory_space<vmem>>, vector<128x128xf32>
    %cst_81 = arith.constant dense<0.000000e+00> : vector<40x128xf32>
    %153 = tpu.matmul %151, %152, %cst_81 {dimension_numbers = #tpu.dot_dimension_numbers<[1], [0], [0], [1], [0, 0, 1, 1], [], []>} : vector<40x128xf32>, vector<128x128xf32>, vector<40x128xf32> -> vector<40x128xf32>
    %c0_82 = arith.constant 0 : index
    %c0_83 = arith.constant 0 : index
    %154 = vector.load %arg21[%c0_82, %c0_83] : memref<1x128xf32, #tpu.memory_space<vmem>>, vector<1x128xf32>
    %155 = vector.broadcast %154 : vector<1x128xf32> to vector<40x128xf32>
    %156 = arith.addf %153, %155 : vector<40x128xf32>
    %c0_84 = arith.constant 0 : index
    %c0_85 = arith.constant 0 : index
    %157 = vector.load %arg22[%c0_84, %c0_85] : memref<1x128xf32, #tpu.memory_space<vmem>>, vector<1x128xf32>
    %c0_86 = arith.constant 0 : index
    %c0_87 = arith.constant 0 : index
    %158 = vector.load %arg23[%c0_86, %c0_87] : memref<1x128xf32, #tpu.memory_space<vmem>>, vector<1x128xf32>
    %159 = vector.broadcast %5 : vector<1x128xf32> to vector<40x128xf32>
    %160 = arith.mulf %156, %159 : vector<40x128xf32>
    %cst_88 = arith.constant dense<0.000000e+00> : vector<40xf32>
    %161 = vector.multi_reduction <add>, %160, %cst_88 [1] : vector<40x128xf32> to vector<40xf32>
    %162 = vector.shape_cast %161 : vector<40xf32> to vector<40x1xf32>
    %cst_89 = arith.constant 3.125000e-02 : f32
    %163 = vector.broadcast %cst_89 : f32 to vector<40x1xf32>
    %164 = arith.mulf %162, %163 : vector<40x1xf32>
    %165 = vector.broadcast %164 : vector<40x1xf32> to vector<40x128xf32>
    %166 = arith.subf %156, %165 : vector<40x128xf32>
    %167 = vector.broadcast %5 : vector<1x128xf32> to vector<40x128xf32>
    %168 = arith.mulf %166, %167 : vector<40x128xf32>
    %169 = arith.mulf %168, %168 : vector<40x128xf32>
    %cst_90 = arith.constant dense<0.000000e+00> : vector<40xf32>
    %170 = vector.multi_reduction <add>, %169, %cst_90 [1] : vector<40x128xf32> to vector<40xf32>
    %171 = vector.shape_cast %170 : vector<40xf32> to vector<40x1xf32>
    %cst_91 = arith.constant 3.125000e-02 : f32
    %172 = vector.broadcast %cst_91 : f32 to vector<40x1xf32>
    %173 = arith.mulf %171, %172 : vector<40x1xf32>
    %cst_92 = arith.constant 9.99999974E-6 : f32
    %174 = vector.broadcast %cst_92 : f32 to vector<40x1xf32>
    %175 = arith.addf %173, %174 : vector<40x1xf32>
    %176 = math.rsqrt %175 : vector<40x1xf32>
    %177 = vector.broadcast %176 : vector<40x1xf32> to vector<40x128xf32>
    %178 = arith.mulf %166, %177 : vector<40x128xf32>
    %179 = vector.broadcast %157 : vector<1x128xf32> to vector<40x128xf32>
    %180 = arith.mulf %178, %179 : vector<40x128xf32>
    %181 = vector.broadcast %158 : vector<1x128xf32> to vector<40x128xf32>
    %182 = arith.addf %180, %181 : vector<40x128xf32>
    %cst_93 = arith.constant 0.000000e+00 : f32
    %183 = vector.broadcast %cst_93 : f32 to vector<40x128xf32>
    %184 = arith.maximumf %182, %183 : vector<40x128xf32>
    %c0_94 = arith.constant 0 : index
    %c0_95 = arith.constant 0 : index
    %185 = vector.load %arg24[%c0_94, %c0_95] : memref<128x128xf32, #tpu.memory_space<vmem>>, vector<128x128xf32>
    %cst_96 = arith.constant dense<0.000000e+00> : vector<40x128xf32>
    %186 = tpu.matmul %184, %185, %cst_96 {dimension_numbers = #tpu.dot_dimension_numbers<[1], [0], [0], [1], [0, 0, 1, 1], [], []>} : vector<40x128xf32>, vector<128x128xf32>, vector<40x128xf32> -> vector<40x128xf32>
    %c0_97 = arith.constant 0 : index
    %c0_98 = arith.constant 0 : index
    %187 = vector.load %arg25[%c0_97, %c0_98] : memref<1x128xf32, #tpu.memory_space<vmem>>, vector<1x128xf32>
    %188 = vector.broadcast %187 : vector<1x128xf32> to vector<40x128xf32>
    %189 = arith.addf %186, %188 : vector<40x128xf32>
    %190 = vector.extract_strided_slice %189 {offsets = [0, 0], sizes = [8, 128], strides = [1, 1]} : vector<40x128xf32> to vector<8x128xf32>
    %c0_99 = arith.constant 0 : index
    %c0_100 = arith.constant 0 : index
    %191 = vector.load %arg29[%c0_99, %c0_100] : memref<8x640xf32, #tpu.memory_space<vmem>>, vector<8x128xf32>
    tpu.vector_store %arg29[%c0_99, %c0_100], %190 {strides = array<i32>} : memref<8x640xf32, #tpu.memory_space<vmem>>, vector<8x128xf32>,
    %192 = vector.extract_strided_slice %189 {offsets = [8, 0], sizes = [8, 128], strides = [1, 1]} : vector<40x128xf32> to vector<8x128xf32>
    %c0_101 = arith.constant 0 : index
    %c128_102 = arith.constant 128 : index
    %193 = vector.load %arg29[%c0_101, %c128_102] : memref<8x640xf32, #tpu.memory_space<vmem>>, vector<8x128xf32>
    tpu.vector_store %arg29[%c0_101, %c128_102], %192 {strides = array<i32>} : memref<8x640xf32, #tpu.memory_space<vmem>>, vector<8x128xf32>,
    %194 = vector.extract_strided_slice %189 {offsets = [16, 0], sizes = [8, 128], strides = [1, 1]} : vector<40x128xf32> to vector<8x128xf32>
    %c0_103 = arith.constant 0 : index
    %c256_104 = arith.constant 256 : index
    %195 = vector.load %arg29[%c0_103, %c256_104] : memref<8x640xf32, #tpu.memory_space<vmem>>, vector<8x128xf32>
    tpu.vector_store %arg29[%c0_103, %c256_104], %194 {strides = array<i32>} : memref<8x640xf32, #tpu.memory_space<vmem>>, vector<8x128xf32>,
    %196 = vector.extract_strided_slice %189 {offsets = [24, 0], sizes = [8, 128], strides = [1, 1]} : vector<40x128xf32> to vector<8x128xf32>
    %c0_105 = arith.constant 0 : index
    %c384_106 = arith.constant 384 : index
    %197 = vector.load %arg29[%c0_105, %c384_106] : memref<8x640xf32, #tpu.memory_space<vmem>>, vector<8x128xf32>
    tpu.vector_store %arg29[%c0_105, %c384_106], %196 {strides = array<i32>} : memref<8x640xf32, #tpu.memory_space<vmem>>, vector<8x128xf32>,
    %198 = vector.extract_strided_slice %189 {offsets = [32, 0], sizes = [8, 128], strides = [1, 1]} : vector<40x128xf32> to vector<8x128xf32>
    %c0_107 = arith.constant 0 : index
    %c512_108 = arith.constant 512 : index
    %199 = vector.load %arg29[%c0_107, %c512_108] : memref<8x640xf32, #tpu.memory_space<vmem>>, vector<8x128xf32>
    tpu.vector_store %arg29[%c0_107, %c512_108], %198 {strides = array<i32>} : memref<8x640xf32, #tpu.memory_space<vmem>>, vector<8x128xf32>,
    return
  }
  func.func @transform_0(%arg0: i32) -> (i32, i32) {
    %c0_i32 = arith.constant 0 : i32
    %c0_i32_0 = arith.constant 0 : i32
    return %arg0, %c0_i32 : i32, i32
  }
  func.func @transform_1(%arg0: i32) -> (i32, i32) {
    %c0_i32 = arith.constant 0 : i32
    %c0_i32_0 = arith.constant 0 : i32
    return %arg0, %c0_i32 : i32, i32
  }
  func.func @transform_2(%arg0: i32) -> (i32, i32) {
    %c0_i32 = arith.constant 0 : i32
    %c0_i32_0 = arith.constant 0 : i32
    %c0_i32_1 = arith.constant 0 : i32
    return %c0_i32, %c0_i32_0 : i32, i32
  }
  func.func @transform_3(%arg0: i32) -> (i32, i32) {
    %c0_i32 = arith.constant 0 : i32
    %c0_i32_0 = arith.constant 0 : i32
    %c0_i32_1 = arith.constant 0 : i32
    return %c0_i32, %c0_i32_0 : i32, i32
  }
  func.func @transform_4(%arg0: i32) -> (i32, i32) {
    %c0_i32 = arith.constant 0 : i32
    %c0_i32_0 = arith.constant 0 : i32
    %c0_i32_1 = arith.constant 0 : i32
    return %c0_i32, %c0_i32_0 : i32, i32
  }
  func.func @transform_5(%arg0: i32) -> (i32, i32) {
    %c0_i32 = arith.constant 0 : i32
    %c0_i32_0 = arith.constant 0 : i32
    %c0_i32_1 = arith.constant 0 : i32
    return %c0_i32, %c0_i32_0 : i32, i32
  }
  func.func @transform_6(%arg0: i32) -> (i32, i32) {
    %c0_i32 = arith.constant 0 : i32
    %c0_i32_0 = arith.constant 0 : i32
    %c0_i32_1 = arith.constant 0 : i32
    return %c0_i32, %c0_i32_0 : i32, i32
  }
  func.func @transform_7(%arg0: i32) -> (i32, i32) {
    %c0_i32 = arith.constant 0 : i32
    %c0_i32_0 = arith.constant 0 : i32
    %c0_i32_1 = arith.constant 0 : i32
    return %c0_i32, %c0_i32_0 : i32, i32
  }
  func.func @transform_8(%arg0: i32) -> (i32, i32) {
    %c0_i32 = arith.constant 0 : i32
    %c0_i32_0 = arith.constant 0 : i32
    %c0_i32_1 = arith.constant 0 : i32
    return %c0_i32, %c0_i32_0 : i32, i32
  }
  func.func @transform_9(%arg0: i32) -> (i32, i32) {
    %c0_i32 = arith.constant 0 : i32
    %c0_i32_0 = arith.constant 0 : i32
    %c0_i32_1 = arith.constant 0 : i32
    return %c0_i32, %c0_i32_0 : i32, i32
  }
  func.func @transform_10(%arg0: i32) -> (i32, i32) {
    %c0_i32 = arith.constant 0 : i32
    %c0_i32_0 = arith.constant 0 : i32
    %c0_i32_1 = arith.constant 0 : i32
    return %c0_i32, %c0_i32_0 : i32, i32
  }
  func.func @transform_11(%arg0: i32) -> (i32, i32) {
    %c0_i32 = arith.constant 0 : i32
    %c0_i32_0 = arith.constant 0 : i32
    %c0_i32_1 = arith.constant 0 : i32
    return %c0_i32, %c0_i32_0 : i32, i32
  }
  func.func @transform_12(%arg0: i32) -> (i32, i32) {
    %c0_i32 = arith.constant 0 : i32
    %c0_i32_0 = arith.constant 0 : i32
    %c0_i32_1 = arith.constant 0 : i32
    return %c0_i32, %c0_i32_0 : i32, i32
  }
  func.func @transform_13(%arg0: i32) -> (i32, i32) {
    %c0_i32 = arith.constant 0 : i32
    %c0_i32_0 = arith.constant 0 : i32
    %c0_i32_1 = arith.constant 0 : i32
    return %c0_i32, %c0_i32_0 : i32, i32
  }
  func.func @transform_14(%arg0: i32) -> (i32, i32) {
    %c0_i32 = arith.constant 0 : i32
    %c0_i32_0 = arith.constant 0 : i32
    %c0_i32_1 = arith.constant 0 : i32
    return %c0_i32, %c0_i32_0 : i32, i32
  }
  func.func @transform_15(%arg0: i32) -> (i32, i32) {
    %c0_i32 = arith.constant 0 : i32
    %c0_i32_0 = arith.constant 0 : i32
    %c0_i32_1 = arith.constant 0 : i32
    return %c0_i32, %c0_i32_0 : i32, i32
  }
  func.func @transform_16(%arg0: i32) -> (i32, i32) {
    %c0_i32 = arith.constant 0 : i32
    %c0_i32_0 = arith.constant 0 : i32
    %c0_i32_1 = arith.constant 0 : i32
    return %c0_i32, %c0_i32_0 : i32, i32
  }
  func.func @transform_17(%arg0: i32) -> (i32, i32) {
    %c0_i32 = arith.constant 0 : i32
    %c0_i32_0 = arith.constant 0 : i32
    %c0_i32_1 = arith.constant 0 : i32
    return %c0_i32, %c0_i32_0 : i32, i32
  }
  func.func @transform_18(%arg0: i32) -> (i32, i32) {
    %c0_i32 = arith.constant 0 : i32
    %c0_i32_0 = arith.constant 0 : i32
    %c0_i32_1 = arith.constant 0 : i32
    return %c0_i32, %c0_i32_0 : i32, i32
  }
  func.func @transform_19(%arg0: i32) -> (i32, i32) {
    %c0_i32 = arith.constant 0 : i32
    %c0_i32_0 = arith.constant 0 : i32
    %c0_i32_1 = arith.constant 0 : i32
    return %c0_i32, %c0_i32_0 : i32, i32
  }
  func.func @transform_20(%arg0: i32) -> (i32, i32) {
    %c0_i32 = arith.constant 0 : i32
    %c0_i32_0 = arith.constant 0 : i32
    %c0_i32_1 = arith.constant 0 : i32
    return %c0_i32, %c0_i32_0 : i32, i32
  }
  func.func @transform_21(%arg0: i32) -> (i32, i32) {
    %c0_i32 = arith.constant 0 : i32
    %c0_i32_0 = arith.constant 0 : i32
    %c0_i32_1 = arith.constant 0 : i32
    return %c0_i32, %c0_i32_0 : i32, i32
  }
  func.func @transform_22(%arg0: i32) -> (i32, i32) {
    %c0_i32 = arith.constant 0 : i32
    %c0_i32_0 = arith.constant 0 : i32
    %c0_i32_1 = arith.constant 0 : i32
    return %c0_i32, %c0_i32_0 : i32, i32
  }
  func.func @transform_23(%arg0: i32) -> (i32, i32) {
    %c0_i32 = arith.constant 0 : i32
    %c0_i32_0 = arith.constant 0 : i32
    %c0_i32_1 = arith.constant 0 : i32
    return %c0_i32, %c0_i32_0 : i32, i32
  }
  func.func @transform_24(%arg0: i32) -> (i32, i32) {
    %c0_i32 = arith.constant 0 : i32
    %c0_i32_0 = arith.constant 0 : i32
    %c0_i32_1 = arith.constant 0 : i32
    return %c0_i32, %c0_i32_0 : i32, i32
  }
  func.func @transform_25(%arg0: i32) -> (i32, i32) {
    %c0_i32 = arith.constant 0 : i32
    %c0_i32_0 = arith.constant 0 : i32
    return %arg0, %c0_i32 : i32, i32
  }
  func.func @transform_26(%arg0: i32) -> (i32, i32) {
    %c0_i32 = arith.constant 0 : i32
    %c0_i32_0 = arith.constant 0 : i32
    return %arg0, %c0_i32 : i32, i32
  }
  func.func @transform_27(%arg0: i32) -> (i32, i32) {
    %c0_i32 = arith.constant 0 : i32
    %c0_i32_0 = arith.constant 0 : i32
    return %arg0, %c0_i32 : i32, i32
  }
  func.func @transform_28(%arg0: i32) -> (i32, i32) {
    %c0_i32 = arith.constant 0 : i32
    %c0_i32_0 = arith.constant 0 : i32
    return %arg0, %c0_i32 : i32, i32
  }
}

module attributes {stable_mosaic.version = 11 : i64} {
  func.func @_cf_kernel(%arg0: i32, %arg1: memref<8x128xf32, #tpu.memory_space<vmem>>, %arg2: memref<8x128xf32, #tpu.memory_space<vmem>>, %arg3: memref<128x128xf32, #tpu.memory_space<vmem>>, %arg4: memref<1x128xf32, #tpu.memory_space<vmem>>, %arg5: memref<1x128xf32, #tpu.memory_space<vmem>>, %arg6: memref<1x128xf32, #tpu.memory_space<vmem>>, %arg7: memref<128x128xf32, #tpu.memory_space<vmem>>, %arg8: memref<1x128xf32, #tpu.memory_space<vmem>>, %arg9: memref<128x128xf32, #tpu.memory_space<vmem>>, %arg10: memref<128x128xf32, #tpu.memory_space<vmem>>, %arg11: memref<1x128xf32, #tpu.memory_space<vmem>>, %arg12: memref<1x128xf32, #tpu.memory_space<vmem>>, %arg13: memref<1x128xf32, #tpu.memory_space<vmem>>, %arg14: memref<128x128xf32, #tpu.memory_space<vmem>>, %arg15: memref<1x128xf32, #tpu.memory_space<vmem>>, %arg16: memref<1x128xf32, #tpu.memory_space<vmem>>, %arg17: memref<1x128xf32, #tpu.memory_space<vmem>>, %arg18: memref<128x640xf32, #tpu.memory_space<vmem>>, %arg19: memref<1x640xf32, #tpu.memory_space<vmem>>, %arg20: memref<128x128xf32, #tpu.memory_space<vmem>>, %arg21: memref<1x128xf32, #tpu.memory_space<vmem>>, %arg22: memref<1x128xf32, #tpu.memory_space<vmem>>, %arg23: memref<1x128xf32, #tpu.memory_space<vmem>>, %arg24: memref<128x128xf32, #tpu.memory_space<vmem>>, %arg25: memref<1x128xf32, #tpu.memory_space<vmem>>, %arg26: memref<8x128xf32, #tpu.memory_space<vmem>>, %arg27: memref<8x640xf32, #tpu.memory_space<vmem>>, %arg28: memref<8x640xf32, #tpu.memory_space<vmem>>, %arg29: memref<8x640xf32, #tpu.memory_space<vmem>>, %arg30: memref<40x128xf32, #tpu.memory_space<vmem>>) attributes {dimension_semantics = [#tpu.dimension_semantics<parallel>], iteration_bounds = array<i64: 1>, scalar_prefetch = 0 : i64, scratch_operands = 1 : i64, tpu.core_type = #tpu.core_type<tc>, window_params = [{transform_indices = @transform_0, window_bounds = array<i64: 8, 128>}, {transform_indices = @transform_1, window_bounds = array<i64: 8, 128>}, {pipeline_mode = #tpu.pipeline_mode<synchronous>, transform_indices = @transform_2, window_bounds = array<i64: 128, 128>}, {pipeline_mode = #tpu.pipeline_mode<synchronous>, transform_indices = @transform_3, window_bounds = array<i64: 1, 128>}, {pipeline_mode = #tpu.pipeline_mode<synchronous>, transform_indices = @transform_4, window_bounds = array<i64: 1, 128>}, {pipeline_mode = #tpu.pipeline_mode<synchronous>, transform_indices = @transform_5, window_bounds = array<i64: 1, 128>}, {pipeline_mode = #tpu.pipeline_mode<synchronous>, transform_indices = @transform_6, window_bounds = array<i64: 128, 128>}, {pipeline_mode = #tpu.pipeline_mode<synchronous>, transform_indices = @transform_7, window_bounds = array<i64: 1, 128>}, {pipeline_mode = #tpu.pipeline_mode<synchronous>, transform_indices = @transform_8, window_bounds = array<i64: 128, 128>}, {pipeline_mode = #tpu.pipeline_mode<synchronous>, transform_indices = @transform_9, window_bounds = array<i64: 128, 128>}, {pipeline_mode = #tpu.pipeline_mode<synchronous>, transform_indices = @transform_10, window_bounds = array<i64: 1, 128>}, {pipeline_mode = #tpu.pipeline_mode<synchronous>, transform_indices = @transform_11, window_bounds = array<i64: 1, 128>}, {pipeline_mode = #tpu.pipeline_mode<synchronous>, transform_indices = @transform_12, window_bounds = array<i64: 1, 128>}, {pipeline_mode = #tpu.pipeline_mode<synchronous>, transform_indices = @transform_13, window_bounds = array<i64: 128, 128>}, {pipeline_mode = #tpu.pipeline_mode<synchronous>, transform_indices = @transform_14, window_bounds = array<i64: 1, 128>}, {pipeline_mode = #tpu.pipeline_mode<synchronous>, transform_indices = @transform_15, window_bounds = array<i64: 1, 128>}, {pipeline_mode = #tpu.pipeline_mode<synchronous>, transform_indices = @transform_16, window_bounds = array<i64: 1, 128>}, {pipeline_mode = #tpu.pipeline_mode<synchronous>, transform_indices = @transform_17, window_bounds = array<i64: 128, 640>}, {pipeline_mode = #tpu.pipeline_mode<synchronous>, transform_indices = @transform_18, window_bounds = array<i64: 1, 640>}, {pipeline_mode = #tpu.pipeline_mode<synchronous>, transform_indices = @transform_19, window_bounds = array<i64: 128, 128>}, {pipeline_mode = #tpu.pipeline_mode<synchronous>, transform_indices = @transform_20, window_bounds = array<i64: 1, 128>}, {pipeline_mode = #tpu.pipeline_mode<synchronous>, transform_indices = @transform_21, window_bounds = array<i64: 1, 128>}, {pipeline_mode = #tpu.pipeline_mode<synchronous>, transform_indices = @transform_22, window_bounds = array<i64: 1, 128>}, {pipeline_mode = #tpu.pipeline_mode<synchronous>, transform_indices = @transform_23, window_bounds = array<i64: 128, 128>}, {pipeline_mode = #tpu.pipeline_mode<synchronous>, transform_indices = @transform_24, window_bounds = array<i64: 1, 128>}, {transform_indices = @transform_25, window_bounds = array<i64: 8, 128>}, {transform_indices = @transform_26, window_bounds = array<i64: 8, 640>}, {transform_indices = @transform_27, window_bounds = array<i64: 8, 640>}, {transform_indices = @transform_28, window_bounds = array<i64: 8, 640>}]} {
    %c0 = arith.constant 0 : index
    %c0_0 = arith.constant 0 : index
    %0 = vector.load %arg1[%c0, %c0_0] : memref<8x128xf32, #tpu.memory_space<vmem>>, vector<8x128xf32>
    %1 = tpu.iota {dimensions = array<i32: 1>} : vector<1x128xi32>
    %c32_i32 = arith.constant 32 : i32
    %2 = vector.broadcast %c32_i32 : i32 to vector<1x128xi32>
    %3 = arith.cmpi slt, %1, %2 : vector<1x128xi32>
    %4 = arith.extui %3 : vector<1x128xi1> to vector<1x128xi32>
    %5 = arith.sitofp %4 : vector<1x128xi32> to vector<1x128xf32>
    %c0_1 = arith.constant 0 : index
    %c0_2 = arith.constant 0 : index
    %6 = vector.load %arg3[%c0_1, %c0_2] : memref<128x128xf32, #tpu.memory_space<vmem>>, vector<128x128xf32>
    %cst = arith.constant dense<0.000000e+00> : vector<8x128xf32>
    %7 = tpu.matmul %0, %6, %cst {dimension_numbers = #tpu.dot_dimension_numbers<[1], [0], [0], [1], [0, 0, 1, 1], [], []>} : vector<8x128xf32>, vector<128x128xf32>, vector<8x128xf32> -> vector<8x128xf32>
    %c0_3 = arith.constant 0 : index
    %c0_4 = arith.constant 0 : index
    %8 = vector.load %arg4[%c0_3, %c0_4] : memref<1x128xf32, #tpu.memory_space<vmem>>, vector<1x128xf32>
    %9 = vector.broadcast %8 : vector<1x128xf32> to vector<8x128xf32>
    %10 = arith.addf %7, %9 : vector<8x128xf32>
    %c0_5 = arith.constant 0 : index
    %c0_6 = arith.constant 0 : index
    %11 = vector.load %arg5[%c0_5, %c0_6] : memref<1x128xf32, #tpu.memory_space<vmem>>, vector<1x128xf32>
    %c0_7 = arith.constant 0 : index
    %c0_8 = arith.constant 0 : index
    %12 = vector.load %arg6[%c0_7, %c0_8] : memref<1x128xf32, #tpu.memory_space<vmem>>, vector<1x128xf32>
    %13 = vector.broadcast %5 : vector<1x128xf32> to vector<8x128xf32>
    %14 = arith.mulf %10, %13 : vector<8x128xf32>
    %cst_9 = arith.constant dense<0.000000e+00> : vector<8xf32>
    %15 = vector.multi_reduction <add>, %14, %cst_9 [1] : vector<8x128xf32> to vector<8xf32>
    %16 = vector.shape_cast %15 : vector<8xf32> to vector<8x1xf32>
    %cst_10 = arith.constant 3.125000e-02 : f32
    %17 = vector.broadcast %cst_10 : f32 to vector<8x1xf32>
    %18 = arith.mulf %16, %17 : vector<8x1xf32>
    %19 = vector.broadcast %18 : vector<8x1xf32> to vector<8x128xf32>
    %20 = arith.subf %10, %19 : vector<8x128xf32>
    %21 = vector.broadcast %5 : vector<1x128xf32> to vector<8x128xf32>
    %22 = arith.mulf %20, %21 : vector<8x128xf32>
    %23 = arith.mulf %22, %22 : vector<8x128xf32>
    %cst_11 = arith.constant dense<0.000000e+00> : vector<8xf32>
    %24 = vector.multi_reduction <add>, %23, %cst_11 [1] : vector<8x128xf32> to vector<8xf32>
    %25 = vector.shape_cast %24 : vector<8xf32> to vector<8x1xf32>
    %cst_12 = arith.constant 3.125000e-02 : f32
    %26 = vector.broadcast %cst_12 : f32 to vector<8x1xf32>
    %27 = arith.mulf %25, %26 : vector<8x1xf32>
    %cst_13 = arith.constant 9.99999974E-6 : f32
    %28 = vector.broadcast %cst_13 : f32 to vector<8x1xf32>
    %29 = arith.addf %27, %28 : vector<8x1xf32>
    %30 = math.rsqrt %29 : vector<8x1xf32>
    %31 = vector.broadcast %30 : vector<8x1xf32> to vector<8x128xf32>
    %32 = arith.mulf %20, %31 : vector<8x128xf32>
    %33 = vector.broadcast %11 : vector<1x128xf32> to vector<8x128xf32>
    %34 = arith.mulf %32, %33 : vector<8x128xf32>
    %35 = vector.broadcast %12 : vector<1x128xf32> to vector<8x128xf32>
    %36 = arith.addf %34, %35 : vector<8x128xf32>
    %cst_14 = arith.constant 0.000000e+00 : f32
    %37 = vector.broadcast %cst_14 : f32 to vector<8x128xf32>
    %38 = arith.maximumf %36, %37 : vector<8x128xf32>
    %c0_15 = arith.constant 0 : index
    %c0_16 = arith.constant 0 : index
    %39 = vector.load %arg7[%c0_15, %c0_16] : memref<128x128xf32, #tpu.memory_space<vmem>>, vector<128x128xf32>
    %cst_17 = arith.constant dense<0.000000e+00> : vector<8x128xf32>
    %40 = tpu.matmul %38, %39, %cst_17 {dimension_numbers = #tpu.dot_dimension_numbers<[1], [0], [0], [1], [0, 0, 1, 1], [], []>} : vector<8x128xf32>, vector<128x128xf32>, vector<8x128xf32> -> vector<8x128xf32>
    %c0_18 = arith.constant 0 : index
    %c0_19 = arith.constant 0 : index
    %41 = vector.load %arg8[%c0_18, %c0_19] : memref<1x128xf32, #tpu.memory_space<vmem>>, vector<1x128xf32>
    %42 = vector.broadcast %41 : vector<1x128xf32> to vector<8x128xf32>
    %43 = arith.addf %40, %42 : vector<8x128xf32>
    %44 = arith.negf %43 : vector<8x128xf32>
    %45 = math.exp %44 : vector<8x128xf32>
    %cst_20 = arith.constant 1.000000e+00 : f32
    %46 = vector.broadcast %cst_20 : f32 to vector<8x128xf32>
    %47 = arith.addf %46, %45 : vector<8x128xf32>
    %48 = arith.divf %46, %47 : vector<8x128xf32>
    %c0_21 = arith.constant 0 : index
    %c0_22 = arith.constant 0 : index
    %49 = vector.load %arg26[%c0_21, %c0_22] : memref<8x128xf32, #tpu.memory_space<vmem>>, vector<8x128xf32>
    tpu.vector_store %arg26[%c0_21, %c0_22], %48 {strides = array<i32>} : memref<8x128xf32, #tpu.memory_space<vmem>>, vector<8x128xf32>,
    %c0_23 = arith.constant 0 : index
    %c0_24 = arith.constant 0 : index
    %50 = vector.load %arg9[%c0_23, %c0_24] : memref<128x128xf32, #tpu.memory_space<vmem>>, vector<128x128xf32>
    %cst_25 = arith.constant dense<0.000000e+00> : vector<8x128xf32>
    %51 = tpu.matmul %0, %50, %cst_25 {dimension_numbers = #tpu.dot_dimension_numbers<[1], [0], [0], [1], [0, 0, 1, 1], [], []>} : vector<8x128xf32>, vector<128x128xf32>, vector<8x128xf32> -> vector<8x128xf32>
    %c0_26 = arith.constant 0 : index
    %c0_27 = arith.constant 0 : index
    %52 = vector.load %arg11[%c0_26, %c0_27] : memref<1x128xf32, #tpu.memory_space<vmem>>, vector<1x128xf32>
    %53 = vector.broadcast %52 : vector<1x128xf32> to vector<8x128xf32>
    %54 = arith.addf %51, %53 : vector<8x128xf32>
    %c0_28 = arith.constant 0 : index
    %c0_29 = arith.constant 0 : index
    %55 = vector.load %arg2[%c0_28, %c0_29] : memref<8x128xf32, #tpu.memory_space<vmem>>, vector<8x128xf32>
    %c0_30 = arith.constant 0 : index
    %c0_31 = arith.constant 0 : index
    %56 = vector.load %arg10[%c0_30, %c0_31] : memref<128x128xf32, #tpu.memory_space<vmem>>, vector<128x128xf32>
    %cst_32 = arith.constant dense<0.000000e+00> : vector<8x128xf32>
    %57 = tpu.matmul %55, %56, %cst_32 {dimension_numbers = #tpu.dot_dimension_numbers<[1], [0], [0], [1], [0, 0, 1, 1], [], []>} : vector<8x128xf32>, vector<128x128xf32>, vector<8x128xf32> -> vector<8x128xf32>
    %58 = arith.addf %54, %57 : vector<8x128xf32>
    %c0_33 = arith.constant 0 : index
    %c0_34 = arith.constant 0 : index
    %59 = vector.load %arg12[%c0_33, %c0_34] : memref<1x128xf32, #tpu.memory_space<vmem>>, vector<1x128xf32>
    %c0_35 = arith.constant 0 : index
    %c0_36 = arith.constant 0 : index
    %60 = vector.load %arg13[%c0_35, %c0_36] : memref<1x128xf32, #tpu.memory_space<vmem>>, vector<1x128xf32>
    %61 = vector.broadcast %5 : vector<1x128xf32> to vector<8x128xf32>
    %62 = arith.mulf %58, %61 : vector<8x128xf32>
    %cst_37 = arith.constant dense<0.000000e+00> : vector<8xf32>
    %63 = vector.multi_reduction <add>, %62, %cst_37 [1] : vector<8x128xf32> to vector<8xf32>
    %64 = vector.shape_cast %63 : vector<8xf32> to vector<8x1xf32>
    %cst_38 = arith.constant 3.125000e-02 : f32
    %65 = vector.broadcast %cst_38 : f32 to vector<8x1xf32>
    %66 = arith.mulf %64, %65 : vector<8x1xf32>
    %67 = vector.broadcast %66 : vector<8x1xf32> to vector<8x128xf32>
    %68 = arith.subf %58, %67 : vector<8x128xf32>
    %69 = vector.broadcast %5 : vector<1x128xf32> to vector<8x128xf32>
    %70 = arith.mulf %68, %69 : vector<8x128xf32>
    %71 = arith.mulf %70, %70 : vector<8x128xf32>
    %cst_39 = arith.constant dense<0.000000e+00> : vector<8xf32>
    %72 = vector.multi_reduction <add>, %71, %cst_39 [1] : vector<8x128xf32> to vector<8xf32>
    %73 = vector.shape_cast %72 : vector<8xf32> to vector<8x1xf32>
    %cst_40 = arith.constant 3.125000e-02 : f32
    %74 = vector.broadcast %cst_40 : f32 to vector<8x1xf32>
    %75 = arith.mulf %73, %74 : vector<8x1xf32>
    %cst_41 = arith.constant 9.99999974E-6 : f32
    %76 = vector.broadcast %cst_41 : f32 to vector<8x1xf32>
    %77 = arith.addf %75, %76 : vector<8x1xf32>
    %78 = math.rsqrt %77 : vector<8x1xf32>
    %79 = vector.broadcast %78 : vector<8x1xf32> to vector<8x128xf32>
    %80 = arith.mulf %68, %79 : vector<8x128xf32>
    %81 = vector.broadcast %59 : vector<1x128xf32> to vector<8x128xf32>
    %82 = arith.mulf %80, %81 : vector<8x128xf32>
    %83 = vector.broadcast %60 : vector<1x128xf32> to vector<8x128xf32>
    %84 = arith.addf %82, %83 : vector<8x128xf32>
    %cst_42 = arith.constant 0.000000e+00 : f32
    %85 = vector.broadcast %cst_42 : f32 to vector<8x128xf32>
    %86 = arith.maximumf %84, %85 : vector<8x128xf32>
    %c0_43 = arith.constant 0 : index
    %c0_44 = arith.constant 0 : index
    %87 = vector.load %arg14[%c0_43, %c0_44] : memref<128x128xf32, #tpu.memory_space<vmem>>, vector<128x128xf32>
    %cst_45 = arith.constant dense<0.000000e+00> : vector<8x128xf32>
    %88 = tpu.matmul %86, %87, %cst_45 {dimension_numbers = #tpu.dot_dimension_numbers<[1], [0], [0], [1], [0, 0, 1, 1], [], []>} : vector<8x128xf32>, vector<128x128xf32>, vector<8x128xf32> -> vector<8x128xf32>
    %c0_46 = arith.constant 0 : index
    %c0_47 = arith.constant 0 : index
    %89 = vector.load %arg15[%c0_46, %c0_47] : memref<1x128xf32, #tpu.memory_space<vmem>>, vector<1x128xf32>
    %90 = vector.broadcast %89 : vector<1x128xf32> to vector<8x128xf32>
    %91 = arith.addf %88, %90 : vector<8x128xf32>
    %c0_48 = arith.constant 0 : index
    %c0_49 = arith.constant 0 : index
    %92 = vector.load %arg16[%c0_48, %c0_49] : memref<1x128xf32, #tpu.memory_space<vmem>>, vector<1x128xf32>
    %c0_50 = arith.constant 0 : index
    %c0_51 = arith.constant 0 : index
    %93 = vector.load %arg17[%c0_50, %c0_51] : memref<1x128xf32, #tpu.memory_space<vmem>>, vector<1x128xf32>
    %94 = vector.broadcast %5 : vector<1x128xf32> to vector<8x128xf32>
    %95 = arith.mulf %91, %94 : vector<8x128xf32>
    %cst_52 = arith.constant dense<0.000000e+00> : vector<8xf32>
    %96 = vector.multi_reduction <add>, %95, %cst_52 [1] : vector<8x128xf32> to vector<8xf32>
    %97 = vector.shape_cast %96 : vector<8xf32> to vector<8x1xf32>
    %cst_53 = arith.constant 3.125000e-02 : f32
    %98 = vector.broadcast %cst_53 : f32 to vector<8x1xf32>
    %99 = arith.mulf %97, %98 : vector<8x1xf32>
    %100 = vector.broadcast %99 : vector<8x1xf32> to vector<8x128xf32>
    %101 = arith.subf %91, %100 : vector<8x128xf32>
    %102 = vector.broadcast %5 : vector<1x128xf32> to vector<8x128xf32>
    %103 = arith.mulf %101, %102 : vector<8x128xf32>
    %104 = arith.mulf %103, %103 : vector<8x128xf32>
    %cst_54 = arith.constant dense<0.000000e+00> : vector<8xf32>
    %105 = vector.multi_reduction <add>, %104, %cst_54 [1] : vector<8x128xf32> to vector<8xf32>
    %106 = vector.shape_cast %105 : vector<8xf32> to vector<8x1xf32>
    %cst_55 = arith.constant 3.125000e-02 : f32
    %107 = vector.broadcast %cst_55 : f32 to vector<8x1xf32>
    %108 = arith.mulf %106, %107 : vector<8x1xf32>
    %cst_56 = arith.constant 9.99999974E-6 : f32
    %109 = vector.broadcast %cst_56 : f32 to vector<8x1xf32>
    %110 = arith.addf %108, %109 : vector<8x1xf32>
    %111 = math.rsqrt %110 : vector<8x1xf32>
    %112 = vector.broadcast %111 : vector<8x1xf32> to vector<8x128xf32>
    %113 = arith.mulf %101, %112 : vector<8x128xf32>
    %114 = vector.broadcast %92 : vector<1x128xf32> to vector<8x128xf32>
    %115 = arith.mulf %113, %114 : vector<8x128xf32>
    %116 = vector.broadcast %93 : vector<1x128xf32> to vector<8x128xf32>
    %117 = arith.addf %115, %116 : vector<8x128xf32>
    %cst_57 = arith.constant 0.000000e+00 : f32
    %118 = vector.broadcast %cst_57 : f32 to vector<8x128xf32>
    %119 = arith.maximumf %117, %118 : vector<8x128xf32>
    %c0_58 = arith.constant 0 : index
    %c0_59 = arith.constant 0 : index
    %120 = vector.load %arg18[%c0_58, %c0_59] : memref<128x640xf32, #tpu.memory_space<vmem>>, vector<128x640xf32>
    %cst_60 = arith.constant dense<0.000000e+00> : vector<8x640xf32>
    %121 = tpu.matmul %119, %120, %cst_60 {dimension_numbers = #tpu.dot_dimension_numbers<[1], [0], [0], [1], [0, 0, 1, 1], [], []>} : vector<8x128xf32>, vector<128x640xf32>, vector<8x640xf32> -> vector<8x640xf32>
    %c0_61 = arith.constant 0 : index
    %c0_62 = arith.constant 0 : index
    %122 = vector.load %arg19[%c0_61, %c0_62] : memref<1x640xf32, #tpu.memory_space<vmem>>, vector<1x640xf32>
    %123 = vector.broadcast %122 : vector<1x640xf32> to vector<8x640xf32>
    %124 = arith.addf %121, %123 : vector<8x640xf32>
    %c0_63 = arith.constant 0 : index
    %c0_64 = arith.constant 0 : index
    %125 = vector.load %arg27[%c0_63, %c0_64] : memref<8x640xf32, #tpu.memory_space<vmem>>, vector<8x640xf32>
    tpu.vector_store %arg27[%c0_63, %c0_64], %124 {strides = array<i32>} : memref<8x640xf32, #tpu.memory_space<vmem>>, vector<8x640xf32>,
    %126 = vector.extract_strided_slice %124 {offsets = [0, 0], sizes = [8, 128], strides = [1, 1]} : vector<8x640xf32> to vector<8x128xf32>
    %127 = arith.mulf %48, %126 : vector<8x128xf32>
    %128 = arith.addf %0, %127 : vector<8x128xf32>
    %c0_65 = arith.constant 0 : index
    %c0_66 = arith.constant 0 : index
    %129 = vector.load %arg28[%c0_65, %c0_66] : memref<8x640xf32, #tpu.memory_space<vmem>>, vector<8x128xf32>
    tpu.vector_store %arg28[%c0_65, %c0_66], %128 {strides = array<i32>} : memref<8x640xf32, #tpu.memory_space<vmem>>, vector<8x128xf32>,
    %c0_67 = arith.constant 0 : index
    %c0_68 = arith.constant 0 : index
    %130 = vector.load %arg30[%c0_67, %c0_68] : memref<40x128xf32, #tpu.memory_space<vmem>>, vector<8x128xf32>
    tpu.vector_store %arg30[%c0_67, %c0_68], %128 {strides = array<i32>} : memref<40x128xf32, #tpu.memory_space<vmem>>, vector<8x128xf32>,
    %131 = vector.extract_strided_slice %124 {offsets = [0, 128], sizes = [8, 128], strides = [1, 1]} : vector<8x640xf32> to vector<8x128xf32>
    %132 = arith.mulf %48, %131 : vector<8x128xf32>
    %133 = arith.addf %0, %132 : vector<8x128xf32>
    %c0_69 = arith.constant 0 : index
    %c128 = arith.constant 128 : index
    %134 = vector.load %arg28[%c0_69, %c128] : memref<8x640xf32, #tpu.memory_space<vmem>>, vector<8x128xf32>
    tpu.vector_store %arg28[%c0_69, %c128], %133 {strides = array<i32>} : memref<8x640xf32, #tpu.memory_space<vmem>>, vector<8x128xf32>,
    %c8 = arith.constant 8 : index
    %c0_70 = arith.constant 0 : index
    %135 = vector.load %arg30[%c8, %c0_70] : memref<40x128xf32, #tpu.memory_space<vmem>>, vector<8x128xf32>
    tpu.vector_store %arg30[%c8, %c0_70], %133 {strides = array<i32>} : memref<40x128xf32, #tpu.memory_space<vmem>>, vector<8x128xf32>,
    %136 = vector.extract_strided_slice %124 {offsets = [0, 256], sizes = [8, 128], strides = [1, 1]} : vector<8x640xf32> to vector<8x128xf32>
    %137 = arith.mulf %48, %136 : vector<8x128xf32>
    %138 = arith.addf %0, %137 : vector<8x128xf32>
    %c0_71 = arith.constant 0 : index
    %c256 = arith.constant 256 : index
    %139 = vector.load %arg28[%c0_71, %c256] : memref<8x640xf32, #tpu.memory_space<vmem>>, vector<8x128xf32>
    tpu.vector_store %arg28[%c0_71, %c256], %138 {strides = array<i32>} : memref<8x640xf32, #tpu.memory_space<vmem>>, vector<8x128xf32>,
    %c16 = arith.constant 16 : index
    %c0_72 = arith.constant 0 : index
    %140 = vector.load %arg30[%c16, %c0_72] : memref<40x128xf32, #tpu.memory_space<vmem>>, vector<8x128xf32>
    tpu.vector_store %arg30[%c16, %c0_72], %138 {strides = array<i32>} : memref<40x128xf32, #tpu.memory_space<vmem>>, vector<8x128xf32>,
    %141 = vector.extract_strided_slice %124 {offsets = [0, 384], sizes = [8, 128], strides = [1, 1]} : vector<8x640xf32> to vector<8x128xf32>
    %142 = arith.mulf %48, %141 : vector<8x128xf32>
    %143 = arith.addf %0, %142 : vector<8x128xf32>
    %c0_73 = arith.constant 0 : index
    %c384 = arith.constant 384 : index
    %144 = vector.load %arg28[%c0_73, %c384] : memref<8x640xf32, #tpu.memory_space<vmem>>, vector<8x128xf32>
    tpu.vector_store %arg28[%c0_73, %c384], %143 {strides = array<i32>} : memref<8x640xf32, #tpu.memory_space<vmem>>, vector<8x128xf32>,
    %c24 = arith.constant 24 : index
    %c0_74 = arith.constant 0 : index
    %145 = vector.load %arg30[%c24, %c0_74] : memref<40x128xf32, #tpu.memory_space<vmem>>, vector<8x128xf32>
    tpu.vector_store %arg30[%c24, %c0_74], %143 {strides = array<i32>} : memref<40x128xf32, #tpu.memory_space<vmem>>, vector<8x128xf32>,
    %146 = vector.extract_strided_slice %124 {offsets = [0, 512], sizes = [8, 128], strides = [1, 1]} : vector<8x640xf32> to vector<8x128xf32>
    %147 = arith.mulf %48, %146 : vector<8x128xf32>
    %148 = arith.addf %0, %147 : vector<8x128xf32>
    %c0_75 = arith.constant 0 : index
    %c512 = arith.constant 512 : index
    %149 = vector.load %arg28[%c0_75, %c512] : memref<8x640xf32, #tpu.memory_space<vmem>>, vector<8x128xf32>
    tpu.vector_store %arg28[%c0_75, %c512], %148 {strides = array<i32>} : memref<8x640xf32, #tpu.memory_space<vmem>>, vector<8x128xf32>,
    %c32 = arith.constant 32 : index
    %c0_76 = arith.constant 0 : index
    %150 = vector.load %arg30[%c32, %c0_76] : memref<40x128xf32, #tpu.memory_space<vmem>>, vector<8x128xf32>
    tpu.vector_store %arg30[%c32, %c0_76], %148 {strides = array<i32>} : memref<40x128xf32, #tpu.memory_space<vmem>>, vector<8x128xf32>,
    %c0_77 = arith.constant 0 : index
    %c0_78 = arith.constant 0 : index
    %151 = vector.load %arg30[%c0_77, %c0_78] : memref<40x128xf32, #tpu.memory_space<vmem>>, vector<40x128xf32>
    %c0_79 = arith.constant 0 : index
    %c0_80 = arith.constant 0 : index
    %152 = vector.load %arg20[%c0_79, %c0_80] : memref<128x128xf32, #tpu.memory_space<vmem>>, vector<128x128xf32>
    %cst_81 = arith.constant dense<0.000000e+00> : vector<40x128xf32>
    %153 = tpu.matmul %151, %152, %cst_81 {dimension_numbers = #tpu.dot_dimension_numbers<[1], [0], [0], [1], [0, 0, 1, 1], [], []>} : vector<40x128xf32>, vector<128x128xf32>, vector<40x128xf32> -> vector<40x128xf32>
    %c0_82 = arith.constant 0 : index
    %c0_83 = arith.constant 0 : index
    %154 = vector.load %arg21[%c0_82, %c0_83] : memref<1x128xf32, #tpu.memory_space<vmem>>, vector<1x128xf32>
    %155 = vector.broadcast %154 : vector<1x128xf32> to vector<40x128xf32>
    %156 = arith.addf %153, %155 : vector<40x128xf32>
    %c0_84 = arith.constant 0 : index
    %c0_85 = arith.constant 0 : index
    %157 = vector.load %arg22[%c0_84, %c0_85] : memref<1x128xf32, #tpu.memory_space<vmem>>, vector<1x128xf32>
    %c0_86 = arith.constant 0 : index
    %c0_87 = arith.constant 0 : index
    %158 = vector.load %arg23[%c0_86, %c0_87] : memref<1x128xf32, #tpu.memory_space<vmem>>, vector<1x128xf32>
    %159 = vector.broadcast %5 : vector<1x128xf32> to vector<40x128xf32>
    %160 = arith.mulf %156, %159 : vector<40x128xf32>
    %cst_88 = arith.constant dense<0.000000e+00> : vector<40xf32>
    %161 = vector.multi_reduction <add>, %160, %cst_88 [1] : vector<40x128xf32> to vector<40xf32>
    %162 = vector.shape_cast %161 : vector<40xf32> to vector<40x1xf32>
    %cst_89 = arith.constant 3.125000e-02 : f32
    %163 = vector.broadcast %cst_89 : f32 to vector<40x1xf32>
    %164 = arith.mulf %162, %163 : vector<40x1xf32>
    %165 = vector.broadcast %164 : vector<40x1xf32> to vector<40x128xf32>
    %166 = arith.subf %156, %165 : vector<40x128xf32>
    %167 = vector.broadcast %5 : vector<1x128xf32> to vector<40x128xf32>
    %168 = arith.mulf %166, %167 : vector<40x128xf32>
    %169 = arith.mulf %168, %168 : vector<40x128xf32>
    %cst_90 = arith.constant dense<0.000000e+00> : vector<40xf32>
    %170 = vector.multi_reduction <add>, %169, %cst_90 [1] : vector<40x128xf32> to vector<40xf32>
    %171 = vector.shape_cast %170 : vector<40xf32> to vector<40x1xf32>
    %cst_91 = arith.constant 3.125000e-02 : f32
    %172 = vector.broadcast %cst_91 : f32 to vector<40x1xf32>
    %173 = arith.mulf %171, %172 : vector<40x1xf32>
    %cst_92 = arith.constant 9.99999974E-6 : f32
    %174 = vector.broadcast %cst_92 : f32 to vector<40x1xf32>
    %175 = arith.addf %173, %174 : vector<40x1xf32>
    %176 = math.rsqrt %175 : vector<40x1xf32>
    %177 = vector.broadcast %176 : vector<40x1xf32> to vector<40x128xf32>
    %178 = arith.mulf %166, %177 : vector<40x128xf32>
    %179 = vector.broadcast %157 : vector<1x128xf32> to vector<40x128xf32>
    %180 = arith.mulf %178, %179 : vector<40x128xf32>
    %181 = vector.broadcast %158 : vector<1x128xf32> to vector<40x128xf32>
    %182 = arith.addf %180, %181 : vector<40x128xf32>
    %cst_93 = arith.constant 0.000000e+00 : f32
    %183 = vector.broadcast %cst_93 : f32 to vector<40x128xf32>
    %184 = arith.maximumf %182, %183 : vector<40x128xf32>
    %c0_94 = arith.constant 0 : index
    %c0_95 = arith.constant 0 : index
    %185 = vector.load %arg24[%c0_94, %c0_95] : memref<128x128xf32, #tpu.memory_space<vmem>>, vector<128x128xf32>
    %cst_96 = arith.constant dense<0.000000e+00> : vector<40x128xf32>
    %186 = tpu.matmul %184, %185, %cst_96 {dimension_numbers = #tpu.dot_dimension_numbers<[1], [0], [0], [1], [0, 0, 1, 1], [], []>} : vector<40x128xf32>, vector<128x128xf32>, vector<40x128xf32> -> vector<40x128xf32>
    %c0_97 = arith.constant 0 : index
    %c0_98 = arith.constant 0 : index
    %187 = vector.load %arg25[%c0_97, %c0_98] : memref<1x128xf32, #tpu.memory_space<vmem>>, vector<1x128xf32>
    %188 = vector.broadcast %187 : vector<1x128xf32> to vector<40x128xf32>
    %189 = arith.addf %186, %188 : vector<40x128xf32>
    %190 = vector.extract_strided_slice %189 {offsets = [0, 0], sizes = [8, 128], strides = [1, 1]} : vector<40x128xf32> to vector<8x128xf32>
    %c0_99 = arith.constant 0 : index
    %c0_100 = arith.constant 0 : index
    %191 = vector.load %arg29[%c0_99, %c0_100] : memref<8x640xf32, #tpu.memory_space<vmem>>, vector<8x128xf32>
    tpu.vector_store %arg29[%c0_99, %c0_100], %190 {strides = array<i32>} : memref<8x640xf32, #tpu.memory_space<vmem>>, vector<8x128xf32>,
    %192 = vector.extract_strided_slice %189 {offsets = [8, 0], sizes = [8, 128], strides = [1, 1]} : vector<40x128xf32> to vector<8x128xf32>
    %c0_101 = arith.constant 0 : index
    %c128_102 = arith.constant 128 : index
    %193 = vector.load %arg29[%c0_101, %c128_102] : memref<8x640xf32, #tpu.memory_space<vmem>>, vector<8x128xf32>
    tpu.vector_store %arg29[%c0_101, %c128_102], %192 {strides = array<i32>} : memref<8x640xf32, #tpu.memory_space<vmem>>, vector<8x128xf32>,
    %194 = vector.extract_strided_slice %189 {offsets = [16, 0], sizes = [8, 128], strides = [1, 1]} : vector<40x128xf32> to vector<8x128xf32>
    %c0_103 = arith.constant 0 : index
    %c256_104 = arith.constant 256 : index
    %195 = vector.load %arg29[%c0_103, %c256_104] : memref<8x640xf32, #tpu.memory_space<vmem>>, vector<8x128xf32>
    tpu.vector_store %arg29[%c0_103, %c256_104], %194 {strides = array<i32>} : memref<8x640xf32, #tpu.memory_space<vmem>>, vector<8x128xf32>,
    %196 = vector.extract_strided_slice %189 {offsets = [24, 0], sizes = [8, 128], strides = [1, 1]} : vector<40x128xf32> to vector<8x128xf32>
    %c0_105 = arith.constant 0 : index
    %c384_106 = arith.constant 384 : index
    %197 = vector.load %arg29[%c0_105, %c384_106] : memref<8x640xf32, #tpu.memory_space<vmem>>, vector<8x128xf32>
    tpu.vector_store %arg29[%c0_105, %c384_106], %196 {strides = array<i32>} : memref<8x640xf32, #tpu.memory_space<vmem>>, vector<8x128xf32>,
    %198 = vector.extract_strided_slice %189 {offsets = [32, 0], sizes = [8, 128], strides = [1, 1]} : vector<40x128xf32> to vector<8x128xf32>
    %c0_107 = arith.constant 0 : index
    %c512_108 = arith.constant 512 : index
    %199 = vector.load %arg29[%c0_107, %c512_108] : memref<8x640xf32, #tpu.memory_space<vmem>>, vector<8x128xf32>
    tpu.vector_store %arg29[%c0_107, %c512_108], %198 {strides = array<i32>} : memref<8x640xf32, #tpu.memory_space<vmem>>, vector<8x128xf32>,
    return
  }
  func.func @transform_0(%arg0: i32) -> (i32, i32) {
    %c0_i32 = arith.constant 0 : i32
    %c0_i32_0 = arith.constant 0 : i32
    return %arg0, %c0_i32 : i32, i32
  }
  func.func @transform_1(%arg0: i32) -> (i32, i32) {
    %c0_i32 = arith.constant 0 : i32
    %c0_i32_0 = arith.constant 0 : i32
    return %arg0, %c0_i32 : i32, i32
  }
  func.func @transform_2(%arg0: i32) -> (i32, i32) {
    %c0_i32 = arith.constant 0 : i32
    %c0_i32_0 = arith.constant 0 : i32
    %c0_i32_1 = arith.constant 0 : i32
    return %c0_i32, %c0_i32_0 : i32, i32
  }
  func.func @transform_3(%arg0: i32) -> (i32, i32) {
    %c0_i32 = arith.constant 0 : i32
    %c0_i32_0 = arith.constant 0 : i32
    %c0_i32_1 = arith.constant 0 : i32
    return %c0_i32, %c0_i32_0 : i32, i32
  }
  func.func @transform_4(%arg0: i32) -> (i32, i32) {
    %c0_i32 = arith.constant 0 : i32
    %c0_i32_0 = arith.constant 0 : i32
    %c0_i32_1 = arith.constant 0 : i32
    return %c0_i32, %c0_i32_0 : i32, i32
  }
  func.func @transform_5(%arg0: i32) -> (i32, i32) {
    %c0_i32 = arith.constant 0 : i32
    %c0_i32_0 = arith.constant 0 : i32
    %c0_i32_1 = arith.constant 0 : i32
    return %c0_i32, %c0_i32_0 : i32, i32
  }
  func.func @transform_6(%arg0: i32) -> (i32, i32) {
    %c0_i32 = arith.constant 0 : i32
    %c0_i32_0 = arith.constant 0 : i32
    %c0_i32_1 = arith.constant 0 : i32
    return %c0_i32, %c0_i32_0 : i32, i32
  }
  func.func @transform_7(%arg0: i32) -> (i32, i32) {
    %c0_i32 = arith.constant 0 : i32
    %c0_i32_0 = arith.constant 0 : i32
    %c0_i32_1 = arith.constant 0 : i32
    return %c0_i32, %c0_i32_0 : i32, i32
  }
  func.func @transform_8(%arg0: i32) -> (i32, i32) {
    %c0_i32 = arith.constant 0 : i32
    %c0_i32_0 = arith.constant 0 : i32
    %c0_i32_1 = arith.constant 0 : i32
    return %c0_i32, %c0_i32_0 : i32, i32
  }
  func.func @transform_9(%arg0: i32) -> (i32, i32) {
    %c0_i32 = arith.constant 0 : i32
    %c0_i32_0 = arith.constant 0 : i32
    %c0_i32_1 = arith.constant 0 : i32
    return %c0_i32, %c0_i32_0 : i32, i32
  }
  func.func @transform_10(%arg0: i32) -> (i32, i32) {
    %c0_i32 = arith.constant 0 : i32
    %c0_i32_0 = arith.constant 0 : i32
    %c0_i32_1 = arith.constant 0 : i32
    return %c0_i32, %c0_i32_0 : i32, i32
  }
  func.func @transform_11(%arg0: i32) -> (i32, i32) {
    %c0_i32 = arith.constant 0 : i32
    %c0_i32_0 = arith.constant 0 : i32
    %c0_i32_1 = arith.constant 0 : i32
    return %c0_i32, %c0_i32_0 : i32, i32
  }
  func.func @transform_12(%arg0: i32) -> (i32, i32) {
    %c0_i32 = arith.constant 0 : i32
    %c0_i32_0 = arith.constant 0 : i32
    %c0_i32_1 = arith.constant 0 : i32
    return %c0_i32, %c0_i32_0 : i32, i32
  }
  func.func @transform_13(%arg0: i32) -> (i32, i32) {
    %c0_i32 = arith.constant 0 : i32
    %c0_i32_0 = arith.constant 0 : i32
    %c0_i32_1 = arith.constant 0 : i32
    return %c0_i32, %c0_i32_0 : i32, i32
  }
  func.func @transform_14(%arg0: i32) -> (i32, i32) {
    %c0_i32 = arith.constant 0 : i32
    %c0_i32_0 = arith.constant 0 : i32
    %c0_i32_1 = arith.constant 0 : i32
    return %c0_i32, %c0_i32_0 : i32, i32
  }
  func.func @transform_15(%arg0: i32) -> (i32, i32) {
    %c0_i32 = arith.constant 0 : i32
    %c0_i32_0 = arith.constant 0 : i32
    %c0_i32_1 = arith.constant 0 : i32
    return %c0_i32, %c0_i32_0 : i32, i32
  }
  func.func @transform_16(%arg0: i32) -> (i32, i32) {
    %c0_i32 = arith.constant 0 : i32
    %c0_i32_0 = arith.constant 0 : i32
    %c0_i32_1 = arith.constant 0 : i32
    return %c0_i32, %c0_i32_0 : i32, i32
  }
  func.func @transform_17(%arg0: i32) -> (i32, i32) {
    %c0_i32 = arith.constant 0 : i32
    %c0_i32_0 = arith.constant 0 : i32
    %c0_i32_1 = arith.constant 0 : i32
    return %c0_i32, %c0_i32_0 : i32, i32
  }
  func.func @transform_18(%arg0: i32) -> (i32, i32) {
    %c0_i32 = arith.constant 0 : i32
    %c0_i32_0 = arith.constant 0 : i32
    %c0_i32_1 = arith.constant 0 : i32
    return %c0_i32, %c0_i32_0 : i32, i32
  }
  func.func @transform_19(%arg0: i32) -> (i32, i32) {
    %c0_i32 = arith.constant 0 : i32
    %c0_i32_0 = arith.constant 0 : i32
    %c0_i32_1 = arith.constant 0 : i32
    return %c0_i32, %c0_i32_0 : i32, i32
  }
  func.func @transform_20(%arg0: i32) -> (i32, i32) {
    %c0_i32 = arith.constant 0 : i32
    %c0_i32_0 = arith.constant 0 : i32
    %c0_i32_1 = arith.constant 0 : i32
    return %c0_i32, %c0_i32_0 : i32, i32
  }
  func.func @transform_21(%arg0: i32) -> (i32, i32) {
    %c0_i32 = arith.constant 0 : i32
    %c0_i32_0 = arith.constant 0 : i32
    %c0_i32_1 = arith.constant 0 : i32
    return %c0_i32, %c0_i32_0 : i32, i32
  }
  func.func @transform_22(%arg0: i32) -> (i32, i32) {
    %c0_i32 = arith.constant 0 : i32
    %c0_i32_0 = arith.constant 0 : i32
    %c0_i32_1 = arith.constant 0 : i32
    return %c0_i32, %c0_i32_0 : i32, i32
  }
  func.func @transform_23(%arg0: i32) -> (i32, i32) {
    %c0_i32 = arith.constant 0 : i32
    %c0_i32_0 = arith.constant 0 : i32
    %c0_i32_1 = arith.constant 0 : i32
    return %c0_i32, %c0_i32_0 : i32, i32
  }
  func.func @transform_24(%arg0: i32) -> (i32, i32) {
    %c0_i32 = arith.constant 0 : i32
    %c0_i32_0 = arith.constant 0 : i32
    %c0_i32_1 = arith.constant 0 : i32
    return %c0_i32, %c0_i32_0 : i32, i32
  }
  func.func @transform_25(%arg0: i32) -> (i32, i32) {
    %c0_i32 = arith.constant 0 : i32
    %c0_i32_0 = arith.constant 0 : i32
    return %arg0, %c0_i32 : i32, i32
  }
  func.func @transform_26(%arg0: i32) -> (i32, i32) {
    %c0_i32 = arith.constant 0 : i32
    %c0_i32_0 = arith.constant 0 : i32
    return %arg0, %c0_i32 : i32, i32
  }
  func.func @transform_27(%arg0: i32) -> (i32, i32) {
    %c0_i32 = arith.constant 0 : i32
    %c0_i32_0 = arith.constant 0 : i32
    return %arg0, %c0_i32 : i32, i32
  }
  func.func @transform_28(%arg0: i32) -> (i32, i32) {
    %c0_i32 = arith.constant 0 : i32
    %c0_i32_0 = arith.constant 0 : i32
    return %arg0, %c0_i32 : i32, i32
  }
}

</mosaic_0001>

<bundles_post_ra>
// kernel: tpu_custom_call.1
= control target key start
LH: loop header
LB: loop body
LE: loop exit
PB: predicated region body
PF: predicated region fallthrough
CT: control target
= control target key end

     0   :  { %s3193_s0 = inlined_call_operand.hbm [shape: f32[8,128], index: 0, kind: input, shape index: {}]   ;;  %s3194_s1 = inlined_call_operand.hbm [shape: f32[8,128], index: 1, kind: input, shape index: {}]   ;;  %s3195_s2 = inlined_call_operand.hbm [shape: f32[128,128], index: 2, kind: input, shape index: {}]   ;;  %s3196_s3 = inlined_call_operand.vmem [shape: f32[1,128], index: 3, kind: input, shape index: {}]   ;;  %s3197_s4 = inlined_call_operand.vmem [shape: f32[1,128], index: 4, kind: input, shape index: {}]   ;;  %s3198_s5 = inlined_call_operand.vmem [shape: f32[1,128], index: 5, kind: input, shape index: {}]   ;;  %s3199_s6 = inlined_call_operand.hbm [shape: f32[128,128], index: 6, kind: input, shape index: {}]   ;;  %s3200_s7 = inlined_call_operand.vmem [shape: f32[1,128], index: 7, kind: input, shape index: {}]   ;;  %s3201_s8 = inlined_call_operand.hbm [shape: f32[128,128], index: 8, kind: input, shape index: {}]   ;;  %s3202_s9 = inlined_call_operand.hbm [shape: f32[128,128], index: 9, kind: input, shape index: {}]   ;;  %s3203_s10 = inlined_call_operand.vmem [shape: f32[1,128], index: 10, kind: input, shape index: {}]   ;;  %s3204_s11 = inlined_call_operand.vmem [shape: f32[1,128], index: 11, kind: input, shape index: {}]   ;;  %s3205_s12 = inlined_call_operand.vmem [shape: f32[1,128], index: 12, kind: input, shape index: {}]   ;;  %s3206_s13 = inlined_call_operand.hbm [shape: f32[128,128], index: 13, kind: input, shape index: {}]   ;;  %s3207_s14 = inlined_call_operand.vmem [shape: f32[1,128], index: 14, kind: input, shape index: {}]   ;;  %s3208_s15 = inlined_call_operand.vmem [shape: f32[1,128], index: 15, kind: input, shape index: {}]   ;;  %s3209_s16 = inlined_call_operand.vmem [shape: f32[1,128], index: 16, kind: input, shape index: {}]   ;;  %s3210_s17 = inlined_call_operand.hbm [shape: f32[128,640], index: 17, kind: input, shape index: {}]   ;;  %s3211_s18 = inlined_call_operand.vmem [shape: f32[1,640], index: 18, kind: input, shape index: {}]   ;;  %s3212_s19 = inlined_call_operand.hbm [shape: f32[128,128], index: 19, kind: input, shape index: {}]   ;;  %s3213_s20 = inlined_call_operand.vmem [shape: f32[1,128], index: 20, kind: input, shape index: {}]   ;;  %s3214_s21 = inlined_call_operand.vmem [shape: f32[1,128], index: 21, kind: input, shape index: {}]   ;;  %s3215_s22 = inlined_call_operand.vmem [shape: f32[1,128], index: 22, kind: input, shape index: {}]   ;;  %s3216_s23 = inlined_call_operand.hbm [shape: f32[128,128], index: 23, kind: input, shape index: {}]   ;;  %s3217_s24 = inlined_call_operand.vmem [shape: f32[1,128], index: 24, kind: input, shape index: {}]   ;;  %s3218_s25 = inlined_call_operand.hbm [shape: f32[8,128], index: 25, kind: output, shape index: {0}]   ;;  %s3219_s26 = inlined_call_operand.hbm [shape: f32[8,640], index: 26, kind: output, shape index: {1}]   ;;  %s3220_s27 = inlined_call_operand.hbm [shape: f32[8,640], index: 27, kind: output, shape index: {2}]   ;;  %s3221_s28 = inlined_call_operand.hbm [shape: f32[8,640], index: 28, kind: output, shape index: {3}]  }
   0x1   :  { %3233 = sst [smem:[#allocation35_spill]] %s3193_s0 }
   0x2   :  { %3234 = sst [smem:[#allocation36_spill]] %s3194_s1 }
   0x3   :  { %3235 = sst [smem:[#allocation37_spill]] %s3195_s2 }
   0x4   :  { %3236 = sst [smem:[#allocation38_spill]] %s3196_s3 }
   0x5   :  { %3237 = sst [smem:[#allocation39_spill]] %s3197_s4 }
   0x6   :  { %3238 = sst [smem:[#allocation40_spill]] %s3198_s5 }
   0x7   :  { %3239 = sst [smem:[#allocation41_spill]] %s3199_s6 }
   0x8   :  { %3240 = sst [smem:[#allocation42_spill]] %s3200_s7 }
   0x9   :  { %3241 = sst [smem:[#allocation43_spill]] %s3201_s8 }
   0xa   :  { %3242 = sst [smem:[#allocation44_spill]] %s3202_s9 }
   0xb   :  { %3243 = sst [smem:[#allocation45_spill]] %s3203_s10 }
   0xc   :  { %3244 = sst [smem:[#allocation46_spill]] %s3204_s11 }
   0xd   :  { %3245 = sst [smem:[#allocation47_spill]] %s3205_s12 }
   0xe   :  { %3246 = sst [smem:[#allocation48_spill]] %s3217_s24 }
   0xf   :  { %3247 = sst [smem:[#allocation49_spill]] %s3221_s28 }
  0x10   :  { %34 = vsyncpa [#allocation4], 0 }
  0x11   :  { %35 = vsyncpa [#allocation7], 0 }
  0x12   :  { %36 = vsyncpa [#allocation10], 0 }
  0x13   :  { %37 = vsyncpa [#allocation13], 0 }
  0x14   :  { %38 = vsyncpa [#allocation16], 0 }
  0x15   :  { %39 = vsyncpa [#allocation19], 0 }
  0x16   :  { %40 = vsyncpa [#allocation5], 0 }
  0x17   :  { %41 = vsyncpa [#allocation22], 0 }
  0x18   :  { %42 = vsyncpa [#allocation25], 0  ;;  %s2608_s8 = smov [#allocation6]   ;;  %s3248_s3 = sld [smem:[#allocation36_spill]] }
  0x19   :  { %s59_s5 = sshll.u32 %s2608_s8, 4  ;;  %s60_s5 = int_to_ptr.vmem [resolvable:$true] %s59_s5 }
  0x1e   :  { %s2282_s6 = scalar_lea.hbm %s3248_s3, 128 }
  0x1f   :  { %p2283_p0 = scmp.ne.s32.totalorder %s3248_s3, %s2282_s6  ;;  %p2286_p1 = scmp.lt.u32.totalorder %s2282_s6, %s3248_s3 }
  0x21   :  { %p2288_p2 = pnand %p2286_p1, %p2283_p0 }
  0x23   :  { %2291 = shalt.err (!%p2288_p2)
}
  0x24   :  { %s2292_s2 = scalar_lea.vmem %s60_s5, 128  ;;  %p2297_p4 = scmp.lt.s32.totalorder %s60_s5, %s60_s5 }
  0x25   :  { %p2293_p3 = scmp.ne.s32.totalorder %s60_s5, %s2292_s2  ;;  %p2298_p5 = scmp.lt.s32.totalorder %s2292_s2, %s2292_s2 }
  0x27   :  { %p2299_p6 = por %p2298_p5, %p2297_p4 }
  0x29   :  { %p2300_p7 = pnand %p2299_p6, %p2293_p3 }
  0x2b   :  { %2303 = shalt.err (!%p2300_p7)
}
  0x2c   :  { %62 = dma.hbm_to_vmem [thread:$0]  %s3248_s3, 128, %s60_s5, [#allocation7]  }
  0x2d   :  { %s2609_s1 = smov [#allocation9]   ;;  %s2610_s8 = smov [#allocation12]  }
  0x2e   :  { %s86_s4 = sshll.u32 %s2609_s1, 4  ;;  %s112_s9 = sshll.u32 %s2610_s8, 4  ;;  %s87_s4 = int_to_ptr.vmem [resolvable:$true] %s86_s4  ;;  %s113_s9 = int_to_ptr.vmem [resolvable:$true] %s112_s9 }
  0x2f   :  { %s3249_s10 = sld [smem:[#allocation41_spill]] }
  0x35   :  { %s2304_s0 = scalar_lea.hbm %s3249_s10, 2048 }
  0x36   :  { %p2305_p8 = scmp.ne.s32.totalorder %s3249_s10, %s2304_s0  ;;  %p2308_p9 = scmp.lt.u32.totalorder %s2304_s0, %s3249_s10 }
  0x38   :  { %p2310_p10 = pnand %p2308_p9, %p2305_p8 }
  0x3a   :  { %2313 = shalt.err (!%p2310_p10)
}
  0x3b   :  { %s2314_s5 = scalar_lea.vmem %s87_s4, 2048  ;;  %p2319_p12 = scmp.lt.s32.totalorder %s87_s4, %s87_s4 }
  0x3c   :  { %p2315_p11 = scmp.ne.s32.totalorder %s87_s4, %s2314_s5  ;;  %p2320_p13 = scmp.lt.s32.totalorder %s2314_s5, %s2314_s5 }
  0x3e   :  { %p2321_p0 = por %p2320_p13, %p2319_p12 }
  0x40   :  { %p2322_p1 = pnand %p2321_p0, %p2315_p11 }
  0x42   :  { %2325 = shalt.err (!%p2322_p1)
}
  0x43   :  { %s3229_s3 = smov 128   ;;  %s3231_s7 = smov 8  }
  0x44   :  { %92 = dma.hbm_to_vmem [thread:$0]  %s3249_s10, 2048, %s87_s4, [#allocation10], %s3229_s3, %s3229_s3, %s3231_s7  }
  0x45   :  { %s3250_s30 = sld [smem:[#allocation44_spill]] }
  0x4b   :  { %s2326_s6 = scalar_lea.hbm %s3250_s30, 2048 }
  0x4c   :  { %p2327_p2 = scmp.ne.s32.totalorder %s3250_s30, %s2326_s6  ;;  %p2330_p3 = scmp.lt.u32.totalorder %s2326_s6, %s3250_s30 }
  0x4e   :  { %p2332_p4 = pnand %p2330_p3, %p2327_p2 }
  0x50   :  { %2335 = shalt.err (!%p2332_p4)
}
  0x51   :  { %s2336_s5 = scalar_lea.vmem %s113_s9, 2048  ;;  %p2341_p6 = scmp.lt.s32.totalorder %s113_s9, %s113_s9 }
  0x52   :  { %p2337_p5 = scmp.ne.s32.totalorder %s113_s9, %s2336_s5  ;;  %p2342_p7 = scmp.lt.s32.totalorder %s2336_s5, %s2336_s5 }
  0x54   :  { %p2343_p8 = por %p2342_p7, %p2341_p6 }
  0x56   :  { %p2344_p9 = pnand %p2343_p8, %p2337_p5 }
  0x58   :  { %2347 = shalt.err (!%p2344_p9)
}
  0x59   :  { %118 = dma.hbm_to_vmem [thread:$0]  %s3250_s30, 2048, %s113_s9, [#allocation13], %s3229_s3, %s3229_s3, %s3231_s7  }
  0x5a   :  { %s2613_s12 = smov [#allocation15]   ;;  %s2348_s6 = scalar_lea.hbm %s3210_s17, 10240 }
  0x5b   :  { %s148_s1 = sshll.u32 %s2613_s12, 4  ;;  %p2349_p10 = scmp.ne.s32.totalorder %s3210_s17, %s2348_s6  ;;  %s149_s1 = int_to_ptr.vmem [resolvable:$true] %s148_s1 }
  0x5c   :  { %p2352_p11 = scmp.lt.u32.totalorder %s2348_s6, %s3210_s17 }
  0x5e   :  { %p2354_p12 = pnand %p2352_p11, %p2349_p10 }
  0x60   :  { %2357 = shalt.err (!%p2354_p12)
}
  0x61   :  { %s2358_s5 = scalar_lea.vmem %s149_s1, 10240  ;;  %p2363_p0 = scmp.lt.s32.totalorder %s149_s1, %s149_s1 }
  0x62   :  { %p2359_p13 = scmp.ne.s32.totalorder %s149_s1, %s2358_s5  ;;  %p2364_p1 = scmp.lt.s32.totalorder %s2358_s5, %s2358_s5 }
  0x64   :  { %p2365_p2 = por %p2364_p1, %p2363_p0 }
  0x66   :  { %p2366_p3 = pnand %p2365_p2, %p2359_p13 }
  0x68   :  { %2369 = shalt.err (!%p2366_p3)
}
  0x69   :  { %s2614_s9 = smov 640   ;;  %s2615_s30 = smov 40  }
  0x6a   :  { %154 = dma.hbm_to_vmem [thread:$0]  %s3210_s17, 10240, %s149_s1, [#allocation16], %s2614_s9, %s2614_s9, %s2615_s30  }
  0x6b   :  { %s2616_s12 = smov [#allocation3]   ;;  %s2617_s8 = smov [#allocation8]  }
  0x6c   :  { %s49_s28 = sshll.u32 %s2616_s12, 4  ;;  %s68_s0 = sshll.u32 %s2617_s8, 4  ;;  %s50_s28 = int_to_ptr.vmem [resolvable:$true] %s49_s28  ;;  %s2828_s0 = int_to_ptr.vmem [resolvable:$true] %s68_s0 }
  0x6d   :  { %s3251_s29 = sld [smem:[#allocation35_spill]] }
  0x73   :  { %s2370_s2 = scalar_lea.hbm %s3251_s29, 128 }
  0x74   :  { %p2371_p4 = scmp.ne.s32.totalorder %s3251_s29, %s2370_s2  ;;  %p2374_p5 = scmp.lt.u32.totalorder %s2370_s2, %s3251_s29 }
  0x76   :  { %p2376_p6 = pnand %p2374_p5, %p2371_p4 }
  0x78   :  { %2379 = shalt.err (!%p2376_p6)
}
  0x79   :  { %s2380_s17 = scalar_lea.vmem %s50_s28, 128  ;;  %p2385_p8 = scmp.lt.s32.totalorder %s50_s28, %s50_s28 }
  0x7a   :  { %p2381_p7 = scmp.ne.s32.totalorder %s50_s28, %s2380_s17  ;;  %p2386_p9 = scmp.lt.s32.totalorder %s2380_s17, %s2380_s17 }
  0x7c   :  { %p2387_p10 = por %p2386_p9, %p2385_p8 }
  0x7e   :  { %p2388_p11 = pnand %p2387_p10, %p2381_p7 }
  0x80   :  { %2391 = shalt.err (!%p2388_p11)
}
  0x81   :  { %52 = dma.hbm_to_vmem [thread:$0]  %s3251_s29, 128, %s50_s28, [#allocation4]  }
  0x82   :  { %s3252_s4 = sld [smem:[#allocation37_spill]] }
  0x88   :  { %s2392_s10 = scalar_lea.hbm %s3252_s4, 2048 }
  0x89   :  { %p2393_p12 = scmp.ne.s32.totalorder %s3252_s4, %s2392_s10  ;;  %p2396_p13 = scmp.lt.u32.totalorder %s2392_s10, %s3252_s4 }
  0x8b   :  { %p2398_p0 = pnand %p2396_p13, %p2393_p12 }
  0x8d   :  { %2401 = shalt.err (!%p2398_p0)
}
  0x8e   :  { %s2402_s6 = scalar_lea.vmem %s2828_s0, 2048  ;;  %p2407_p2 = scmp.lt.s32.totalorder %s2828_s0, %s2828_s0 }
  0x8f   :  { %p2403_p1 = scmp.ne.s32.totalorder %s2828_s0, %s2402_s6  ;;  %p2408_p3 = scmp.lt.s32.totalorder %s2402_s6, %s2402_s6 }
  0x91   :  { %p2409_p4 = por %p2408_p3, %p2407_p2 }
  0x93   :  { %p2410_p5 = pnand %p2409_p4, %p2403_p1 }
  0x95   :  { %2413 = shalt.err (!%p2410_p5)
}
  0x96   :  { %s3253_s28 = smov 8   ;;  %s3254_s11 = smov 128  }
  0x97   :  { %74 = dma.hbm_to_vmem [thread:$0]  %s3252_s4, 2048, %s2828_s0, [#allocation7], %s3254_s11, %s3254_s11, %s3253_s28  }
  0x98   :  { %s2618_s5 = smov [#allocation11]   ;;  %s2619_s1 = smov [#allocation14]  }
  0x99   :  { %s100_s17 = sshll.u32 %s2618_s5, 4  ;;  %s130_s9 = sshll.u32 %s2619_s1, 4  ;;  %s101_s17 = int_to_ptr.vmem [resolvable:$true] %s100_s17  ;;  %s2862_s9 = int_to_ptr.vmem [resolvable:$true] %s130_s9 }
  0x9a   :  { %s3255_s10 = sld [smem:[#allocation43_spill]] }
  0xa0   :  { %s2414_s12 = scalar_lea.hbm %s3255_s10, 2048 }
  0xa1   :  { %p2415_p6 = scmp.ne.s32.totalorder %s3255_s10, %s2414_s12  ;;  %p2418_p7 = scmp.lt.u32.totalorder %s2414_s12, %s3255_s10 }
  0xa3   :  { %p2420_p8 = pnand %p2418_p7, %p2415_p6 }
  0xa5   :  { %2423 = shalt.err (!%p2420_p8)
}
  0xa6   :  { %s2424_s0 = scalar_lea.vmem %s101_s17, 2048  ;;  %p2429_p10 = scmp.lt.s32.totalorder %s101_s17, %s101_s17 }
  0xa7   :  { %p2425_p9 = scmp.ne.s32.totalorder %s101_s17, %s2424_s0  ;;  %p2430_p11 = scmp.lt.s32.totalorder %s2424_s0, %s2424_s0 }
  0xa9   :  { %p2431_p12 = por %p2430_p11, %p2429_p10 }
  0xab   :  { %p2432_p13 = pnand %p2431_p12, %p2425_p9 }
  0xad   :  { %2435 = shalt.err (!%p2432_p13)
}
  0xae   :  { %106 = dma.hbm_to_vmem [thread:$0]  %s3255_s10, 2048, %s101_s17, [#allocation10], %s3254_s11, %s3254_s11, %s3253_s28  }
  0xaf   :  { %s2436_s1 = scalar_lea.hbm %s3206_s13, 2048 }
  0xb0   :  { %p2437_p0 = scmp.ne.s32.totalorder %s3206_s13, %s2436_s1  ;;  %p2440_p1 = scmp.lt.u32.totalorder %s2436_s1, %s3206_s13 }
  0xb2   :  { %p2442_p2 = pnand %p2440_p1, %p2437_p0 }
  0xb4   :  { %2445 = shalt.err (!%p2442_p2)
}
  0xb5   :  { %s2446_s7 = scalar_lea.vmem %s2862_s9, 2048  ;;  %p2451_p4 = scmp.lt.s32.totalorder %s2862_s9, %s2862_s9 }
  0xb6   :  { %p2447_p3 = scmp.ne.s32.totalorder %s2862_s9, %s2446_s7  ;;  %p2452_p5 = scmp.lt.s32.totalorder %s2446_s7, %s2446_s7 }
  0xb8   :  { %p2453_p6 = por %p2452_p5, %p2451_p4 }
  0xba   :  { %p2454_p7 = pnand %p2453_p6, %p2447_p3 }
  0xbc   :  { %2457 = shalt.err (!%p2454_p7)
}
  0xbd   :  { %136 = dma.hbm_to_vmem [thread:$0]  %s3206_s13, 2048, %s2862_s9, [#allocation13], %s3254_s11, %s3254_s11, %s3253_s28  }
  0xbe   :  { %s2620_s8 = smov [#allocation17]   ;;  %s2621_s0 = smov [#allocation18]  }
  0xbf   :  { %s162_s6 = sshll.u32 %s2620_s8, 4  ;;  %s180_s4 = sshll.u32 %s2621_s0, 4  ;;  %s163_s6 = int_to_ptr.vmem [resolvable:$true] %s162_s6  ;;  %s2899_s4 = int_to_ptr.vmem [resolvable:$true] %s180_s4 }
  0xc0   :  { %s2458_s5 = scalar_lea.hbm %s3212_s19, 2048 }
  0xc1   :  { %p2459_p8 = scmp.ne.s32.totalorder %s3212_s19, %s2458_s5  ;;  %p2462_p9 = scmp.lt.u32.totalorder %s2458_s5, %s3212_s19 }
  0xc3   :  { %p2464_p10 = pnand %p2462_p9, %p2459_p8 }
  0xc5   :  { %2467 = shalt.err (!%p2464_p10)
}
  0xc6   :  { %s2468_s13 = scalar_lea.vmem %s163_s6, 2048  ;;  %p2473_p12 = scmp.lt.s32.totalorder %s163_s6, %s163_s6 }
  0xc7   :  { %p2469_p11 = scmp.ne.s32.totalorder %s163_s6, %s2468_s13  ;;  %p2474_p13 = scmp.lt.s32.totalorder %s2468_s13, %s2468_s13 }
  0xc9   :  { %p2475_p0 = por %p2474_p13, %p2473_p12 }
  0xcb   :  { %p2476_p1 = pnand %p2475_p0, %p2469_p11 }
  0xcd   :  { %2479 = shalt.err (!%p2476_p1)
}
  0xce   :  { %168 = dma.hbm_to_vmem [thread:$0]  %s3212_s19, 2048, %s163_s6, [#allocation16], %s3254_s11, %s3254_s11, %s3253_s28  }
  0xcf   :  { %s2480_s10 = scalar_lea.hbm %s3216_s23, 2048 }
  0xd0   :  { %p2481_p2 = scmp.ne.s32.totalorder %s3216_s23, %s2480_s10  ;;  %p2484_p3 = scmp.lt.u32.totalorder %s2480_s10, %s3216_s23 }
  0xd2   :  { %p2486_p4 = pnand %p2484_p3, %p2481_p2 }
  0xd4   :  { %2489 = shalt.err (!%p2486_p4)
}
  0xd5   :  { %s2490_s5 = scalar_lea.vmem %s2899_s4, 2048  ;;  %p2495_p6 = scmp.lt.s32.totalorder %s2899_s4, %s2899_s4 }
  0xd6   :  { %p2491_p5 = scmp.ne.s32.totalorder %s2899_s4, %s2490_s5  ;;  %p2496_p7 = scmp.lt.s32.totalorder %s2490_s5, %s2490_s5 }
  0xd8   :  { %p2497_p8 = por %p2496_p7, %p2495_p6 }
  0xda   :  { %p2498_p9 = pnand %p2497_p8, %p2491_p5 }
  0xdc   :  { %2501 = shalt.err (!%p2498_p9)
}
  0xdd   :  { %186 = dma.hbm_to_vmem [thread:$0]  %s3216_s23, 2048, %s2899_s4, [#allocation19], %s3254_s11, %s3254_s11, %s3253_s28  }
  0xde   :  { %2590 = dma.done.wait [#allocation4], 128  }
  0xdf   :  { %2591 = vsyncadd [#allocation4], 4294967168 }
  0xe0   :  { %2592 = dma.done.wait [#allocation7], 2176  }
  0xe1   :  { %2593 = vsyncadd [#allocation7], 4294965120 }
  0xe2   :  { %2594 = dma.done.wait [#allocation10], 4096  }
  0xe3   :  { %2595 = vsyncadd [#allocation10], 4294963200 }
  0xe4   :  { %2596 = dma.done.wait [#allocation13], 4096  }
  0xe5   :  { %2597 = vsyncadd [#allocation13], 4294963200 }
  0xe6   :  { %2598 = dma.done.wait [#allocation16], 12288  }
  0xe7   :  { %2599 = vsyncadd [#allocation16], 4294955008 }
  0xe8   :  { %2600 = dma.done.wait [#allocation19], 2048  }
  0xe9   :  { %2601 = vsyncadd [#allocation19], 4294965248  ;;  %v2622_v0 = vmov 0.0|0.0   ;;  %vm2623_vm0 = vmmov 0   ;;  %v2624_v1 = vmov 0.0   ;;  %v225_v2 = vld [vmem:[#allocation8] sm:$0xff] }
  0xea   :  { %1981 = vmatprep.subr.bf16.mxu0 %v2622_v0  ;;  %1709 = vmatprep.mubr.msk.f32.mxu0 %vm2623_vm0, %v2624_v1  ;;  %v226_v3 = vld [vmem:[#allocation8 + $0x8] sm:$0xff]  ;;  %v227_v4 = vld [vmem:[#allocation8 + $0x10] sm:$0xff]  ;;  %v228_v6 = vld [vmem:[#allocation8 + $0x18] sm:$0xff]  ;;  %s3256_s11 = sld [smem:[#allocation38_spill]]  ;;  %s3257_s30 = sld [smem:[#allocation45_spill]] }
  0xeb   :  { %2005 = vmatprep.subr.bf16.mxu1 %v2622_v0  ;;  %1744 = vmatprep.mubr.msk.f32.mxu1 %vm2623_vm0, %v2624_v1  ;;  %v1982_v5 = vpack.c.bf16 %v226_v3, %v225_v2  ;;  %v1985_v7 = vpack.c.bf16 %v228_v6, %v227_v4  ;;  %v229_v8 = vld [vmem:[#allocation8 + $0x20] sm:$0xff]  ;;  %v230_v9 = vld [vmem:[#allocation8 + $0x28] sm:$0xff]  ;;  %v231_v11 = vld [vmem:[#allocation8 + $0x30] sm:$0xff]  ;;  %s3258_s13 = sld [smem:[#allocation39_spill]]  ;;  %s3259_s7 = sld [smem:[#allocation40_spill]] }
  0xec   :  { %v1988_v10 = vpack.c.bf16 %v230_v9, %v229_v8  ;;  %v232_v12 = vld [vmem:[#allocation8 + $0x38] sm:$0xff]  ;;  %v233_v14 = vld [vmem:[#allocation8 + $0x40] sm:$0xff]  ;;  %v234_v15 = vld [vmem:[#allocation8 + $0x48] sm:$0xff]  ;;  %s3260_s8 = sld [smem:[#allocation46_spill]]  ;;  %s3261_s2 = sld [smem:[#allocation47_spill]] }
  0xed   :  { %1983 = vmatpush3.bf16.msra.mxu0 %v1982_v5  ;;  %v1991_v13 = vpack.c.bf16 %v232_v12, %v231_v11  ;;  %v1994_v16 = vpack.c.bf16 %v234_v15, %v233_v14  ;;  %v235_v17 = vld [vmem:[#allocation8 + $0x50] sm:$0xff]  ;;  %v236_v18 = vld [vmem:[#allocation8 + $0x58] sm:$0xff]  ;;  %v237_v20 = vld [vmem:[#allocation8 + $0x60] sm:$0xff]  ;;  %v220_v14 = vlaneseq  ;;  %s3262_s6 = sld [smem:[#allocation42_spill]]  ;;  %s2626_s9 = smov [#allocation20]  }
  0xee   :  { %1984 = vmatprep.subr.bf16.mxu0 %v2622_v0  ;;  %v1997_v19 = vpack.c.bf16 %v236_v18, %v235_v17  ;;  %v238_v21 = vld [vmem:[#allocation8 + $0x68] sm:$0xff]  ;;  %v239_v23 = vld [vmem:[#allocation8 + $0x70] sm:$0xff]  ;;  %v240_v24 = vld [vmem:[#allocation8 + $0x78] sm:$0xff]  ;;  %s1462_s24 = sshll.u32 %s2626_s9, 4  ;;  %s1463_s24 = int_to_ptr.vmem [resolvable:$true] %s1462_s24 }
  0xef   :  { %v2000_v22 = vpack.c.bf16 %v238_v21, %v237_v20  ;;  %v2003_v25 = vpack.c.bf16 %v240_v24, %v239_v23  ;;  %v448_v26 = vld [vmem:[#allocation11] sm:$0xff]  ;;  %v449_v27 = vld [vmem:[#allocation11 + $0x8] sm:$0xff]  ;;  %v2949_v28 = vld [vmem:[#allocation3] sm:$0xff]  ;;  %v221_v15 = vand.u32 127, %v220_v14 }
  0xf0   :  { %v2030_v29 = vpack.c.bf16 %v449_v27, %v448_v26  ;;  %v450_v30 = vld [vmem:[#allocation11 + $0x10] sm:$0xff]  ;;  %v451_v31 = vld [vmem:[#allocation11 + $0x18] sm:$0xff]  ;;  %v452_v33 = vld [vmem:[#allocation11 + $0x20] sm:$0xff] }
  0xf1   :  { %1986 = vmatpush3.bf16.msra.mxu0 %v1985_v7  ;;  %v2033_v32 = vpack.c.bf16 %v451_v31, %v450_v30  ;;  %v453_v34 = vld [vmem:[#allocation11 + $0x28] sm:$0xff]  ;;  %v454_v36 = vld [vmem:[#allocation11 + $0x30] sm:$0xff]  ;;  %v455_v37 = vld [vmem:[#allocation11 + $0x38] sm:$0xff]  ;;  %vm222_vm1 = vcmp.lt.s32.totalorder %v221_v15, 32 }
  0xf2   :  { %1987 = vmatprep.subr.bf16.mxu0 %v2622_v0  ;;  %v2036_v35 = vpack.c.bf16 %v453_v34, %v452_v33  ;;  %v2039_v38 = vpack.c.bf16 %v455_v37, %v454_v36  ;;  %v456_v39 = vld [vmem:[#allocation11 + $0x40] sm:$0xff]  ;;  %v457_v40 = vld [vmem:[#allocation11 + $0x48] sm:$0xff]  ;;  %v458_v42 = vld [vmem:[#allocation11 + $0x50] sm:$0xff]  ;;  %v2979_v18 = vsel %vm222_vm1, 1.0, %v2624_v1 }
  0xf3   :  { %v2042_v41 = vpack.c.bf16 %v457_v40, %v456_v39  ;;  %v459_v43 = vld [vmem:[#allocation11 + $0x58] sm:$0xff]  ;;  %v460_v45 = vld [vmem:[#allocation11 + $0x60] sm:$0xff]  ;;  %v461_v46 = vld [vmem:[#allocation11 + $0x68] sm:$0xff] }
  0xf4   :  { %v2045_v44 = vpack.c.bf16 %v459_v43, %v458_v42  ;;  %v2048_v47 = vpack.c.bf16 %v461_v46, %v460_v45  ;;  %v462_v48 = vld [vmem:[#allocation11 + $0x70] sm:$0xff]  ;;  %v463_v49 = vld [vmem:[#allocation11 + $0x78] sm:$0xff]  ;;  %v542_v51 = vld [vmem:[#allocation12] sm:$0xff] }
  0xf5   :  { %1989 = vmatpush3.bf16.msra.mxu0 %v1988_v10  ;;  %v2051_v50 = vpack.c.bf16 %v463_v49, %v462_v48  ;;  %v543_v52 = vld [vmem:[#allocation12 + $0x8] sm:$0xff]  ;;  %v544_v54 = vld [vmem:[#allocation12 + $0x10] sm:$0xff]  ;;  %v545_v55 = vld [vmem:[#allocation12 + $0x18] sm:$0xff] }
  0xf6   :  { %1990 = vmatprep.subr.bf16.mxu0 %v2622_v0  ;;  %v2054_v53 = vpack.c.bf16 %v543_v52, %v542_v51  ;;  %v2057_v56 = vpack.c.bf16 %v545_v55, %v544_v54  ;;  %v546_v57 = vld [vmem:[#allocation12 + $0x20] sm:$0xff]  ;;  %v547_v58 = vld [vmem:[#allocation12 + $0x28] sm:$0xff]  ;;  %v548_v60 = vld [vmem:[#allocation12 + $0x30] sm:$0xff] }
  0xf7   :  { %v2060_v59 = vpack.c.bf16 %v547_v58, %v546_v57  ;;  %v549_v61 = vld [vmem:[#allocation12 + $0x38] sm:$0xff]  ;;  %v550_v63 = vld [vmem:[#allocation12 + $0x40] sm:$0xff]  ;;  %v551_v2 = vld [vmem:[#allocation12 + $0x48] sm:$0xff] }
  0xf8   :  { %v2063_v62 = vpack.c.bf16 %v549_v61, %v548_v60  ;;  %v2066_v3 = vpack.c.bf16 %v551_v2, %v550_v63  ;;  %v552_v4 = vld [vmem:[#allocation12 + $0x50] sm:$0xff]  ;;  %v553_v5 = vld [vmem:[#allocation12 + $0x58] sm:$0xff]  ;;  %v554_v7 = vld [vmem:[#allocation12 + $0x60] sm:$0xff] }
  0xf9   :  { %1992 = vmatpush3.bf16.msra.mxu0 %v1991_v13  ;;  %v2069_v6 = vpack.c.bf16 %v553_v5, %v552_v4  ;;  %v555_v8 = vld [vmem:[#allocation12 + $0x68] sm:$0xff]  ;;  %v556_v10 = vld [vmem:[#allocation12 + $0x70] sm:$0xff]  ;;  %v557_v11 = vld [vmem:[#allocation12 + $0x78] sm:$0xff] }
  0xfa   :  { %1993 = vmatprep.subr.bf16.mxu0 %v2622_v0  ;;  %v2072_v9 = vpack.c.bf16 %v555_v8, %v554_v7  ;;  %v2075_v12 = vpack.c.bf16 %v557_v11, %v556_v10  ;;  %v541_v13 = vld [vmem:[#allocation6] sm:$0xff]  ;;  %v348_v27 = vld [vmem:[#allocation9] sm:$0xff]  ;;  %v350_v30 = vld [vmem:[#allocation9 + $0x10] sm:$0xff] }
  0xfb   :  { %v352_v39 = vld [vmem:[#allocation9 + $0x20] sm:$0xff]  ;;  %v353_v40 = vld [vmem:[#allocation9 + $0x28] sm:$0xff]  ;;  %v354_v42 = vld [vmem:[#allocation9 + $0x30] sm:$0xff] }
  0xfc   :  { %v355_v43 = vld [vmem:[#allocation9 + $0x38] sm:$0xff]  ;;  %v356_v45 = vld [vmem:[#allocation9 + $0x40] sm:$0xff]  ;;  %v357_v46 = vld [vmem:[#allocation9 + $0x48] sm:$0xff] }
  0xfd   :  { %1995 = vmatpush3.bf16.msra.mxu0 %v1994_v16  ;;  %v1518_v16 = vld [vmem:[%s3256_s11] ss:$0 sm:$0xff]  ;;  %v359_v49 = vld [vmem:[#allocation9 + $0x58] sm:$0xff]  ;;  %v360_v51 = vld [vmem:[#allocation9 + $0x60] sm:$0xff] }
  0xfe   :  { %1996 = vmatprep.subr.bf16.mxu0 %v2622_v0  ;;  %v358_v48 = vld [vmem:[#allocation9 + $0x50] sm:$0xff]  ;;  %v361_v52 = vld [vmem:[#allocation9 + $0x68] sm:$0xff]  ;;  %v363_v55 = vld [vmem:[#allocation9 + $0x78] sm:$0xff] }
  0xff   :  { %v362_v54 = vld [vmem:[#allocation9 + $0x70] sm:$0xff]  ;;  %v659_v8 = vld [vmem:[#allocation14] sm:$0xff]  ;;  %v662_v15 = vld [vmem:[#allocation14 + $0x18] sm:$0xff] }
 0x100   :  { %v1519_v4 = vld [vmem:[%s3258_s13] ss:$0 sm:$0xff] }
 0x101   :  { %1998 = vmatpush3.bf16.msra.mxu0 %v1997_v19 }
 0x102   :  { %1999 = vmatprep.subr.bf16.mxu0 %v2622_v0 }
 0x105   :  { %2001 = vmatpush3.bf16.msra.mxu0 %v2000_v22  ;;  %v1523_v22 = vld [vmem:[%s3257_s30] ss:$0 sm:$0xff] }
 0x106   :  { %2002 = vmatprep.subr.bf16.mxu0 %v2622_v0 }
 0x109   :  { %2004 = vmatpush3.bf16.msra.mxu0 %v2003_v25 }
 0x10a   :  { %2029 = vmatprep.subr.bf16.mxu0 %v2622_v0 }
 0x10c   :  { %1710 = vmatmul.mubr.f32.vlgmr.msra.gmra.mrb[0].mxu0 %v2949_v28 }
 0x10d   :  { %2031 = vmatpush3.bf16.msra.mxu0 %v2030_v29  ;;  %1779 = vmatprep.mubr.msk.f32.mxu0 %vm2623_vm0, %v2624_v1  ;;  %v349_v29 = vld [vmem:[#allocation9 + $0x8] sm:$0xff] }
 0x10e   :  { %2032 = vmatprep.subr.bf16.mxu0 %v2622_v0  ;;  %v2006_v31 = vpack.c.bf16 %v349_v29, %v348_v27  ;;  %v669_v27 = vld [vmem:[#allocation14 + $0x50] sm:$0xff]  ;;  %v670_v29 = vld [vmem:[#allocation14 + $0x58] sm:$0xff] }
 0x110   :  { %2007 = vmatpush3.bf16.msra.mxu1 %v2006_v31  ;;  %v671_v31 = vld [vmem:[#allocation14 + $0x60] sm:$0xff] }
 0x111   :  { %2034 = vmatpush3.bf16.msra.mxu0 %v2033_v32  ;;  %v351_v32 = vld [vmem:[#allocation9 + $0x18] sm:$0xff]  ;;  %2008 = vmatprep.subr.bf16.mxu1 %v2622_v0 }
 0x112   :  { %2035 = vmatprep.subr.bf16.mxu0 %v2622_v0  ;;  %v2009_v33 = vpack.c.bf16 %v351_v32, %v350_v30  ;;  %v2093_v30 = vpack.c.bf16 %v670_v29, %v669_v27  ;;  %v672_v32 = vld [vmem:[#allocation14 + $0x68] sm:$0xff]  ;;  %v802_v27 = vld [vmem:[#allocation15 + $0xa0] sm:$0xff] }
 0x113   :  { %v807_v29 = vld [vmem:[#allocation15 + $0xc8] sm:$0xff] }
 0x114   :  { %2010 = vmatpush3.bf16.msra.mxu1 %v2009_v33  ;;  %v2096_v33 = vpack.c.bf16 %v672_v32, %v671_v31  ;;  %v810_v31 = vld [vmem:[#allocation15 + $0xe0] sm:$0xff]  ;;  %v2111_v32 = vpack.c.bf16 %v807_v29, %v802_v27 }
 0x115   :  { %2037 = vmatpush3.bf16.msra.mxu0 %v2036_v35  ;;  %2011 = vmatprep.subr.bf16.mxu1 %v2622_v0 }
 0x116   :  { %2038 = vmatprep.subr.bf16.mxu0 %v2622_v0 }
 0x119   :  { %2040 = vmatpush3.bf16.msra.mxu0 %v2039_v38 }
 0x11a   :  { %2041 = vmatprep.subr.bf16.mxu0 %v2622_v0 }
 0x11d   :  { %2043 = vmatpush3.bf16.msra.mxu0 %v2042_v41  ;;  %v2012_v41 = vpack.c.bf16 %v353_v40, %v352_v39 }
 0x11e   :  { %2044 = vmatprep.subr.bf16.mxu0 %v2622_v0 }
 0x11f   :  { %2013 = vmatpush3.bf16.msra.mxu1 %v2012_v41  ;;  %v1524_v41 = vld [vmem:[%s3260_s8] ss:$0 sm:$0xff] }
 0x120   :  { %2014 = vmatprep.subr.bf16.mxu1 %v2622_v0 }
 0x121   :  { %2046 = vmatpush3.bf16.msra.mxu0 %v2045_v44  ;;  %v2015_v44 = vpack.c.bf16 %v355_v43, %v354_v42  ;;  %v1525_v43 = vld [vmem:[%s3261_s2] ss:$0 sm:$0xff] }
 0x122   :  { %2047 = vmatprep.subr.bf16.mxu0 %v2622_v0 }
 0x123   :  { %2016 = vmatpush3.bf16.msra.mxu1 %v2015_v44 }
 0x124   :  { %2017 = vmatprep.subr.bf16.mxu1 %v2622_v0 }
 0x125   :  { %2049 = vmatpush3.bf16.msra.mxu0 %v2048_v47  ;;  %v2018_v47 = vpack.c.bf16 %v357_v46, %v356_v45 }
 0x126   :  { %2050 = vmatprep.subr.bf16.mxu0 %v2622_v0 }
 0x127   :  { %2019 = vmatpush3.bf16.msra.mxu1 %v2018_v47  ;;  %v1521_v47 = vld [vmem:[%s3262_s6] ss:$0 sm:$0xff] }
 0x128   :  { %2020 = vmatprep.subr.bf16.mxu1 %v2622_v0 }
 0x129   :  { %2052 = vmatpush3.bf16.msra.mxu0 %v2051_v50  ;;  %v2021_v50 = vpack.c.bf16 %v359_v49, %v358_v48 }
 0x12a   :  { %2053 = vmatprep.subr.bf16.mxu0 %v2622_v0 }
 0x12b   :  { %2022 = vmatpush3.bf16.msra.mxu1 %v2021_v50 }
 0x12c   :  { %1780 = vmatmul.mubr.f32.vlgmr.msra.gmra.mrb[2].mxu0 %v2949_v28  ;;  %2023 = vmatprep.subr.bf16.mxu1 %v2622_v0 }
 0x12d   :  { %2055 = vmatpush3.bf16.msra.mxu0 %v2054_v53  ;;  %1814 = vmatprep.mubr.msk.f32.mxu0 %vm2623_vm0, %v2624_v1  ;;  %v2024_v53 = vpack.c.bf16 %v361_v52, %v360_v51 }
 0x12e   :  { %2056 = vmatprep.subr.bf16.mxu0 %v2622_v0 }
 0x12f   :  { %2025 = vmatpush3.bf16.msra.mxu1 %v2024_v53 }
 0x130   :  { %2026 = vmatprep.subr.bf16.mxu1 %v2622_v0 }
 0x131   :  { %2058 = vmatpush3.bf16.msra.mxu0 %v2057_v56  ;;  %v2027_v56 = vpack.c.bf16 %v363_v55, %v362_v54  ;;  %v1526_v55 = vld [vmem:[%s3207_s14] ss:$0 sm:$0xff] }
 0x132   :  { %2059 = vmatprep.subr.bf16.mxu0 %v2622_v0 }
 0x133   :  { %2028 = vmatpush3.bf16.msra.mxu1 %v2027_v56 }
 0x134   :  { %2077 = vmatprep.subr.bf16.mxu1 %v2622_v0 }
 0x135   :  { %2061 = vmatpush3.bf16.msra.mxu0 %v2060_v59 }
 0x136   :  { %2062 = vmatprep.subr.bf16.mxu0 %v2622_v0 }
 0x139   :  { %2064 = vmatpush3.bf16.msra.mxu0 %v2063_v62 }
 0x13a   :  { %2065 = vmatprep.subr.bf16.mxu0 %v2622_v0 }
 0x13d   :  { %2067 = vmatpush3.bf16.msra.mxu0 %v2066_v3 }
 0x13e   :  { %2068 = vmatprep.subr.bf16.mxu0 %v2622_v0 }
 0x141   :  { %2070 = vmatpush3.bf16.msra.mxu0 %v2069_v6  ;;  %v1520_v6 = vld [vmem:[%s3259_s7] ss:$0 sm:$0xff] }
 0x142   :  { %2071 = vmatprep.subr.bf16.mxu0 %v2622_v0 }
 0x145   :  { %2073 = vmatpush3.bf16.msra.mxu0 %v2072_v9  ;;  %v660_v9 = vld [vmem:[#allocation14 + $0x8] sm:$0xff] }
 0x146   :  { %2074 = vmatprep.subr.bf16.mxu0 %v2622_v0  ;;  %v2078_v11 = vpack.c.bf16 %v660_v9, %v659_v8  ;;  %v789_v8 = vld [vmem:[#allocation15 + $0x38] sm:$0xff] }
 0x147   :  { %v793_v9 = vld [vmem:[#allocation15 + $0x58] sm:$0xff] }
 0x149   :  { %2076 = vmatpush3.bf16.msra.mxu0 %v2075_v12 }
 0x14c   :  { %1815 = vmatmul.mubr.f32.vlgmr.msra.gmra.mrb[2].mxu0 %v541_v13  ;;  %v661_v13 = vld [vmem:[#allocation14 + $0x10] sm:$0xff] }
 0x14d   :  { %1024 = vmatprep.mubr.f32.mxu0 %v2624_v1 }
 0x1df   :  { %v314_v17 = vpop.f32.mrb[0].mxu0 }
 0x1e0   :  { %v315_v19 = vadd.f32 %v1518_v16, %v314_v17  ;;  %v1711_v20 = vpop.f32.mrb[1].mxu0  ;;  %v2081_v16 = vpack.c.bf16 %v662_v15, %v661_v13  ;;  %v663_v17 = vld [vmem:[#allocation14 + $0x20] sm:$0xff]  ;;  %v797_v13 = vld [vmem:[#allocation15 + $0x78] sm:$0xff] }
 0x1e2   :  { %v320_v21 = vmul.f32 %v2979_v18, %v315_v19 }
 0x1e4   :  { %321 = vadd.xlane.f32.xlu0 %v320_v21  ;;  %v665_v21 = vld [vmem:[#allocation14 + $0x30] sm:$0xff] }
 0x21f   :  { %v624_v23 = vpop.f32.mrb[2].mxu0 }
 0x220   :  { %v2237_v24 = vadd.f32 %v1523_v22, %v624_v23  ;;  %v1816_v25 = vpop.f32.mrb[3].mxu0  ;;  %v666_v22 = vld [vmem:[#allocation14 + $0x38] sm:$0xff] }
 0x221   :  { %v2087_v23 = vpack.c.bf16 %v666_v22, %v665_v21  ;;  %v668_v25 = vld [vmem:[#allocation14 + $0x48] sm:$0xff] }
 0x222   :  { %v631_v26 = vmul.f32 %v2237_v24, %v2979_v18  ;;  %v799_v22 = vld [vmem:[#allocation15 + $0x88] sm:$0xff] }
 0x224   :  { %632 = vadd.xlane.f32.xlu0 %v631_v26 }
 0x271   :  { %v322_v34 = vpop.xlane.xlu0 %321 }
 0x272   :  { %v323_v35 = vmul.f32 0.03125, %v322_v34  ;;  %v673_v34 = vld [vmem:[#allocation14 + $0x70] sm:$0xff] }
 0x274   :  { %v324_v36 = vsub.f32 %v315_v19, %v323_v35  ;;  %v664_v19 = vld [vmem:[#allocation14 + $0x28] sm:$0xff]  ;;  %v674_v35 = vld [vmem:[#allocation14 + $0x78] sm:$0xff] }
 0x275   :  { %v2084_v20 = vpack.c.bf16 %v664_v19, %v663_v17  ;;  %v795_v17 = vld [vmem:[#allocation15 + $0x68] sm:$0xff]  ;;  %v800_v19 = vld [vmem:[#allocation15 + $0x90] sm:$0xff] }
 0x276   :  { %v325_v37 = vmul.f32 %v2979_v18, %v324_v36  ;;  %v2137_v21 = vpack.c.bf16 %v800_v19, %v795_v17  ;;  %v843_v17 = vld [vmem:[#allocation15 + $0x1e8] sm:$0xff] }
 0x278   :  { %v326_v38 = vmul.f32 %v325_v37, %v325_v37 }
 0x27a   :  { %327 = vadd.xlane.f32.xlu1 %v326_v38 }
 0x2b1   :  { %v633_v57 = vpop.xlane.xlu0 %632 }
 0x2b2   :  { %v634_v58 = vmul.f32 0.03125, %v633_v57 }
 0x2b4   :  { %v635_v59 = vsub.f32 %v2237_v24, %v634_v58  ;;  %v667_v24 = vld [vmem:[#allocation14 + $0x40] sm:$0xff] }
 0x2b5   :  { %v2090_v26 = vpack.c.bf16 %v668_v25, %v667_v24  ;;  %v808_v24 = vld [vmem:[#allocation15 + $0xd0] sm:$0xff] }
 0x2b6   :  { %v636_v60 = vmul.f32 %v2979_v18, %v635_v59 }
 0x2b8   :  { %v637_v61 = vmul.f32 %v636_v60, %v636_v60  ;;  %v783_v60 = vld [vmem:[#allocation15 + $0x8] sm:$0xff] }
 0x2ba   :  { %638 = vadd.xlane.f32.xlu1 %v637_v61  ;;  %v788_v61 = vld [vmem:[#allocation15 + $0x30] sm:$0xff] }
 0x307   :  { %v328_v62 = vpop.xlane.xlu1 %327 }
 0x308   :  { %v329_v63 = vmul.f32 0.03125, %v328_v62  ;;  %v782_v62 = vld [vmem:[#allocation15] sm:$0xff] }
 0x30a   :  { %v330_v2 = vadd.f32 1e-05, %v329_v63  ;;  %v2101_v63 = vpack.c.bf16 %v788_v61, %v783_v60  ;;  %v825_v60 = vld [vmem:[#allocation15 + $0x158] sm:$0xff] }
 0x30c   :  { %2261 = vrsqrt.f32 %v330_v2  ;;  %v787_v2 = vld [vmem:[#allocation15 + $0x28] sm:$0xff] }
 0x316   :  { %v2262_v3 = vpop.eup %2261 }
 0x317   :  { %v332_v5 = vmul.f32 %v2262_v3, %v324_v36  ;;  %v2099_v36 = vpack.c.bf16 %v674_v35, %v673_v34  ;;  %v785_v3 = vld [vmem:[#allocation15 + $0x18] sm:$0xff] }
 0x319   :  { %v339_v7 = vmul.f32 %v1519_v4, %v332_v5  ;;  %v790_v4 = vld [vmem:[#allocation15 + $0x40] sm:$0xff]  ;;  %v2103_v5 = vpack.c.bf16 %v787_v2, %v782_v62  ;;  %v829_v2 = vld [vmem:[#allocation15 + $0x178] sm:$0xff] }
 0x31a   :  { %v830_v62 = vld [vmem:[#allocation15 + $0x180] sm:$0xff] }
 0x31b   :  { %v346_v10 = vadd.f32 %v1520_v6, %v339_v7  ;;  %v2133_v6 = vpack.c.bf16 %v790_v4, %v785_v3  ;;  %v784_v7 = vld [vmem:[#allocation15 + $0x10] sm:$0xff]  ;;  %v2149_v3 = vpack.c.bf16 %v830_v62, %v825_v60  ;;  %v801_v62 = vld [vmem:[#allocation15 + $0x98] sm:$0xff] }
 0x31d   :  { %v347_v12 = vmax.f32 %v346_v10, 0.0  ;;  %v2135_v10 = vpack.c.bf16 %v789_v8, %v784_v7  ;;  %2134 = vmatprep.subr.bf16.mxu0 %v2133_v6  ;;  %v838_v6 = vld [vmem:[#allocation15 + $0x1c0] sm:$0xff]  ;;  %v832_v7 = vld [vmem:[#allocation15 + $0x190] sm:$0xff] }
 0x31f   :  { %1745 = vmatmul.mubr.f32.vlgmr.msra.gmra.mrb[0].mxu1 %v347_v12  ;;  %v792_v12 = vld [vmem:[#allocation15 + $0x50] sm:$0xff]  ;;  %2136 = vmatpush1.bf16.msra.mxu0 %v2135_v10  ;;  %v835_v10 = vld [vmem:[#allocation15 + $0x1a8] sm:$0xff] }
 0x320   :  { %2079 = vmatpush3.bf16.msra.mxu1 %v2078_v11  ;;  %1849 = vmatprep.mubr.msk.f32.mxu1 %vm2623_vm0, %v2624_v1  ;;  %v798_v11 = vld [vmem:[#allocation15 + $0x80] sm:$0xff] }
 0x321   :  { %2080 = vmatprep.subr.bf16.mxu1 %v2622_v0  ;;  %v2105_v15 = vpack.c.bf16 %v798_v11, %v793_v9  ;;  %2138 = vmatprep.subr.bf16.mxu0 %v2137_v21  ;;  %v837_v9 = vld [vmem:[#allocation15 + $0x1b8] sm:$0xff]  ;;  %v840_v11 = vld [vmem:[#allocation15 + $0x1d0] sm:$0xff]  ;;  %v842_v21 = vld [vmem:[#allocation15 + $0x1e0] sm:$0xff] }
 0x324   :  { %2082 = vmatpush3.bf16.msra.mxu1 %v2081_v16  ;;  %v2107_v16 = vpack.c.bf16 %v797_v13, %v792_v12  ;;  %v2123_v12 = vpack.c.bf16 %v837_v9, %v832_v7  ;;  %v2153_v13 = vpack.c.bf16 %v840_v11, %v835_v10  ;;  %v1135_v7 = vld [vmem:[#allocation17 + $0x20] sm:$0xff]  ;;  %v816_v10 = vld [vmem:[#allocation15 + $0x110] sm:$0xff]  ;;  %v821_v11 = vld [vmem:[#allocation15 + $0x138] sm:$0xff] }
 0x325   :  { %2083 = vmatprep.subr.bf16.mxu1 %v2622_v0 }
 0x328   :  { %2085 = vmatpush3.bf16.msra.mxu1 %v2084_v20  ;;  %v794_v20 = vld [vmem:[#allocation15 + $0x60] sm:$0xff] }
 0x329   :  { %2086 = vmatprep.subr.bf16.mxu1 %v2622_v0  ;;  %v2139_v25 = vpack.c.bf16 %v799_v22, %v794_v20  ;;  %v848_v20 = vld [vmem:[#allocation15 + $0x210] sm:$0xff]  ;;  %v847_v22 = vld [vmem:[#allocation15 + $0x208] sm:$0xff] }
 0x32a   :  { %v2127_v27 = vpack.c.bf16 %v847_v22, %v842_v21  ;;  %v1139_v21 = vld [vmem:[#allocation17 + $0x40] sm:$0xff]  ;;  %v1140_v22 = vld [vmem:[#allocation17 + $0x48] sm:$0xff] }
 0x32b   :  { %2140 = vmatpush1.bf16.msra.mxu0 %v2139_v25  ;;  %v850_v25 = vld [vmem:[#allocation15 + $0x220] sm:$0xff] }
 0x32c   :  { %2088 = vmatpush3.bf16.msra.mxu1 %v2087_v23  ;;  %v803_v23 = vld [vmem:[#allocation15 + $0xa8] sm:$0xff] }
 0x32d   :  { %2089 = vmatprep.subr.bf16.mxu1 %v2622_v0 }
 0x330   :  { %2091 = vmatpush3.bf16.msra.mxu1 %v2090_v26  ;;  %v2109_v26 = vpack.c.bf16 %v808_v24, %v803_v23  ;;  %v2125_v23 = vpack.c.bf16 %v848_v20, %v843_v17  ;;  %v845_v24 = vld [vmem:[#allocation15 + $0x1f8] sm:$0xff]  ;;  %v826_v17 = vld [vmem:[#allocation15 + $0x160] sm:$0xff] }
 0x331   :  { %2092 = vmatprep.subr.bf16.mxu1 %v2622_v0  ;;  %v2157_v29 = vpack.c.bf16 %v850_v25, %v845_v24  ;;  %v836_v24 = vld [vmem:[#allocation15 + $0x1b0] sm:$0xff]  ;;  %v841_v25 = vld [vmem:[#allocation15 + $0x1d8] sm:$0xff] }
 0x334   :  { %2094 = vmatpush3.bf16.msra.mxu1 %v2093_v30  ;;  %v805_v30 = vld [vmem:[#allocation15 + $0xb8] sm:$0xff] }
 0x335   :  { %2095 = vmatprep.subr.bf16.mxu1 %v2622_v0 }
 0x338   :  { %2097 = vmatpush3.bf16.msra.mxu1 %v2096_v33  ;;  %v2141_v33 = vpack.c.bf16 %v810_v31, %v805_v30  ;;  %v849_v30 = vld [vmem:[#allocation15 + $0x218] sm:$0xff] }
 0x339   :  { %2098 = vmatprep.subr.bf16.mxu1 %v2622_v0  ;;  %v853_v31 = vld [vmem:[#allocation15 + $0x238] sm:$0xff] }
 0x33a   :  { %2142 = vmatprep.subr.bf16.mxu0 %v2141_v33 }
 0x33c   :  { %2100 = vmatpush3.bf16.msra.mxu1 %v2099_v36 }
 0x33d   :  { %2102 = vmatprep.subr.bf16.mxu1 %v2101_v63  ;;  %v824_v63 = vld [vmem:[#allocation15 + $0x150] sm:$0xff] }
 0x33e   :  { %v2151_v4 = vpack.c.bf16 %v829_v2, %v824_v63  ;;  %v1133_v2 = vld [vmem:[#allocation17 + $0x10] sm:$0xff] }
 0x347   :  { %v639_v37 = vpop.xlane.xlu1 %638 }
 0x348   :  { %v640_v38 = vmul.f32 0.03125, %v639_v37 }
 0x34a   :  { %v641_v39 = vadd.f32 1e-05, %v640_v38 }
 0x34c   :  { %2263 = vrsqrt.f32 %v641_v39  ;;  %v804_v39 = vld [vmem:[#allocation15 + $0xb0] sm:$0xff] }
 0x356   :  { %v2264_v40 = vpop.eup %2263 }
 0x357   :  { %v643_v42 = vmul.f32 %v2264_v40, %v635_v59  ;;  %v809_v40 = vld [vmem:[#allocation15 + $0xd8] sm:$0xff] }
 0x359   :  { %v650_v44 = vmul.f32 %v1524_v41, %v643_v42  ;;  %v2143_v41 = vpack.c.bf16 %v809_v40, %v804_v39  ;;  %v813_v42 = vld [vmem:[#allocation15 + $0xf8] sm:$0xff]  ;;  %v860_v39 = vld [vmem:[#allocation15 + $0x270] sm:$0xff] }
 0x35b   :  { %v657_v45 = vadd.f32 %v1525_v43, %v650_v44  ;;  %v818_v43 = vld [vmem:[#allocation15 + $0x120] sm:$0xff]  ;;  %2144 = vmatpush1.bf16.msra.mxu0 %v2143_v41 }
 0x35c   :  { %v2113_v44 = vpack.c.bf16 %v818_v43, %v813_v42  ;;  %v854_v41 = vld [vmem:[#allocation15 + $0x240] sm:$0xff]  ;;  %v859_v42 = vld [vmem:[#allocation15 + $0x268] sm:$0xff] }
 0x35d   :  { %v658_v46 = vmax.f32 %v657_v45, 0.0  ;;  %v812_v45 = vld [vmem:[#allocation15 + $0xf0] sm:$0xff] }
 0x35f   :  { %1850 = vmatmul.mubr.f32.vlgmr.msra.gmra.mrb[2].mxu1 %v658_v46  ;;  %v817_v46 = vld [vmem:[#allocation15 + $0x118] sm:$0xff] }
 0x360   :  { %953 = vmatprep.mubr.f32.mxu1 %v2624_v1  ;;  %2104 = vmatpush1.bf16.msra.mxu1 %v2103_v5  ;;  %v833_v5 = vld [vmem:[#allocation15 + $0x198] sm:$0xff] }
 0x361   :  { %2106 = vmatprep.subr.bf16.mxu1 %v2105_v15  ;;  %v2121_v8 = vpack.c.bf16 %v838_v6, %v833_v5  ;;  %v834_v15 = vld [vmem:[#allocation15 + $0x1a0] sm:$0xff]  ;;  %v811_v5 = vld [vmem:[#allocation15 + $0xe8] sm:$0xff] }
 0x364   :  { %2108 = vmatpush1.bf16.msra.mxu1 %v2107_v16  ;;  %v839_v16 = vld [vmem:[#allocation15 + $0x1c8] sm:$0xff] }
 0x365   :  { %2110 = vmatprep.subr.bf16.mxu1 %v2109_v26  ;;  %v2155_v19 = vpack.c.bf16 %v839_v16, %v834_v15  ;;  %v844_v26 = vld [vmem:[#allocation15 + $0x1f0] sm:$0xff]  ;;  %v1138_v15 = vld [vmem:[#allocation17 + $0x38] sm:$0xff]  ;;  %v2175_v16 = vpack.c.bf16 %v821_v11, %v816_v10 }
 0x368   :  { %2112 = vmatpush1.bf16.msra.mxu1 %v2111_v32  ;;  %v858_v32 = vld [vmem:[#allocation15 + $0x260] sm:$0xff] }
 0x369   :  { %2114 = vmatprep.subr.bf16.mxu1 %v2113_v44  ;;  %v2129_v33 = vpack.c.bf16 %v858_v32, %v853_v31  ;;  %v2163_v44 = vpack.c.bf16 %v859_v42, %v854_v41  ;;  %v846_v31 = vld [vmem:[#allocation15 + $0x200] sm:$0xff]  ;;  %v851_v32 = vld [vmem:[#allocation15 + $0x228] sm:$0xff]  ;;  %v1145_v42 = vld [vmem:[#allocation17 + $0x70] sm:$0xff] }
 0x3f2   :  { %v437_v48 = vpop.f32.mrb[0].mxu1 }
 0x3f3   :  { %v438_v49 = vadd.f32 %v1521_v47, %v437_v48  ;;  %v1746_v50 = vpop.f32.mrb[1].mxu1  ;;  %v815_v47 = vld [vmem:[#allocation15 + $0x108] sm:$0xff]  ;;  %v2115_v48 = vpack.c.bf16 %v817_v46, %v812_v45 }
 0x3f4   :  { %v814_v50 = vld [vmem:[#allocation15 + $0x100] sm:$0xff] }
 0x3f5   :  { %v1522_v51 = vmul.f32 -1.442695, %v438_v49  ;;  %v820_v49 = vld [vmem:[#allocation15 + $0x130] sm:$0xff]  ;;  %2116 = vmatpush1.bf16.msra.mxu1 %v2115_v48 }
 0x3f7   :  { %2265 = vpow2.f32 %v1522_v51  ;;  %v819_v51 = vld [vmem:[#allocation15 + $0x128] sm:$0xff] }
 0x401   :  { %v2266_v52 = vpop.eup %2265 }
 0x402   :  { %v444_v53 = vadd.f32 1.0, %v2266_v52  ;;  %v2145_v52 = vpack.c.bf16 %v820_v49, %v815_v47  ;;  %v1527_v49 = vld [vmem:[%s3208_s15] ss:$0 sm:$0xff] }
 0x404   :  { %2267 = vrcp.f32 %v444_v53  ;;  %v2147_v53 = vpack.c.bf16 %v819_v51, %v814_v50  ;;  %2146 = vmatprep.subr.bf16.mxu0 %v2145_v52  ;;  %v1528_v51 = vld [vmem:[%s3209_s16] ss:$0 sm:$0xff] }
 0x406   :  { %2148 = vmatpush1.bf16.msra.mxu0 %v2147_v53  ;;  %v786_v53 = vld [vmem:[#allocation15 + $0x20] sm:$0xff] }
 0x407   :  { %2150 = vmatprep.subr.bf16.mxu0 %v2149_v3  ;;  %v1134_v3 = vld [vmem:[#allocation17 + $0x18] sm:$0xff] }
 0x408   :  { %v2193_v6 = vpack.c.bf16 %v1134_v3, %v1133_v2 }
 0x40a   :  { %2152 = vmatpush1.bf16.msra.mxu0 %v2151_v4  ;;  %v806_v4 = vld [vmem:[#allocation15 + $0xc0] sm:$0xff] }
 0x40b   :  { %2154 = vmatprep.subr.bf16.mxu0 %v2153_v13  ;;  %v2172_v9 = vpack.c.bf16 %v811_v5, %v806_v4  ;;  %v1137_v13 = vld [vmem:[#allocation17 + $0x30] sm:$0xff] }
 0x40c   :  { %v2199_v20 = vpack.c.bf16 %v1138_v15, %v1137_v13  ;;  %v2281_v13 = vld [vmem:[#allocation3] sm:$0xff] }
 0x40e   :  { %v3021_v54 = vpop.eup %2267  ;;  %2156 = vmatpush1.bf16.msra.mxu0 %v2155_v19  ;;  %v831_v19 = vld [vmem:[#allocation15 + $0x188] sm:$0xff] }
 0x40f   :  { %447 = vst [vmem:[#allocation20] sm:$0xff] %v3021_v54  ;;  %2158 = vmatprep.subr.bf16.mxu0 %v2157_v29  ;;  %v1142_v29 = vld [vmem:[#allocation17 + $0x58] sm:$0xff] }
 0x432   :  { %v748_v56 = vpop.f32.mrb[2].mxu1 }
 0x433   :  { %v749_v57 = vadd.f32 %v1526_v55, %v748_v56  ;;  %v1851_v58 = vpop.f32.mrb[3].mxu1  ;;  %v823_v55 = vld [vmem:[#allocation15 + $0x148] sm:$0xff]  ;;  %v828_v56 = vld [vmem:[#allocation15 + $0x170] sm:$0xff] }
 0x434   :  { %v822_v58 = vld [vmem:[#allocation15 + $0x140] sm:$0xff] }
 0x435   :  { %v754_v59 = vmul.f32 %v2979_v18, %v749_v57 }
 0x437   :  { %755 = vadd.xlane.f32.xlu0 %v754_v59  ;;  %v827_v59 = vld [vmem:[#allocation15 + $0x168] sm:$0xff] }
 0x438   :  { %v2119_v61 = vpack.c.bf16 %v827_v59, %v822_v58 }
 0x4c4   :  { %v756_v34 = vpop.xlane.xlu0 %755 }
 0x4c5   :  { %v757_v35 = vmul.f32 0.03125, %v756_v34  ;;  %v852_v34 = vld [vmem:[#allocation15 + $0x230] sm:$0xff] }
 0x4c7   :  { %v3028_v36 = vsub.f32 %v749_v57, %v757_v35  ;;  %v2117_v57 = vpack.c.bf16 %v828_v56, %v823_v55  ;;  %v857_v35 = vld [vmem:[#allocation15 + $0x258] sm:$0xff]  ;;  %v791_v55 = vld [vmem:[#allocation15 + $0x48] sm:$0xff]  ;;  %v1131_v56 = vld [vmem:[#allocation17] sm:$0xff] }
 0x4c8   :  { %v2131_v43 = vpack.c.bf16 %v857_v35, %v852_v34  ;;  %v2166_v59 = vpack.c.bf16 %v791_v55, %v786_v53  ;;  %v2184_v34 = vpack.c.bf16 %v851_v32, %v846_v31  ;;  %v856_v35 = vld [vmem:[#allocation15 + $0x250] sm:$0xff] }
 0x4c9   :  { %v759_v37 = vmul.f32 %v2979_v18, %v3028_v36  ;;  %2118 = vmatprep.subr.bf16.mxu1 %v2117_v57  ;;  %v1132_v57 = vld [vmem:[#allocation17 + $0x8] sm:$0xff] }
 0x4ca   :  { %2120 = vmatpush1.bf16.msra.mxu1 %v2119_v61  ;;  %v796_v61 = vld [vmem:[#allocation15 + $0x70] sm:$0xff]  ;;  %v2190_v63 = vpack.c.bf16 %v1132_v57, %v1131_v56 }
 0x4cb   :  { %v760_v38 = vmul.f32 %v759_v37, %v759_v37  ;;  %2122 = vmatprep.subr.bf16.mxu1 %v2121_v8  ;;  %v855_v37 = vld [vmem:[#allocation15 + $0x248] sm:$0xff] }
 0x4cc   :  { %v2161_v40 = vpack.c.bf16 %v860_v39, %v855_v37  ;;  %v1136_v8 = vld [vmem:[#allocation17 + $0x28] sm:$0xff]  ;;  %v861_v37 = vld [vmem:[#allocation15 + $0x278] sm:$0xff]  ;;  %v1143_v39 = vld [vmem:[#allocation17 + $0x60] sm:$0xff] }
 0x4cd   :  { %761 = vadd.xlane.f32.xlu1 %v760_v38  ;;  %v2159_v38 = vpack.c.bf16 %v849_v30, %v844_v26  ;;  %v2202_v26 = vpack.c.bf16 %v1140_v22, %v1139_v21  ;;  %v2181_v30 = vpack.c.bf16 %v841_v25, %v836_v24 }
 0x4ce   :  { %2124 = vmatpush1.bf16.msra.mxu1 %v2123_v12  ;;  %v2196_v12 = vpack.c.bf16 %v1136_v8, %v1135_v7 }
 0x4cf   :  { %2126 = vmatprep.subr.bf16.mxu1 %v2125_v23  ;;  %2160 = vmatpush1.bf16.msra.mxu0 %v2159_v38  ;;  %v2178_v23 = vpack.c.bf16 %v831_v19, %v826_v17  ;;  %v2187_v38 = vpack.c.bf16 %v861_v37, %v856_v35 }
 0x4d0   :  { %2162 = vmatprep.subr.bf16.mxu0 %v2161_v40  ;;  %v1144_v40 = vld [vmem:[#allocation17 + $0x68] sm:$0xff] }
 0x4d1   :  { %v2208_v41 = vpack.c.bf16 %v1144_v40, %v1143_v39  ;;  %v1338_v39 = vld [vmem:[#allocation18] sm:$0xff]  ;;  %v1339_v40 = vld [vmem:[#allocation18 + $0x8] sm:$0xff] }
 0x4d2   :  { %2128 = vmatpush1.bf16.msra.mxu1 %v2127_v27  ;;  %v1141_v27 = vld [vmem:[#allocation17 + $0x50] sm:$0xff] }
 0x4d3   :  { %2130 = vmatprep.subr.bf16.mxu1 %v2129_v33  ;;  %2164 = vmatpush1.bf16.msra.mxu0 %v2163_v44  ;;  %v2205_v33 = vpack.c.bf16 %v1142_v29, %v1141_v27 }
 0x4d4   :  { %2189 = vmatprep.subr.bf16.mxu0 %v2622_v0 }
 0x4d6   :  { %2132 = vmatpush1.bf16.msra.mxu1 %v2131_v43  ;;  %v1146_v43 = vld [vmem:[#allocation17 + $0x78] sm:$0xff] }
 0x4d7   :  { %2165 = vmatprep.subr.bf16.mxu1 %v2622_v0  ;;  %v2211_v44 = vpack.c.bf16 %v1146_v43, %v1145_v42  ;;  %v2214_v42 = vpack.c.bf16 %v1339_v40, %v1338_v39  ;;  %v1341_v43 = vld [vmem:[#allocation18 + $0x18] sm:$0xff]  ;;  %v1531_v40 = vld [vmem:[%s3215_s22] ss:$0 sm:$0xff] }
 0x55a   :  { %v762_v45 = vpop.xlane.xlu1 %761 }
 0x55b   :  { %v763_v46 = vmul.f32 0.03125, %v762_v45  ;;  %v865_v45 = vshrl.u32 %v220_v14, 7 }
 0x55d   :  { %v764_v47 = vadd.f32 1e-05, %v763_v46  ;;  %v866_v46 = vsub.s32 0, %v865_v45 }
 0x55f   :  { %2269 = vrsqrt.f32 %v764_v47  ;;  %v874_v47 = vsub.s32 2, %v865_v45 }
 0x569   :  { %v2270_v48 = vpop.eup %2269 }
 0x56a   :  { %v766_v50 = vmul.f32 %v2270_v48, %v3028_v36  ;;  %v2169_v36 = vpack.c.bf16 %v801_v62, %v796_v61  ;;  %v862_v48 = vld [vmem:[%s3211_s18] sm:$0x1f] }
 0x56c   :  { %v773_v52 = vmul.f32 %v1527_v49, %v766_v50  ;;  %v870_v49 = vsub.s32 1, %v865_v45  ;;  %v878_v50 = vsub.s32 3, %v865_v45 }
 0x56e   :  { %v780_v58 = vadd.f32 %v1528_v51, %v773_v52  ;;  %v867_v51 = vrot.slane %v862_v48, %v866_v46  ;;  %v875_v52 = vrot.slane %v862_v48, %v874_v47  ;;  %v871_v53 = vrot.slane %v862_v48, %v870_v49 }
 0x56f   :  { %v879_v55 = vrot.slane %v862_v48, %v878_v50 }
 0x570   :  { %v3041_v60 = vmax.f32 %v780_v58, 0.0 }
 0x572   :  { %954 = vmatmul.mubr.f32.vlgmr.msra.gmra.mrb[4].mxu1 %v3041_v60  ;;  %1025 = vmatmul.mubr.f32.vlgmr.msra.gmra.mrb[4].mxu0 %v3041_v60 }
 0x573   :  { %2167 = vmatpush3.bf16.msra.mxu1 %v2166_v59  ;;  %1884 = vmatprep.mubr.msk.f32.mxu1 %vm2623_vm0, %v2624_v1 }
 0x574   :  { %2168 = vmatprep.subr.bf16.mxu1 %v2622_v0  ;;  %2191 = vmatpush3.bf16.msra.mxu0 %v2190_v63 }
 0x575   :  { %2192 = vmatprep.subr.bf16.mxu0 %v2622_v0  ;;  %1919 = vmatprep.mubr.msk.f32.mxu0 %vm2623_vm0, %v2624_v1 }
 0x577   :  { %2170 = vmatpush3.bf16.msra.mxu1 %v2169_v36 }
 0x578   :  { %2171 = vmatprep.subr.bf16.mxu1 %v2622_v0  ;;  %2194 = vmatpush3.bf16.msra.mxu0 %v2193_v6 }
 0x579   :  { %2195 = vmatprep.subr.bf16.mxu0 %v2622_v0 }
 0x57b   :  { %2173 = vmatpush3.bf16.msra.mxu1 %v2172_v9 }
 0x57c   :  { %2174 = vmatprep.subr.bf16.mxu1 %v2622_v0  ;;  %2197 = vmatpush3.bf16.msra.mxu0 %v2196_v12 }
 0x57d   :  { %2198 = vmatprep.subr.bf16.mxu0 %v2622_v0 }
 0x57f   :  { %2176 = vmatpush3.bf16.msra.mxu1 %v2175_v16  ;;  %v1529_v16 = vld [vmem:[%s3213_s20] ss:$0 sm:$0xff] }
 0x580   :  { %2177 = vmatprep.subr.bf16.mxu1 %v2622_v0  ;;  %2200 = vmatpush3.bf16.msra.mxu0 %v2199_v20 }
 0x581   :  { %2201 = vmatprep.subr.bf16.mxu0 %v2622_v0 }
 0x583   :  { %2179 = vmatpush3.bf16.msra.mxu1 %v2178_v23 }
 0x584   :  { %2180 = vmatprep.subr.bf16.mxu1 %v2622_v0  ;;  %2203 = vmatpush3.bf16.msra.mxu0 %v2202_v26 }
 0x585   :  { %2204 = vmatprep.subr.bf16.mxu0 %v2622_v0 }
 0x587   :  { %2182 = vmatpush3.bf16.msra.mxu1 %v2181_v30 }
 0x588   :  { %2183 = vmatprep.subr.bf16.mxu1 %v2622_v0  ;;  %2206 = vmatpush3.bf16.msra.mxu0 %v2205_v33 }
 0x589   :  { %2207 = vmatprep.subr.bf16.mxu0 %v2622_v0 }
 0x58b   :  { %2185 = vmatpush3.bf16.msra.mxu1 %v2184_v34 }
 0x58c   :  { %2186 = vmatprep.subr.bf16.mxu1 %v2622_v0  ;;  %2209 = vmatpush3.bf16.msra.mxu0 %v2208_v41  ;;  %v1340_v41 = vld [vmem:[#allocation18 + $0x10] sm:$0xff] }
 0x58d   :  { %2210 = vmatprep.subr.bf16.mxu0 %v2622_v0 }
 0x58f   :  { %2188 = vmatpush3.bf16.msra.mxu1 %v2187_v38 }
 0x590   :  { %2213 = vmatprep.subr.bf16.mxu1 %v2622_v0  ;;  %2212 = vmatpush3.bf16.msra.mxu0 %v2211_v44  ;;  %v2217_v44 = vpack.c.bf16 %v1341_v43, %v1340_v41 }
 0x592   :  { %1885 = vmatmul.mubr.f32.vlgmr.msra.gmra.mrb[6].mxu1 %v3041_v60 }
 0x593   :  { %1966 = vmatprep.mubr.msk.f32.mxu1 %vm2623_vm0, %v2624_v1  ;;  %2215 = vmatpush3.bf16.msra.mxu1 %v2214_v42 }
 0x594   :  { %2216 = vmatprep.subr.bf16.mxu1 %v2622_v0 }
 0x597   :  { %2218 = vmatpush3.bf16.msra.mxu1 %v2217_v44 }
 0x598   :  { %2219 = vmatprep.subr.bf16.mxu1 %v2622_v0 }
 0x645   :  { %v955_v56 = vpop.f32.mrb[4].mxu1  ;;  %v1026_v57 = vpop.f32.mrb[4].mxu0 }
 0x646   :  { %v956_v58 = vadd.f32 %v955_v56, %v867_v51  ;;  %v1027_v59 = vadd.f32 %v1026_v57, %v875_v52  ;;  %v957_v60 = vpop.f32.mrb[5].mxu1  ;;  %v1028_v61 = vpop.f32.mrb[5].mxu0 }
 0x647   :  { %v958_v62 = vadd.f32 %v957_v60, %v871_v53  ;;  %v1029_v14 = vadd.f32 %v1028_v61, %v879_v55 }
 0x648   :  { %1101 = vst [vmem:[#allocation21] sm:$0xff] %v956_v58  ;;  %v1106_v63 = vmul.f32 %v3021_v54, %v956_v58  ;;  %1103 = vst [vmem:[#allocation21 + $0x10] sm:$0xff] %v1027_v59  ;;  %v1114_v2 = vmul.f32 %v3021_v54, %v1027_v59 }
 0x649   :  { %1102 = vst [vmem:[#allocation21 + $0x8] sm:$0xff] %v958_v62  ;;  %v1110_v3 = vmul.f32 %v3021_v54, %v958_v62  ;;  %1104 = vst [vmem:[#allocation21 + $0x18] sm:$0xff] %v1029_v14  ;;  %v1118_v36 = vmul.f32 %v3021_v54, %v1029_v14 }
 0x64a   :  { %v1107_v4 = vadd.f32 %v1106_v63, %v2949_v28  ;;  %v1115_v5 = vadd.f32 %v1114_v2, %v2949_v28 }
 0x64b   :  { %v1111_v6 = vadd.f32 %v1110_v3, %v2949_v28  ;;  %v1119_v7 = vadd.f32 %v1118_v36, %v2949_v28  ;;  %v882_v28 = vsub.s32 4, %v865_v45  ;;  %v1342_v3 = vld [vmem:[#allocation18 + $0x20] sm:$0xff]  ;;  %v1343_v36 = vld [vmem:[#allocation18 + $0x28] sm:$0xff] }
 0x64c   :  { %1108 = vst [vmem:[#allocation23] sm:$0xff] %v1107_v4  ;;  %1920 = vmatmul.mubr.f32.vlgmr.msra.gmra.mrb[6].mxu0 %v1107_v4  ;;  %1116 = vst [vmem:[#allocation23 + $0x10] sm:$0xff] %v1115_v5  ;;  %v2220_v4 = vpack.c.bf16 %v1343_v36, %v1342_v3 }
 0x64d   :  { %1922 = vmatprep.mubr.msk.f32.mxu0 %vm2623_vm0, %v2624_v1  ;;  %1112 = vst [vmem:[#allocation23 + $0x8] sm:$0xff] %v1111_v6  ;;  %1120 = vst [vmem:[#allocation23 + $0x18] sm:$0xff] %v1119_v7  ;;  %v883_v8 = vrot.slane %v862_v48, %v882_v28  ;;  %v1346_v28 = vld [vmem:[#allocation18 + $0x40] sm:$0xff] }
 0x64e   :  { %2221 = vmatpush3.bf16.msra.mxu1 %v2220_v4 }
 0x64f   :  { %2222 = vmatprep.subr.bf16.mxu1 %v2622_v0 }
 0x650   :  { %1923 = vmatmul.mubr.f32.gmra.mrb[8].mxu0 %v1111_v6  ;;  %v1345_v6 = vld [vmem:[#allocation18 + $0x38] sm:$0xff] }
 0x651   :  { %1925 = vmatprep.mubr.msk.f32.mxu0 %vm2623_vm0, %v2624_v1 }
 0x654   :  { %1926 = vmatmul.mubr.f32.gmra.mrb[10].mxu0 %v1115_v5  ;;  %v1344_v5 = vld [vmem:[#allocation18 + $0x30] sm:$0xff] }
 0x655   :  { %1928 = vmatprep.mubr.msk.f32.mxu0 %vm2623_vm0, %v2624_v1 }
 0x658   :  { %1929 = vmatmul.mubr.f32.gmra.mrb[12].mxu0 %v1119_v7  ;;  %v2223_v7 = vpack.c.bf16 %v1345_v6, %v1344_v5 }
 0x659   :  { %1931 = vmatprep.mubr.msk.f32.mxu0 %vm2623_vm0, %v2624_v1 }
 0x65a   :  { %2224 = vmatpush3.bf16.msra.mxu1 %v2223_v7 }
 0x65b   :  { %2225 = vmatprep.subr.bf16.mxu1 %v2622_v0 }
 0x665   :  { %v1097_v9 = vpop.f32.mrb[6].mxu1 }
 0x666   :  { %v1098_v10 = vadd.f32 %v1097_v9, %v883_v8  ;;  %v1886_v11 = vpop.f32.mrb[7].mxu1  ;;  %v1347_v8 = vld [vmem:[#allocation18 + $0x48] sm:$0xff] }
 0x667   :  { %v2226_v9 = vpack.c.bf16 %v1347_v8, %v1346_v28 }
 0x668   :  { %1105 = vst [vmem:[#allocation21 + $0x20] sm:$0xff] %v1098_v10  ;;  %v1122_v12 = vmul.f32 %v3021_v54, %v1098_v10 }
 0x669   :  { %2227 = vmatpush3.bf16.msra.mxu1 %v2226_v9 }
 0x66a   :  { %v1123_v15 = vadd.f32 %v2281_v13, %v1122_v12  ;;  %2228 = vmatprep.subr.bf16.mxu1 %v2622_v0  ;;  %v1348_v12 = vld [vmem:[#allocation18 + $0x50] sm:$0xff]  ;;  %v1349_v13 = vld [vmem:[#allocation18 + $0x58] sm:$0xff] }
 0x66c   :  { %1124 = vst [vmem:[#allocation23 + $0x20] sm:$0xff] %v1123_v15  ;;  %1932 = vmatmul.mubr.f32.gmra.mrb[14].mxu0 %v1123_v15  ;;  %v2229_v15 = vpack.c.bf16 %v1349_v13, %v1348_v12 }
 0x66e   :  { %2230 = vmatpush3.bf16.msra.mxu1 %v2229_v15 }
 0x66f   :  { %2231 = vmatprep.subr.bf16.mxu1 %v2622_v0 }
 0x71f   :  { %v1220_v17 = vpop.f32.mrb[6].mxu0 }
 0x720   :  { %v1221_v19 = vadd.f32 %v1529_v16, %v1220_v17  ;;  %v1921_v20 = vpop.f32.mrb[7].mxu0 }
 0x721   :  { %v1351_v20 = vld [vmem:[#allocation18 + $0x68] sm:$0xff] }
 0x722   :  { %v1246_v21 = vmul.f32 %v2979_v18, %v1221_v19 }
 0x723   :  { %v1225_v22 = vpop.f32.mrb[8].mxu0 }
 0x724   :  { %v1226_v23 = vadd.f32 %v1529_v16, %v1225_v22  ;;  %1251 = vadd.xlane.f32.xlu0 %v1246_v21  ;;  %v1924_v24 = vpop.f32.mrb[9].mxu0 }
 0x725   :  { %v1353_v24 = vld [vmem:[#allocation18 + $0x78] sm:$0xff] }
 0x726   :  { %v1247_v25 = vmul.f32 %v2979_v18, %v1226_v23 }
 0x727   :  { %v1230_v54 = vpop.f32.mrb[10].mxu0 }
 0x728   :  { %v1231_v26 = vadd.f32 %v1529_v16, %v1230_v54  ;;  %1253 = vadd.xlane.f32.xlu1 %v1247_v25  ;;  %v1927_v27 = vpop.f32.mrb[11].mxu0 }
 0x72a   :  { %v1248_v29 = vmul.f32 %v2979_v18, %v1231_v26 }
 0x72b   :  { %v1235_v30 = vpop.f32.mrb[12].mxu0 }
 0x72c   :  { %v1236_v31 = vadd.f32 %v1529_v16, %v1235_v30  ;;  %1255 = vadd.xlane.f32.xlu0 %v1248_v29  ;;  %v1930_v32 = vpop.f32.mrb[13].mxu0 }
 0x72e   :  { %v1249_v33 = vmul.f32 %v2979_v18, %v1236_v31 }
 0x730   :  { %1257 = vadd.xlane.f32.xlu1 %v1249_v33 }
 0x73f   :  { %v1240_v34 = vpop.f32.mrb[14].mxu0 }
 0x740   :  { %v1241_v35 = vadd.f32 %v1529_v16, %v1240_v34  ;;  %v1933_v37 = vpop.f32.mrb[15].mxu0 }
 0x742   :  { %v1250_v38 = vmul.f32 %v2979_v18, %v1241_v35 }
 0x744   :  { %1259 = vadd.xlane.f32.xlu0 %v1250_v38 }
 0x7b1   :  { %v1252_v45 = vpop.xlane.xlu0 %1251 }
 0x7b2   :  { %v1261_v46 = vmul.f32 0.03125, %v1252_v45 }
 0x7b4   :  { %v3098_v47 = vsub.f32 %v1221_v19, %v1261_v46  ;;  %v1350_v19 = vld [vmem:[#allocation18 + $0x60] sm:$0xff] }
 0x7b5   :  { %v1254_v48 = vpop.xlane.xlu1 %1253  ;;  %v2232_v21 = vpack.c.bf16 %v1351_v20, %v1350_v19 }
 0x7b6   :  { %v1262_v49 = vmul.f32 0.03125, %v1254_v48  ;;  %v1271_v50 = vmul.f32 %v2979_v18, %v3098_v47 }
 0x7b7   :  { %2233 = vmatpush3.bf16.msra.mxu1 %v2232_v21 }
 0x7b8   :  { %v3102_v51 = vsub.f32 %v1226_v23, %v1262_v49  ;;  %v1276_v52 = vmul.f32 %v1271_v50, %v1271_v50  ;;  %v1352_v23 = vld [vmem:[#allocation18 + $0x70] sm:$0xff]  ;;  %2234 = vmatprep.subr.bf16.mxu1 %v2622_v0 }
 0x7b9   :  { %v1256_v53 = vpop.xlane.xlu0 %1255  ;;  %v2235_v25 = vpack.c.bf16 %v1353_v24, %v1352_v23  ;;  %v1530_v0 = vld [vmem:[%s3214_s21] ss:$0 sm:$0xff]  ;;  %s2625_s21 = smov [#allocation21]  }
 0x7ba   :  { %v1263_v55 = vmul.f32 0.03125, %v1256_v53  ;;  %1281 = vadd.xlane.f32.xlu1 %v1276_v52  ;;  %v1272_v56 = vmul.f32 %v2979_v18, %v3102_v51  ;;  %s1472_s22 = sshll.u32 %s2625_s21, 4  ;;  %s1473_s22 = int_to_ptr.vmem [resolvable:$true] %s1472_s22 }
 0x7bb   :  { %2236 = vmatpush3.bf16.msra.mxu1 %v2235_v25  ;;  %s2502_s7 = scalar_lea.vmem %s1473_s22, 640  ;;  %p2507_p11 = scmp.lt.s32.totalorder %s1473_s22, %s1473_s22 }
 0x7bc   :  { %v3106_v57 = vsub.f32 %v1231_v26, %v1263_v55  ;;  %v1277_v58 = vmul.f32 %v1272_v56, %v1272_v56  ;;  %p2503_p10 = scmp.ne.s32.totalorder %s1473_s22, %s2502_s7  ;;  %p2508_p12 = scmp.lt.s32.totalorder %s2502_s7, %s2502_s7 }
 0x7bd   :  { %v1258_v59 = vpop.xlane.xlu1 %1257 }
 0x7be   :  { %v1264_v60 = vmul.f32 0.03125, %v1258_v59  ;;  %1283 = vadd.xlane.f32.xlu0 %v1277_v58  ;;  %v1273_v61 = vmul.f32 %v2979_v18, %v3106_v57  ;;  %p2509_p13 = por %p2508_p12, %p2507_p11 }
 0x7c0   :  { %v3110_v62 = vsub.f32 %v1236_v31, %v1264_v60  ;;  %v1278_v14 = vmul.f32 %v1273_v61, %v1273_v61  ;;  %p2510_p0 = pnand %p2509_p13, %p2503_p10 }
 0x7c2   :  { %1285 = vadd.xlane.f32.xlu1 %v1278_v14  ;;  %v1274_v63 = vmul.f32 %v2979_v18, %v3110_v62 }
 0x7c4   :  { %v1279_v2 = vmul.f32 %v1274_v63, %v1274_v63 }
 0x7c6   :  { %1287 = vadd.xlane.f32.xlu0 %v1279_v2 }
 0x7d1   :  { %v1260_v10 = vpop.xlane.xlu0 %1259 }
 0x7d2   :  { %v1265_v11 = vmul.f32 0.03125, %v1260_v10 }
 0x7d4   :  { %v3117_v16 = vsub.f32 %v1241_v35, %v1265_v11 }
 0x7d6   :  { %v1275_v17 = vmul.f32 %v2979_v18, %v3117_v16 }
 0x7d8   :  { %v1280_v22 = vmul.f32 %v1275_v17, %v1275_v17 }
 0x7da   :  { %1289 = vadd.xlane.f32.xlu1 %v1280_v22 }
 0x847   :  { %v1282_v54 = vpop.xlane.xlu1 %1281 }
 0x848   :  { %v1291_v26 = vmul.f32 0.03125, %v1282_v54 }
 0x84a   :  { %v1296_v27 = vadd.f32 1e-05, %v1291_v26 }
 0x84b   :  { %v1284_v29 = vpop.xlane.xlu0 %1283 }
 0x84c   :  { %2271 = vrsqrt.f32 %v1296_v27  ;;  %v1292_v18 = vmul.f32 0.03125, %v1284_v29 }
 0x84e   :  { %v1297_v30 = vadd.f32 1e-05, %v1292_v18 }
 0x84f   :  { %v1286_v31 = vpop.xlane.xlu1 %1285 }
 0x850   :  { %2273 = vrsqrt.f32 %v1297_v30  ;;  %v1293_v32 = vmul.f32 0.03125, %v1286_v31 }
 0x852   :  { %v1298_v33 = vadd.f32 1e-05, %v1293_v32 }
 0x853   :  { %v1288_v34 = vpop.xlane.xlu0 %1287 }
 0x854   :  { %2275 = vrsqrt.f32 %v1298_v33  ;;  %v1294_v35 = vmul.f32 0.03125, %v1288_v34 }
 0x856   :  { %v2272_v37 = vpop.eup %2271  ;;  %v1299_v38 = vadd.f32 1e-05, %v1294_v35 }
 0x857   :  { %v1306_v39 = vmul.f32 %v2272_v37, %v3098_v47 }
 0x858   :  { %2277 = vrsqrt.f32 %v1299_v38 }
 0x859   :  { %v1317_v41 = vmul.f32 %v1530_v0, %v1306_v39 }
 0x85a   :  { %v2274_v42 = vpop.eup %2273 }
 0x85b   :  { %v1328_v43 = vadd.f32 %v1531_v40, %v1317_v41  ;;  %v1307_v44 = vmul.f32 %v2274_v42, %v3102_v51 }
 0x85d   :  { %v1333_v45 = vmax.f32 %v1328_v43, 0.0  ;;  %v1318_v46 = vmul.f32 %v1530_v0, %v1307_v44 }
 0x85e   :  { %v2276_v48 = vpop.eup %2275 }
 0x85f   :  { %1967 = vmatmul.mubr.f32.vlgmr.msra.gmra.mrb[8].mxu1 %v1333_v45  ;;  %v1329_v49 = vadd.f32 %v1531_v40, %v1318_v46  ;;  %v1308_v50 = vmul.f32 %v2276_v48, %v3106_v57 }
 0x860   :  { %1969 = vmatprep.mubr.msk.f32.mxu1 %vm2623_vm0, %v2624_v1 }
 0x861   :  { %v1334_v47 = vmax.f32 %v1329_v49, 0.0  ;;  %v1319_v52 = vmul.f32 %v1530_v0, %v1308_v50 }
 0x862   :  { %v2278_v53 = vpop.eup %2277 }
 0x863   :  { %1970 = vmatmul.mubr.f32.gmra.mrb[10].mxu1 %v1334_v47  ;;  %v1330_v55 = vadd.f32 %v1531_v40, %v1319_v52  ;;  %v1309_v56 = vmul.f32 %v2278_v53, %v3110_v62 }
 0x864   :  { %1972 = vmatprep.mubr.msk.f32.mxu1 %vm2623_vm0, %v2624_v1 }
 0x865   :  { %v1335_v51 = vmax.f32 %v1330_v55, 0.0  ;;  %v1320_v58 = vmul.f32 %v1530_v0, %v1309_v56 }
 0x867   :  { %v1290_v59 = vpop.xlane.xlu1 %1289  ;;  %1973 = vmatmul.mubr.f32.gmra.mrb[12].mxu1 %v1335_v51  ;;  %v1331_v60 = vadd.f32 %v1531_v40, %v1320_v58 }
 0x868   :  { %v1295_v61 = vmul.f32 0.03125, %v1290_v59  ;;  %1975 = vmatprep.mubr.msk.f32.mxu1 %vm2623_vm0, %v2624_v1 }
 0x869   :  { %v1336_v57 = vmax.f32 %v1331_v60, 0.0 }
 0x86a   :  { %v1300_v14 = vadd.f32 1e-05, %v1295_v61 }
 0x86b   :  { %1976 = vmatmul.mubr.f32.gmra.mrb[14].mxu1 %v1336_v57 }
 0x86c   :  { %2279 = vrsqrt.f32 %v1300_v14  ;;  %1978 = vmatprep.mubr.msk.f32.mxu1 %vm2623_vm0, %v2624_v1 }
 0x876   :  { %v2280_v62 = vpop.eup %2279 }
 0x877   :  { %v1310_v63 = vmul.f32 %v2280_v62, %v3117_v16 }
 0x879   :  { %v1321_v2 = vmul.f32 %v1530_v0, %v1310_v63 }
 0x87b   :  { %v1332_v3 = vadd.f32 %v1531_v40, %v1321_v2 }
 0x87d   :  { %v1337_v36 = vmax.f32 %v1332_v3, 0.0 }
 0x87f   :  { %1979 = vmatmul.mubr.f32.gmra.mrb[16].mxu1 %v1337_v36 }
 0x880   :  { %2513 = shalt.err (!%p2510_p0)
}
 0x881   :  { %s2514_s8 = scalar_lea.hbm %s3219_s26, 640 }
 0x882   :  { %p2515_p1 = scmp.ne.s32.totalorder %s3219_s26, %s2514_s8  ;;  %p2518_p2 = scmp.lt.u32.totalorder %s2514_s8, %s3219_s26 }
 0x884   :  { %p2520_p3 = pnand %p2518_p2, %p2515_p1 }
 0x886   :  { %2523 = shalt.err (!%p2520_p3)
}
 0x887   :  { %1475 = dma.vmem_to_hbm [thread:$0]  %s1473_s22, 640, %s3219_s26, [#allocation22]  }
 0x888   :  { %s2524_s23 = scalar_lea.vmem %s1463_s24, 128  ;;  %p2529_p5 = scmp.lt.s32.totalorder %s1463_s24, %s1463_s24 }
 0x889   :  { %p2525_p4 = scmp.ne.s32.totalorder %s1463_s24, %s2524_s23  ;;  %p2530_p6 = scmp.lt.s32.totalorder %s2524_s23, %s2524_s23 }
 0x88b   :  { %p2531_p7 = por %p2530_p6, %p2529_p5 }
 0x88d   :  { %p2532_p8 = pnand %p2531_p7, %p2525_p4 }
 0x88f   :  { %2535 = shalt.err (!%p2532_p8)
}
 0x890   :  { %s2536_s11 = scalar_lea.hbm %s3218_s25, 128 }
 0x891   :  { %p2537_p9 = scmp.ne.s32.totalorder %s3218_s25, %s2536_s11  ;;  %p2540_p10 = scmp.lt.u32.totalorder %s2536_s11, %s3218_s25 }
 0x893   :  { %p2542_p11 = pnand %p2540_p10, %p2537_p9 }
 0x895   :  { %2545 = shalt.err (!%p2542_p11)
}
 0x896   :  { %1465 = dma.vmem_to_hbm [thread:$0]  %s1463_s24, 128, %s3218_s25, [#allocation5]  }
 0x897   :  { %s2627_s30 = smov [#allocation23]  }
 0x898   :  { %s1482_s20 = sshll.u32 %s2627_s30, 4  ;;  %s1483_s20 = int_to_ptr.vmem [resolvable:$true] %s1482_s20 }
 0x899   :  { %s2546_s3 = scalar_lea.vmem %s1483_s20, 640  ;;  %p2551_p13 = scmp.lt.s32.totalorder %s1483_s20, %s1483_s20 }
 0x89a   :  { %p2547_p12 = scmp.ne.s32.totalorder %s1483_s20, %s2546_s3  ;;  %p2552_p0 = scmp.lt.s32.totalorder %s2546_s3, %s2546_s3 }
 0x89c   :  { %p2553_p1 = por %p2552_p0, %p2551_p13 }
 0x89e   :  { %p2554_p2 = pnand %p2553_p1, %p2547_p12 }
 0x8a0   :  { %2557 = shalt.err (!%p2554_p2)
}
 0x8a1   :  { %s2558_s21 = scalar_lea.hbm %s3220_s27, 640 }
 0x8a2   :  { %p2559_p3 = scmp.ne.s32.totalorder %s3220_s27, %s2558_s21  ;;  %p2562_p4 = scmp.lt.u32.totalorder %s2558_s21, %s3220_s27 }
 0x8a4   :  { %p2564_p5 = pnand %p2562_p4, %p2559_p3 }
 0x8a6   :  { %2567 = shalt.err (!%p2564_p5)
}
 0x8a7   :  { %1485 = dma.vmem_to_hbm [thread:$0]  %s1483_s20, 640, %s3220_s27, [#allocation22]  }
 0x8a8   :  { %s3263_s0 = sld [smem:[#allocation48_spill]]  ;;  %s2628_s27 = smov [#allocation24]  }
 0x8a9   :  { %s1492_s29 = sshll.u32 %s2628_s27, 4  ;;  %s1493_s29 = int_to_ptr.vmem [resolvable:$true] %s1492_s29 }
 0x8aa   :  { %s2568_s2 = scalar_lea.vmem %s1493_s29, 640  ;;  %p2573_p7 = scmp.lt.s32.totalorder %s1493_s29, %s1493_s29 }
 0x8ab   :  { %p2569_p6 = scmp.ne.s32.totalorder %s1493_s29, %s2568_s2  ;;  %p2574_p8 = scmp.lt.s32.totalorder %s2568_s2, %s2568_s2 }
 0x8ad   :  { %p2575_p9 = por %p2574_p8, %p2573_p7 }
 0x8ae   :  { %v1532_v1 = vld [vmem:[%s3263_s0] ss:$0 sm:$0xff] }
 0x8af   :  { %p2576_p10 = pnand %p2575_p9, %p2569_p6 }
 0x932   :  { %v1427_v4 = vpop.f32.mrb[8].mxu1 }
 0x933   :  { %v1428_v5 = vadd.f32 %v1532_v1, %v1427_v4  ;;  %v1968_v6 = vpop.f32.mrb[9].mxu1 }
 0x935   :  { %1451 = vst [vmem:[#allocation24] sm:$0xff] %v1428_v5 }
 0x936   :  { %v1432_v7 = vpop.f32.mrb[10].mxu1 }
 0x937   :  { %v1433_v28 = vadd.f32 %v1532_v1, %v1432_v7  ;;  %v1971_v8 = vpop.f32.mrb[11].mxu1 }
 0x939   :  { %1452 = vst [vmem:[#allocation24 + $0x8] sm:$0xff] %v1433_v28 }
 0x93a   :  { %v1437_v9 = vpop.f32.mrb[12].mxu1 }
 0x93b   :  { %v1438_v10 = vadd.f32 %v1532_v1, %v1437_v9  ;;  %v1974_v11 = vpop.f32.mrb[13].mxu1 }
 0x93d   :  { %1453 = vst [vmem:[#allocation24 + $0x10] sm:$0xff] %v1438_v10 }
 0x93e   :  { %v1442_v12 = vpop.f32.mrb[14].mxu1 }
 0x93f   :  { %v1443_v13 = vadd.f32 %v1532_v1, %v1442_v12  ;;  %v1977_v15 = vpop.f32.mrb[15].mxu1 }
 0x941   :  { %1454 = vst [vmem:[#allocation24 + $0x18] sm:$0xff] %v1443_v13 }
 0x952   :  { %v1447_v16 = vpop.f32.mrb[16].mxu1 }
 0x953   :  { %v1448_v17 = vadd.f32 %v1532_v1, %v1447_v16  ;;  %v1980_v19 = vpop.f32.mrb[17].mxu1 }
 0x955   :  { %1455 = vst [vmem:[#allocation24 + $0x20] sm:$0xff] %v1448_v17 }
 0x956   :  { %2579 = shalt.err (!%p2576_p10)
}
 0x957   :  { %s3264_s6 = sld [smem:[#allocation49_spill]] }
 0x95d   :  { %s2580_s23 = scalar_lea.hbm %s3264_s6, 640 }
 0x95e   :  { %p2581_p11 = scmp.ne.s32.totalorder %s3264_s6, %s2580_s23  ;;  %p2584_p12 = scmp.lt.u32.totalorder %s2580_s23, %s3264_s6 }
 0x960   :  { %p2586_p13 = pnand %p2584_p12, %p2581_p11 }
 0x962   :  { %2589 = shalt.err (!%p2586_p13)
}
 0x963   :  { %1495 = dma.vmem_to_hbm [thread:$0]  %s1493_s29, 640, %s3264_s6, [#allocation25]  }
 0x964   :  { %2602 = dma.done.wait [#allocation5], 128  }
 0x965   :  { %2603 = vsyncadd [#allocation5], 4294967168 }
 0x966   :  { %2604 = dma.done.wait [#allocation22], 1280  }
 0x967   :  { %2605 = vsyncadd [#allocation22], 4294966016 }
 0x968   :  { %2606 = dma.done.wait [#allocation25], 640  }
 0x969   :  { %2607 = vsyncadd [#allocation25], 4294966656 }
 0x96a   :  { %1508 = vsyncpa [#allocation4], 1 }
 0x96b   :  { %1509 = vsyncpa [#allocation7], 1 }
 0x96c   :  { %1510 = vsyncpa [#allocation10], 1 }
 0x96d   :  { %1511 = vsyncpa [#allocation13], 1 }
 0x96e   :  { %1512 = vsyncpa [#allocation16], 1 }
 0x96f   :  { %1513 = vsyncpa [#allocation19], 1 }
 0x970   :  { %1514 = vsyncpa [#allocation5], 1 }
 0x971   :  { %1515 = vsyncpa [#allocation22], 1 }
 0x972   :  { %1516 = vsyncpa [#allocation25], 1 }

// kernel: tpu_custom_call.1
= control target key start
LH: loop header
LB: loop body
LE: loop exit
PB: predicated region body
PF: predicated region fallthrough
CT: control target
= control target key end

     0   :  { %s3193_s0 = inlined_call_operand.hbm [shape: f32[8,128], index: 0, kind: input, shape index: {}]   ;;  %s3194_s1 = inlined_call_operand.hbm [shape: f32[8,128], index: 1, kind: input, shape index: {}]   ;;  %s3195_s2 = inlined_call_operand.hbm [shape: f32[128,128], index: 2, kind: input, shape index: {}]   ;;  %s3196_s3 = inlined_call_operand.vmem [shape: f32[1,128], index: 3, kind: input, shape index: {}]   ;;  %s3197_s4 = inlined_call_operand.vmem [shape: f32[1,128], index: 4, kind: input, shape index: {}]   ;;  %s3198_s5 = inlined_call_operand.vmem [shape: f32[1,128], index: 5, kind: input, shape index: {}]   ;;  %s3199_s6 = inlined_call_operand.hbm [shape: f32[128,128], index: 6, kind: input, shape index: {}]   ;;  %s3200_s7 = inlined_call_operand.vmem [shape: f32[1,128], index: 7, kind: input, shape index: {}]   ;;  %s3201_s8 = inlined_call_operand.hbm [shape: f32[128,128], index: 8, kind: input, shape index: {}]   ;;  %s3202_s9 = inlined_call_operand.hbm [shape: f32[128,128], index: 9, kind: input, shape index: {}]   ;;  %s3203_s10 = inlined_call_operand.vmem [shape: f32[1,128], index: 10, kind: input, shape index: {}]   ;;  %s3204_s11 = inlined_call_operand.vmem [shape: f32[1,128], index: 11, kind: input, shape index: {}]   ;;  %s3205_s12 = inlined_call_operand.vmem [shape: f32[1,128], index: 12, kind: input, shape index: {}]   ;;  %s3206_s13 = inlined_call_operand.hbm [shape: f32[128,128], index: 13, kind: input, shape index: {}]   ;;  %s3207_s14 = inlined_call_operand.vmem [shape: f32[1,128], index: 14, kind: input, shape index: {}]   ;;  %s3208_s15 = inlined_call_operand.vmem [shape: f32[1,128], index: 15, kind: input, shape index: {}]   ;;  %s3209_s16 = inlined_call_operand.vmem [shape: f32[1,128], index: 16, kind: input, shape index: {}]   ;;  %s3210_s17 = inlined_call_operand.hbm [shape: f32[128,640], index: 17, kind: input, shape index: {}]   ;;  %s3211_s18 = inlined_call_operand.vmem [shape: f32[1,640], index: 18, kind: input, shape index: {}]   ;;  %s3212_s19 = inlined_call_operand.hbm [shape: f32[128,128], index: 19, kind: input, shape index: {}]   ;;  %s3213_s20 = inlined_call_operand.vmem [shape: f32[1,128], index: 20, kind: input, shape index: {}]   ;;  %s3214_s21 = inlined_call_operand.vmem [shape: f32[1,128], index: 21, kind: input, shape index: {}]   ;;  %s3215_s22 = inlined_call_operand.vmem [shape: f32[1,128], index: 22, kind: input, shape index: {}]   ;;  %s3216_s23 = inlined_call_operand.hbm [shape: f32[128,128], index: 23, kind: input, shape index: {}]   ;;  %s3217_s24 = inlined_call_operand.vmem [shape: f32[1,128], index: 24, kind: input, shape index: {}]   ;;  %s3218_s25 = inlined_call_operand.hbm [shape: f32[8,128], index: 25, kind: output, shape index: {0}]   ;;  %s3219_s26 = inlined_call_operand.hbm [shape: f32[8,640], index: 26, kind: output, shape index: {1}]   ;;  %s3220_s27 = inlined_call_operand.hbm [shape: f32[8,640], index: 27, kind: output, shape index: {2}]   ;;  %s3221_s28 = inlined_call_operand.hbm [shape: f32[8,640], index: 28, kind: output, shape index: {3}]  }
   0x1   :  { %3233 = sst [smem:[#allocation35_spill]] %s3193_s0 }
   0x2   :  { %3234 = sst [smem:[#allocation36_spill]] %s3194_s1 }
   0x3   :  { %3235 = sst [smem:[#allocation37_spill]] %s3195_s2 }
   0x4   :  { %3236 = sst [smem:[#allocation38_spill]] %s3196_s3 }
   0x5   :  { %3237 = sst [smem:[#allocation39_spill]] %s3197_s4 }
   0x6   :  { %3238 = sst [smem:[#allocation40_spill]] %s3198_s5 }
   0x7   :  { %3239 = sst [smem:[#allocation41_spill]] %s3199_s6 }
   0x8   :  { %3240 = sst [smem:[#allocation42_spill]] %s3200_s7 }
   0x9   :  { %3241 = sst [smem:[#allocation43_spill]] %s3201_s8 }
   0xa   :  { %3242 = sst [smem:[#allocation44_spill]] %s3202_s9 }
   0xb   :  { %3243 = sst [smem:[#allocation45_spill]] %s3203_s10 }
   0xc   :  { %3244 = sst [smem:[#allocation46_spill]] %s3204_s11 }
   0xd   :  { %3245 = sst [smem:[#allocation47_spill]] %s3205_s12 }
   0xe   :  { %3246 = sst [smem:[#allocation48_spill]] %s3217_s24 }
   0xf   :  { %3247 = sst [smem:[#allocation49_spill]] %s3221_s28 }
  0x10   :  { %34 = vsyncpa [#allocation4], 0 }
  0x11   :  { %35 = vsyncpa [#allocation7], 0 }
  0x12   :  { %36 = vsyncpa [#allocation10], 0 }
  0x13   :  { %37 = vsyncpa [#allocation13], 0 }
  0x14   :  { %38 = vsyncpa [#allocation16], 0 }
  0x15   :  { %39 = vsyncpa [#allocation19], 0 }
  0x16   :  { %40 = vsyncpa [#allocation5], 0 }
  0x17   :  { %41 = vsyncpa [#allocation22], 0 }
  0x18   :  { %42 = vsyncpa [#allocation25], 0  ;;  %s2608_s8 = smov [#allocation6]   ;;  %s3248_s3 = sld [smem:[#allocation36_spill]] }
  0x19   :  { %s59_s5 = sshll.u32 %s2608_s8, 4  ;;  %s60_s5 = int_to_ptr.vmem [resolvable:$true] %s59_s5 }
  0x1e   :  { %s2282_s6 = scalar_lea.hbm %s3248_s3, 128 }
  0x1f   :  { %p2283_p0 = scmp.ne.s32.totalorder %s3248_s3, %s2282_s6  ;;  %p2286_p1 = scmp.lt.u32.totalorder %s2282_s6, %s3248_s3 }
  0x21   :  { %p2288_p2 = pnand %p2286_p1, %p2283_p0 }
  0x23   :  { %2291 = shalt.err (!%p2288_p2)
}
  0x24   :  { %s2292_s2 = scalar_lea.vmem %s60_s5, 128  ;;  %p2297_p4 = scmp.lt.s32.totalorder %s60_s5, %s60_s5 }
  0x25   :  { %p2293_p3 = scmp.ne.s32.totalorder %s60_s5, %s2292_s2  ;;  %p2298_p5 = scmp.lt.s32.totalorder %s2292_s2, %s2292_s2 }
  0x27   :  { %p2299_p6 = por %p2298_p5, %p2297_p4 }
  0x29   :  { %p2300_p7 = pnand %p2299_p6, %p2293_p3 }
  0x2b   :  { %2303 = shalt.err (!%p2300_p7)
}
  0x2c   :  { %62 = dma.hbm_to_vmem [thread:$0]  %s3248_s3, 128, %s60_s5, [#allocation7]  }
  0x2d   :  { %s2609_s1 = smov [#allocation9]   ;;  %s2610_s8 = smov [#allocation12]  }
  0x2e   :  { %s86_s4 = sshll.u32 %s2609_s1, 4  ;;  %s112_s9 = sshll.u32 %s2610_s8, 4  ;;  %s87_s4 = int_to_ptr.vmem [resolvable:$true] %s86_s4  ;;  %s113_s9 = int_to_ptr.vmem [resolvable:$true] %s112_s9 }
  0x2f   :  { %s3249_s10 = sld [smem:[#allocation41_spill]] }
  0x35   :  { %s2304_s0 = scalar_lea.hbm %s3249_s10, 2048 }
  0x36   :  { %p2305_p8 = scmp.ne.s32.totalorder %s3249_s10, %s2304_s0  ;;  %p2308_p9 = scmp.lt.u32.totalorder %s2304_s0, %s3249_s10 }
  0x38   :  { %p2310_p10 = pnand %p2308_p9, %p2305_p8 }
  0x3a   :  { %2313 = shalt.err (!%p2310_p10)
}
  0x3b   :  { %s2314_s5 = scalar_lea.vmem %s87_s4, 2048  ;;  %p2319_p12 = scmp.lt.s32.totalorder %s87_s4, %s87_s4 }
  0x3c   :  { %p2315_p11 = scmp.ne.s32.totalorder %s87_s4, %s2314_s5  ;;  %p2320_p13 = scmp.lt.s32.totalorder %s2314_s5, %s2314_s5 }
  0x3e   :  { %p2321_p0 = por %p2320_p13, %p2319_p12 }
  0x40   :  { %p2322_p1 = pnand %p2321_p0, %p2315_p11 }
  0x42   :  { %2325 = shalt.err (!%p2322_p1)
}
  0x43   :  { %s3229_s3 = smov 128   ;;  %s3231_s7 = smov 8  }
  0x44   :  { %92 = dma.hbm_to_vmem [thread:$0]  %s3249_s10, 2048, %s87_s4, [#allocation10], %s3229_s3, %s3229_s3, %s3231_s7  }
  0x45   :  { %s3250_s30 = sld [smem:[#allocation44_spill]] }
  0x4b   :  { %s2326_s6 = scalar_lea.hbm %s3250_s30, 2048 }
  0x4c   :  { %p2327_p2 = scmp.ne.s32.totalorder %s3250_s30, %s2326_s6  ;;  %p2330_p3 = scmp.lt.u32.totalorder %s2326_s6, %s3250_s30 }
  0x4e   :  { %p2332_p4 = pnand %p2330_p3, %p2327_p2 }
  0x50   :  { %2335 = shalt.err (!%p2332_p4)
}
  0x51   :  { %s2336_s5 = scalar_lea.vmem %s113_s9, 2048  ;;  %p2341_p6 = scmp.lt.s32.totalorder %s113_s9, %s113_s9 }
  0x52   :  { %p2337_p5 = scmp.ne.s32.totalorder %s113_s9, %s2336_s5  ;;  %p2342_p7 = scmp.lt.s32.totalorder %s2336_s5, %s2336_s5 }
  0x54   :  { %p2343_p8 = por %p2342_p7, %p2341_p6 }
  0x56   :  { %p2344_p9 = pnand %p2343_p8, %p2337_p5 }
  0x58   :  { %2347 = shalt.err (!%p2344_p9)
}
  0x59   :  { %118 = dma.hbm_to_vmem [thread:$0]  %s3250_s30, 2048, %s113_s9, [#allocation13], %s3229_s3, %s3229_s3, %s3231_s7  }
  0x5a   :  { %s2613_s12 = smov [#allocation15]   ;;  %s2348_s6 = scalar_lea.hbm %s3210_s17, 10240 }
  0x5b   :  { %s148_s1 = sshll.u32 %s2613_s12, 4  ;;  %p2349_p10 = scmp.ne.s32.totalorder %s3210_s17, %s2348_s6  ;;  %s149_s1 = int_to_ptr.vmem [resolvable:$true] %s148_s1 }
  0x5c   :  { %p2352_p11 = scmp.lt.u32.totalorder %s2348_s6, %s3210_s17 }
  0x5e   :  { %p2354_p12 = pnand %p2352_p11, %p2349_p10 }
  0x60   :  { %2357 = shalt.err (!%p2354_p12)
}
  0x61   :  { %s2358_s5 = scalar_lea.vmem %s149_s1, 10240  ;;  %p2363_p0 = scmp.lt.s32.totalorder %s149_s1, %s149_s1 }
  0x62   :  { %p2359_p13 = scmp.ne.s32.totalorder %s149_s1, %s2358_s5  ;;  %p2364_p1 = scmp.lt.s32.totalorder %s2358_s5, %s2358_s5 }
  0x64   :  { %p2365_p2 = por %p2364_p1, %p2363_p0 }
  0x66   :  { %p2366_p3 = pnand %p2365_p2, %p2359_p13 }
  0x68   :  { %2369 = shalt.err (!%p2366_p3)
}
  0x69   :  { %s2614_s9 = smov 640   ;;  %s2615_s30 = smov 40  }
  0x6a   :  { %154 = dma.hbm_to_vmem [thread:$0]  %s3210_s17, 10240, %s149_s1, [#allocation16], %s2614_s9, %s2614_s9, %s2615_s30  }
  0x6b   :  { %s2616_s12 = smov [#allocation3]   ;;  %s2617_s8 = smov [#allocation8]  }
  0x6c   :  { %s49_s28 = sshll.u32 %s2616_s12, 4  ;;  %s68_s0 = sshll.u32 %s2617_s8, 4  ;;  %s50_s28 = int_to_ptr.vmem [resolvable:$true] %s49_s28  ;;  %s2828_s0 = int_to_ptr.vmem [resolvable:$true] %s68_s0 }
  0x6d   :  { %s3251_s29 = sld [smem:[#allocation35_spill]] }
  0x73   :  { %s2370_s2 = scalar_lea.hbm %s3251_s29, 128 }
  0x74   :  { %p2371_p4 = scmp.ne.s32.totalorder %s3251_s29, %s2370_s2  ;;  %p2374_p5 = scmp.lt.u32.totalorder %s2370_s2, %s3251_s29 }
  0x76   :  { %p2376_p6 = pnand %p2374_p5, %p2371_p4 }
  0x78   :  { %2379 = shalt.err (!%p2376_p6)
}
  0x79   :  { %s2380_s17 = scalar_lea.vmem %s50_s28, 128  ;;  %p2385_p8 = scmp.lt.s32.totalorder %s50_s28, %s50_s28 }
  0x7a   :  { %p2381_p7 = scmp.ne.s32.totalorder %s50_s28, %s2380_s17  ;;  %p2386_p9 = scmp.lt.s32.totalorder %s2380_s17, %s2380_s17 }
  0x7c   :  { %p2387_p10 = por %p2386_p9, %p2385_p8 }
  0x7e   :  { %p2388_p11 = pnand %p2387_p10, %p2381_p7 }
  0x80   :  { %2391 = shalt.err (!%p2388_p11)
}
  0x81   :  { %52 = dma.hbm_to_vmem [thread:$0]  %s3251_s29, 128, %s50_s28, [#allocation4]  }
  0x82   :  { %s3252_s4 = sld [smem:[#allocation37_spill]] }
  0x88   :  { %s2392_s10 = scalar_lea.hbm %s3252_s4, 2048 }
  0x89   :  { %p2393_p12 = scmp.ne.s32.totalorder %s3252_s4, %s2392_s10  ;;  %p2396_p13 = scmp.lt.u32.totalorder %s2392_s10, %s3252_s4 }
  0x8b   :  { %p2398_p0 = pnand %p2396_p13, %p2393_p12 }
  0x8d   :  { %2401 = shalt.err (!%p2398_p0)
}
  0x8e   :  { %s2402_s6 = scalar_lea.vmem %s2828_s0, 2048  ;;  %p2407_p2 = scmp.lt.s32.totalorder %s2828_s0, %s2828_s0 }
  0x8f   :  { %p2403_p1 = scmp.ne.s32.totalorder %s2828_s0, %s2402_s6  ;;  %p2408_p3 = scmp.lt.s32.totalorder %s2402_s6, %s2402_s6 }
  0x91   :  { %p2409_p4 = por %p2408_p3, %p2407_p2 }
  0x93   :  { %p2410_p5 = pnand %p2409_p4, %p2403_p1 }
  0x95   :  { %2413 = shalt.err (!%p2410_p5)
}
  0x96   :  { %s3253_s28 = smov 8   ;;  %s3254_s11 = smov 128  }
  0x97   :  { %74 = dma.hbm_to_vmem [thread:$0]  %s3252_s4, 2048, %s2828_s0, [#allocation7], %s3254_s11, %s3254_s11, %s3253_s28  }
  0x98   :  { %s2618_s5 = smov [#allocation11]   ;;  %s2619_s1 = smov [#allocation14]  }
  0x99   :  { %s100_s17 = sshll.u32 %s2618_s5, 4  ;;  %s130_s9 = sshll.u32 %s2619_s1, 4  ;;  %s101_s17 = int_to_ptr.vmem [resolvable:$true] %s100_s17  ;;  %s2862_s9 = int_to_ptr.vmem [resolvable:$true] %s130_s9 }
  0x9a   :  { %s3255_s10 = sld [smem:[#allocation43_spill]] }
  0xa0   :  { %s2414_s12 = scalar_lea.hbm %s3255_s10, 2048 }
  0xa1   :  { %p2415_p6 = scmp.ne.s32.totalorder %s3255_s10, %s2414_s12  ;;  %p2418_p7 = scmp.lt.u32.totalorder %s2414_s12, %s3255_s10 }
  0xa3   :  { %p2420_p8 = pnand %p2418_p7, %p2415_p6 }
  0xa5   :  { %2423 = shalt.err (!%p2420_p8)
}
  0xa6   :  { %s2424_s0 = scalar_lea.vmem %s101_s17, 2048  ;;  %p2429_p10 = scmp.lt.s32.totalorder %s101_s17, %s101_s17 }
  0xa7   :  { %p2425_p9 = scmp.ne.s32.totalorder %s101_s17, %s2424_s0  ;;  %p2430_p11 = scmp.lt.s32.totalorder %s2424_s0, %s2424_s0 }
  0xa9   :  { %p2431_p12 = por %p2430_p11, %p2429_p10 }
  0xab   :  { %p2432_p13 = pnand %p2431_p12, %p2425_p9 }
  0xad   :  { %2435 = shalt.err (!%p2432_p13)
}
  0xae   :  { %106 = dma.hbm_to_vmem [thread:$0]  %s3255_s10, 2048, %s101_s17, [#allocation10], %s3254_s11, %s3254_s11, %s3253_s28  }
  0xaf   :  { %s2436_s1 = scalar_lea.hbm %s3206_s13, 2048 }
  0xb0   :  { %p2437_p0 = scmp.ne.s32.totalorder %s3206_s13, %s2436_s1  ;;  %p2440_p1 = scmp.lt.u32.totalorder %s2436_s1, %s3206_s13 }
  0xb2   :  { %p2442_p2 = pnand %p2440_p1, %p2437_p0 }
  0xb4   :  { %2445 = shalt.err (!%p2442_p2)
}
  0xb5   :  { %s2446_s7 = scalar_lea.vmem %s2862_s9, 2048  ;;  %p2451_p4 = scmp.lt.s32.totalorder %s2862_s9, %s2862_s9 }
  0xb6   :  { %p2447_p3 = scmp.ne.s32.totalorder %s2862_s9, %s2446_s7  ;;  %p2452_p5 = scmp.lt.s32.totalorder %s2446_s7, %s2446_s7 }
  0xb8   :  { %p2453_p6 = por %p2452_p5, %p2451_p4 }
  0xba   :  { %p2454_p7 = pnand %p2453_p6, %p2447_p3 }
  0xbc   :  { %2457 = shalt.err (!%p2454_p7)
}
  0xbd   :  { %136 = dma.hbm_to_vmem [thread:$0]  %s3206_s13, 2048, %s2862_s9, [#allocation13], %s3254_s11, %s3254_s11, %s3253_s28  }
  0xbe   :  { %s2620_s8 = smov [#allocation17]   ;;  %s2621_s0 = smov [#allocation18]  }
  0xbf   :  { %s162_s6 = sshll.u32 %s2620_s8, 4  ;;  %s180_s4 = sshll.u32 %s2621_s0, 4  ;;  %s163_s6 = int_to_ptr.vmem [resolvable:$true] %s162_s6  ;;  %s2899_s4 = int_to_ptr.vmem [resolvable:$true] %s180_s4 }
  0xc0   :  { %s2458_s5 = scalar_lea.hbm %s3212_s19, 2048 }
  0xc1   :  { %p2459_p8 = scmp.ne.s32.totalorder %s3212_s19, %s2458_s5  ;;  %p2462_p9 = scmp.lt.u32.totalorder %s2458_s5, %s3212_s19 }
  0xc3   :  { %p2464_p10 = pnand %p2462_p9, %p2459_p8 }
  0xc5   :  { %2467 = shalt.err (!%p2464_p10)
}
  0xc6   :  { %s2468_s13 = scalar_lea.vmem %s163_s6, 2048  ;;  %p2473_p12 = scmp.lt.s32.totalorder %s163_s6, %s163_s6 }
  0xc7   :  { %p2469_p11 = scmp.ne.s32.totalorder %s163_s6, %s2468_s13  ;;  %p2474_p13 = scmp.lt.s32.totalorder %s2468_s13, %s2468_s13 }
  0xc9   :  { %p2475_p0 = por %p2474_p13, %p2473_p12 }
  0xcb   :  { %p2476_p1 = pnand %p2475_p0, %p2469_p11 }
  0xcd   :  { %2479 = shalt.err (!%p2476_p1)
}
  0xce   :  { %168 = dma.hbm_to_vmem [thread:$0]  %s3212_s19, 2048, %s163_s6, [#allocation16], %s3254_s11, %s3254_s11, %s3253_s28  }
  0xcf   :  { %s2480_s10 = scalar_lea.hbm %s3216_s23, 2048 }
  0xd0   :  { %p2481_p2 = scmp.ne.s32.totalorder %s3216_s23, %s2480_s10  ;;  %p2484_p3 = scmp.lt.u32.totalorder %s2480_s10, %s3216_s23 }
  0xd2   :  { %p2486_p4 = pnand %p2484_p3, %p2481_p2 }
  0xd4   :  { %2489 = shalt.err (!%p2486_p4)
}
  0xd5   :  { %s2490_s5 = scalar_lea.vmem %s2899_s4, 2048  ;;  %p2495_p6 = scmp.lt.s32.totalorder %s2899_s4, %s2899_s4 }
  0xd6   :  { %p2491_p5 = scmp.ne.s32.totalorder %s2899_s4, %s2490_s5  ;;  %p2496_p7 = scmp.lt.s32.totalorder %s2490_s5, %s2490_s5 }
  0xd8   :  { %p2497_p8 = por %p2496_p7, %p2495_p6 }
  0xda   :  { %p2498_p9 = pnand %p2497_p8, %p2491_p5 }
  0xdc   :  { %2501 = shalt.err (!%p2498_p9)
}
  0xdd   :  { %186 = dma.hbm_to_vmem [thread:$0]  %s3216_s23, 2048, %s2899_s4, [#allocation19], %s3254_s11, %s3254_s11, %s3253_s28  }
  0xde   :  { %2590 = dma.done.wait [#allocation4], 128  }
  0xdf   :  { %2591 = vsyncadd [#allocation4], 4294967168 }
  0xe0   :  { %2592 = dma.done.wait [#allocation7], 2176  }
  0xe1   :  { %2593 = vsyncadd [#allocation7], 4294965120 }
  0xe2   :  { %2594 = dma.done.wait [#allocation10], 4096  }
  0xe3   :  { %2595 = vsyncadd [#allocation10], 4294963200 }
  0xe4   :  { %2596 = dma.done.wait [#allocation13], 4096  }
  0xe5   :  { %2597 = vsyncadd [#allocation13], 4294963200 }
  0xe6   :  { %2598 = dma.done.wait [#allocation16], 12288  }
  0xe7   :  { %2599 = vsyncadd [#allocation16], 4294955008 }
  0xe8   :  { %2600 = dma.done.wait [#allocation19], 2048  }
  0xe9   :  { %2601 = vsyncadd [#allocation19], 4294965248  ;;  %v2622_v0 = vmov 0.0|0.0   ;;  %vm2623_vm0 = vmmov 0   ;;  %v2624_v1 = vmov 0.0   ;;  %v225_v2 = vld [vmem:[#allocation8] sm:$0xff] }
  0xea   :  { %1981 = vmatprep.subr.bf16.mxu0 %v2622_v0  ;;  %1709 = vmatprep.mubr.msk.f32.mxu0 %vm2623_vm0, %v2624_v1  ;;  %v226_v3 = vld [vmem:[#allocation8 + $0x8] sm:$0xff]  ;;  %v227_v4 = vld [vmem:[#allocation8 + $0x10] sm:$0xff]  ;;  %v228_v6 = vld [vmem:[#allocation8 + $0x18] sm:$0xff]  ;;  %s3256_s11 = sld [smem:[#allocation38_spill]]  ;;  %s3257_s30 = sld [smem:[#allocation45_spill]] }
  0xeb   :  { %2005 = vmatprep.subr.bf16.mxu1 %v2622_v0  ;;  %1744 = vmatprep.mubr.msk.f32.mxu1 %vm2623_vm0, %v2624_v1  ;;  %v1982_v5 = vpack.c.bf16 %v226_v3, %v225_v2  ;;  %v1985_v7 = vpack.c.bf16 %v228_v6, %v227_v4  ;;  %v229_v8 = vld [vmem:[#allocation8 + $0x20] sm:$0xff]  ;;  %v230_v9 = vld [vmem:[#allocation8 + $0x28] sm:$0xff]  ;;  %v231_v11 = vld [vmem:[#allocation8 + $0x30] sm:$0xff]  ;;  %s3258_s13 = sld [smem:[#allocation39_spill]]  ;;  %s3259_s7 = sld [smem:[#allocation40_spill]] }
  0xec   :  { %v1988_v10 = vpack.c.bf16 %v230_v9, %v229_v8  ;;  %v232_v12 = vld [vmem:[#allocation8 + $0x38] sm:$0xff]  ;;  %v233_v14 = vld [vmem:[#allocation8 + $0x40] sm:$0xff]  ;;  %v234_v15 = vld [vmem:[#allocation8 + $0x48] sm:$0xff]  ;;  %s3260_s8 = sld [smem:[#allocation46_spill]]  ;;  %s3261_s2 = sld [smem:[#allocation47_spill]] }
  0xed   :  { %1983 = vmatpush3.bf16.msra.mxu0 %v1982_v5  ;;  %v1991_v13 = vpack.c.bf16 %v232_v12, %v231_v11  ;;  %v1994_v16 = vpack.c.bf16 %v234_v15, %v233_v14  ;;  %v235_v17 = vld [vmem:[#allocation8 + $0x50] sm:$0xff]  ;;  %v236_v18 = vld [vmem:[#allocation8 + $0x58] sm:$0xff]  ;;  %v237_v20 = vld [vmem:[#allocation8 + $0x60] sm:$0xff]  ;;  %v220_v14 = vlaneseq  ;;  %s3262_s6 = sld [smem:[#allocation42_spill]]  ;;  %s2626_s9 = smov [#allocation20]  }
  0xee   :  { %1984 = vmatprep.subr.bf16.mxu0 %v2622_v0  ;;  %v1997_v19 = vpack.c.bf16 %v236_v18, %v235_v17  ;;  %v238_v21 = vld [vmem:[#allocation8 + $0x68] sm:$0xff]  ;;  %v239_v23 = vld [vmem:[#allocation8 + $0x70] sm:$0xff]  ;;  %v240_v24 = vld [vmem:[#allocation8 + $0x78] sm:$0xff]  ;;  %s1462_s24 = sshll.u32 %s2626_s9, 4  ;;  %s1463_s24 = int_to_ptr.vmem [resolvable:$true] %s1462_s24 }
  0xef   :  { %v2000_v22 = vpack.c.bf16 %v238_v21, %v237_v20  ;;  %v2003_v25 = vpack.c.bf16 %v240_v24, %v239_v23  ;;  %v448_v26 = vld [vmem:[#allocation11] sm:$0xff]  ;;  %v449_v27 = vld [vmem:[#allocation11 + $0x8] sm:$0xff]  ;;  %v2949_v28 = vld [vmem:[#allocation3] sm:$0xff]  ;;  %v221_v15 = vand.u32 127, %v220_v14 }
  0xf0   :  { %v2030_v29 = vpack.c.bf16 %v449_v27, %v448_v26  ;;  %v450_v30 = vld [vmem:[#allocation11 + $0x10] sm:$0xff]  ;;  %v451_v31 = vld [vmem:[#allocation11 + $0x18] sm:$0xff]  ;;  %v452_v33 = vld [vmem:[#allocation11 + $0x20] sm:$0xff] }
  0xf1   :  { %1986 = vmatpush3.bf16.msra.mxu0 %v1985_v7  ;;  %v2033_v32 = vpack.c.bf16 %v451_v31, %v450_v30  ;;  %v453_v34 = vld [vmem:[#allocation11 + $0x28] sm:$0xff]  ;;  %v454_v36 = vld [vmem:[#allocation11 + $0x30] sm:$0xff]  ;;  %v455_v37 = vld [vmem:[#allocation11 + $0x38] sm:$0xff]  ;;  %vm222_vm1 = vcmp.lt.s32.totalorder %v221_v15, 32 }
  0xf2   :  { %1987 = vmatprep.subr.bf16.mxu0 %v2622_v0  ;;  %v2036_v35 = vpack.c.bf16 %v453_v34, %v452_v33  ;;  %v2039_v38 = vpack.c.bf16 %v455_v37, %v454_v36  ;;  %v456_v39 = vld [vmem:[#allocation11 + $0x40] sm:$0xff]  ;;  %v457_v40 = vld [vmem:[#allocation11 + $0x48] sm:$0xff]  ;;  %v458_v42 = vld [vmem:[#allocation11 + $0x50] sm:$0xff]  ;;  %v2979_v18 = vsel %vm222_vm1, 1.0, %v2624_v1 }
  0xf3   :  { %v2042_v41 = vpack.c.bf16 %v457_v40, %v456_v39  ;;  %v459_v43 = vld [vmem:[#allocation11 + $0x58] sm:$0xff]  ;;  %v460_v45 = vld [vmem:[#allocation11 + $0x60] sm:$0xff]  ;;  %v461_v46 = vld [vmem:[#allocation11 + $0x68] sm:$0xff] }
  0xf4   :  { %v2045_v44 = vpack.c.bf16 %v459_v43, %v458_v42  ;;  %v2048_v47 = vpack.c.bf16 %v461_v46, %v460_v45  ;;  %v462_v48 = vld [vmem:[#allocation11 + $0x70] sm:$0xff]  ;;  %v463_v49 = vld [vmem:[#allocation11 + $0x78] sm:$0xff]  ;;  %v542_v51 = vld [vmem:[#allocation12] sm:$0xff] }
  0xf5   :  { %1989 = vmatpush3.bf16.msra.mxu0 %v1988_v10  ;;  %v2051_v50 = vpack.c.bf16 %v463_v49, %v462_v48  ;;  %v543_v52 = vld [vmem:[#allocation12 + $0x8] sm:$0xff]  ;;  %v544_v54 = vld [vmem:[#allocation12 + $0x10] sm:$0xff]  ;;  %v545_v55 = vld [vmem:[#allocation12 + $0x18] sm:$0xff] }
  0xf6   :  { %1990 = vmatprep.subr.bf16.mxu0 %v2622_v0  ;;  %v2054_v53 = vpack.c.bf16 %v543_v52, %v542_v51  ;;  %v2057_v56 = vpack.c.bf16 %v545_v55, %v544_v54  ;;  %v546_v57 = vld [vmem:[#allocation12 + $0x20] sm:$0xff]  ;;  %v547_v58 = vld [vmem:[#allocation12 + $0x28] sm:$0xff]  ;;  %v548_v60 = vld [vmem:[#allocation12 + $0x30] sm:$0xff] }
  0xf7   :  { %v2060_v59 = vpack.c.bf16 %v547_v58, %v546_v57  ;;  %v549_v61 = vld [vmem:[#allocation12 + $0x38] sm:$0xff]  ;;  %v550_v63 = vld [vmem:[#allocation12 + $0x40] sm:$0xff]  ;;  %v551_v2 = vld [vmem:[#allocation12 + $0x48] sm:$0xff] }
  0xf8   :  { %v2063_v62 = vpack.c.bf16 %v549_v61, %v548_v60  ;;  %v2066_v3 = vpack.c.bf16 %v551_v2, %v550_v63  ;;  %v552_v4 = vld [vmem:[#allocation12 + $0x50] sm:$0xff]  ;;  %v553_v5 = vld [vmem:[#allocation12 + $0x58] sm:$0xff]  ;;  %v554_v7 = vld [vmem:[#allocation12 + $0x60] sm:$0xff] }
  0xf9   :  { %1992 = vmatpush3.bf16.msra.mxu0 %v1991_v13  ;;  %v2069_v6 = vpack.c.bf16 %v553_v5, %v552_v4  ;;  %v555_v8 = vld [vmem:[#allocation12 + $0x68] sm:$0xff]  ;;  %v556_v10 = vld [vmem:[#allocation12 + $0x70] sm:$0xff]  ;;  %v557_v11 = vld [vmem:[#allocation12 + $0x78] sm:$0xff] }
  0xfa   :  { %1993 = vmatprep.subr.bf16.mxu0 %v2622_v0  ;;  %v2072_v9 = vpack.c.bf16 %v555_v8, %v554_v7  ;;  %v2075_v12 = vpack.c.bf16 %v557_v11, %v556_v10  ;;  %v541_v13 = vld [vmem:[#allocation6] sm:$0xff]  ;;  %v348_v27 = vld [vmem:[#allocation9] sm:$0xff]  ;;  %v350_v30 = vld [vmem:[#allocation9 + $0x10] sm:$0xff] }
  0xfb   :  { %v352_v39 = vld [vmem:[#allocation9 + $0x20] sm:$0xff]  ;;  %v353_v40 = vld [vmem:[#allocation9 + $0x28] sm:$0xff]  ;;  %v354_v42 = vld [vmem:[#allocation9 + $0x30] sm:$0xff] }
  0xfc   :  { %v355_v43 = vld [vmem:[#allocation9 + $0x38] sm:$0xff]  ;;  %v356_v45 = vld [vmem:[#allocation9 + $0x40] sm:$0xff]  ;;  %v357_v46 = vld [vmem:[#allocation9 + $0x48] sm:$0xff] }
  0xfd   :  { %1995 = vmatpush3.bf16.msra.mxu0 %v1994_v16  ;;  %v1518_v16 = vld [vmem:[%s3256_s11] ss:$0 sm:$0xff]  ;;  %v359_v49 = vld [vmem:[#allocation9 + $0x58] sm:$0xff]  ;;  %v360_v51 = vld [vmem:[#allocation9 + $0x60] sm:$0xff] }
  0xfe   :  { %1996 = vmatprep.subr.bf16.mxu0 %v2622_v0  ;;  %v358_v48 = vld [vmem:[#allocation9 + $0x50] sm:$0xff]  ;;  %v361_v52 = vld [vmem:[#allocation9 + $0x68] sm:$0xff]  ;;  %v363_v55 = vld [vmem:[#allocation9 + $0x78] sm:$0xff] }
  0xff   :  { %v362_v54 = vld [vmem:[#allocation9 + $0x70] sm:$0xff]  ;;  %v659_v8 = vld [vmem:[#allocation14] sm:$0xff]  ;;  %v662_v15 = vld [vmem:[#allocation14 + $0x18] sm:$0xff] }
 0x100   :  { %v1519_v4 = vld [vmem:[%s3258_s13] ss:$0 sm:$0xff] }
 0x101   :  { %1998 = vmatpush3.bf16.msra.mxu0 %v1997_v19 }
 0x102   :  { %1999 = vmatprep.subr.bf16.mxu0 %v2622_v0 }
 0x105   :  { %2001 = vmatpush3.bf16.msra.mxu0 %v2000_v22  ;;  %v1523_v22 = vld [vmem:[%s3257_s30] ss:$0 sm:$0xff] }
 0x106   :  { %2002 = vmatprep.subr.bf16.mxu0 %v2622_v0 }
 0x109   :  { %2004 = vmatpush3.bf16.msra.mxu0 %v2003_v25 }
 0x10a   :  { %2029 = vmatprep.subr.bf16.mxu0 %v2622_v0 }
 0x10c   :  { %1710 = vmatmul.mubr.f32.vlgmr.msra.gmra.mrb[0].mxu0 %v2949_v28 }
 0x10d   :  { %2031 = vmatpush3.bf16.msra.mxu0 %v2030_v29  ;;  %1779 = vmatprep.mubr.msk.f32.mxu0 %vm2623_vm0, %v2624_v1  ;;  %v349_v29 = vld [vmem:[#allocation9 + $0x8] sm:$0xff] }
 0x10e   :  { %2032 = vmatprep.subr.bf16.mxu0 %v2622_v0  ;;  %v2006_v31 = vpack.c.bf16 %v349_v29, %v348_v27  ;;  %v669_v27 = vld [vmem:[#allocation14 + $0x50] sm:$0xff]  ;;  %v670_v29 = vld [vmem:[#allocation14 + $0x58] sm:$0xff] }
 0x110   :  { %2007 = vmatpush3.bf16.msra.mxu1 %v2006_v31  ;;  %v671_v31 = vld [vmem:[#allocation14 + $0x60] sm:$0xff] }
 0x111   :  { %2034 = vmatpush3.bf16.msra.mxu0 %v2033_v32  ;;  %v351_v32 = vld [vmem:[#allocation9 + $0x18] sm:$0xff]  ;;  %2008 = vmatprep.subr.bf16.mxu1 %v2622_v0 }
 0x112   :  { %2035 = vmatprep.subr.bf16.mxu0 %v2622_v0  ;;  %v2009_v33 = vpack.c.bf16 %v351_v32, %v350_v30  ;;  %v2093_v30 = vpack.c.bf16 %v670_v29, %v669_v27  ;;  %v672_v32 = vld [vmem:[#allocation14 + $0x68] sm:$0xff]  ;;  %v802_v27 = vld [vmem:[#allocation15 + $0xa0] sm:$0xff] }
 0x113   :  { %v807_v29 = vld [vmem:[#allocation15 + $0xc8] sm:$0xff] }
 0x114   :  { %2010 = vmatpush3.bf16.msra.mxu1 %v2009_v33  ;;  %v2096_v33 = vpack.c.bf16 %v672_v32, %v671_v31  ;;  %v810_v31 = vld [vmem:[#allocation15 + $0xe0] sm:$0xff]  ;;  %v2111_v32 = vpack.c.bf16 %v807_v29, %v802_v27 }
 0x115   :  { %2037 = vmatpush3.bf16.msra.mxu0 %v2036_v35  ;;  %2011 = vmatprep.subr.bf16.mxu1 %v2622_v0 }
 0x116   :  { %2038 = vmatprep.subr.bf16.mxu0 %v2622_v0 }
 0x119   :  { %2040 = vmatpush3.bf16.msra.mxu0 %v2039_v38 }
 0x11a   :  { %2041 = vmatprep.subr.bf16.mxu0 %v2622_v0 }
 0x11d   :  { %2043 = vmatpush3.bf16.msra.mxu0 %v2042_v41  ;;  %v2012_v41 = vpack.c.bf16 %v353_v40, %v352_v39 }
 0x11e   :  { %2044 = vmatprep.subr.bf16.mxu0 %v2622_v0 }
 0x11f   :  { %2013 = vmatpush3.bf16.msra.mxu1 %v2012_v41  ;;  %v1524_v41 = vld [vmem:[%s3260_s8] ss:$0 sm:$0xff] }
 0x120   :  { %2014 = vmatprep.subr.bf16.mxu1 %v2622_v0 }
 0x121   :  { %2046 = vmatpush3.bf16.msra.mxu0 %v2045_v44  ;;  %v2015_v44 = vpack.c.bf16 %v355_v43, %v354_v42  ;;  %v1525_v43 = vld [vmem:[%s3261_s2] ss:$0 sm:$0xff] }
 0x122   :  { %2047 = vmatprep.subr.bf16.mxu0 %v2622_v0 }
 0x123   :  { %2016 = vmatpush3.bf16.msra.mxu1 %v2015_v44 }
 0x124   :  { %2017 = vmatprep.subr.bf16.mxu1 %v2622_v0 }
 0x125   :  { %2049 = vmatpush3.bf16.msra.mxu0 %v2048_v47  ;;  %v2018_v47 = vpack.c.bf16 %v357_v46, %v356_v45 }
 0x126   :  { %2050 = vmatprep.subr.bf16.mxu0 %v2622_v0 }
 0x127   :  { %2019 = vmatpush3.bf16.msra.mxu1 %v2018_v47  ;;  %v1521_v47 = vld [vmem:[%s3262_s6] ss:$0 sm:$0xff] }
 0x128   :  { %2020 = vmatprep.subr.bf16.mxu1 %v2622_v0 }
 0x129   :  { %2052 = vmatpush3.bf16.msra.mxu0 %v2051_v50  ;;  %v2021_v50 = vpack.c.bf16 %v359_v49, %v358_v48 }
 0x12a   :  { %2053 = vmatprep.subr.bf16.mxu0 %v2622_v0 }
 0x12b   :  { %2022 = vmatpush3.bf16.msra.mxu1 %v2021_v50 }
 0x12c   :  { %1780 = vmatmul.mubr.f32.vlgmr.msra.gmra.mrb[2].mxu0 %v2949_v28  ;;  %2023 = vmatprep.subr.bf16.mxu1 %v2622_v0 }
 0x12d   :  { %2055 = vmatpush3.bf16.msra.mxu0 %v2054_v53  ;;  %1814 = vmatprep.mubr.msk.f32.mxu0 %vm2623_vm0, %v2624_v1  ;;  %v2024_v53 = vpack.c.bf16 %v361_v52, %v360_v51 }
 0x12e   :  { %2056 = vmatprep.subr.bf16.mxu0 %v2622_v0 }
 0x12f   :  { %2025 = vmatpush3.bf16.msra.mxu1 %v2024_v53 }
 0x130   :  { %2026 = vmatprep.subr.bf16.mxu1 %v2622_v0 }
 0x131   :  { %2058 = vmatpush3.bf16.msra.mxu0 %v2057_v56  ;;  %v2027_v56 = vpack.c.bf16 %v363_v55, %v362_v54  ;;  %v1526_v55 = vld [vmem:[%s3207_s14] ss:$0 sm:$0xff] }
 0x132   :  { %2059 = vmatprep.subr.bf16.mxu0 %v2622_v0 }
 0x133   :  { %2028 = vmatpush3.bf16.msra.mxu1 %v2027_v56 }
 0x134   :  { %2077 = vmatprep.subr.bf16.mxu1 %v2622_v0 }
 0x135   :  { %2061 = vmatpush3.bf16.msra.mxu0 %v2060_v59 }
 0x136   :  { %2062 = vmatprep.subr.bf16.mxu0 %v2622_v0 }
 0x139   :  { %2064 = vmatpush3.bf16.msra.mxu0 %v2063_v62 }
 0x13a   :  { %2065 = vmatprep.subr.bf16.mxu0 %v2622_v0 }
 0x13d   :  { %2067 = vmatpush3.bf16.msra.mxu0 %v2066_v3 }
 0x13e   :  { %2068 = vmatprep.subr.bf16.mxu0 %v2622_v0 }
 0x141   :  { %2070 = vmatpush3.bf16.msra.mxu0 %v2069_v6  ;;  %v1520_v6 = vld [vmem:[%s3259_s7] ss:$0 sm:$0xff] }
 0x142   :  { %2071 = vmatprep.subr.bf16.mxu0 %v2622_v0 }
 0x145   :  { %2073 = vmatpush3.bf16.msra.mxu0 %v2072_v9  ;;  %v660_v9 = vld [vmem:[#allocation14 + $0x8] sm:$0xff] }
 0x146   :  { %2074 = vmatprep.subr.bf16.mxu0 %v2622_v0  ;;  %v2078_v11 = vpack.c.bf16 %v660_v9, %v659_v8  ;;  %v789_v8 = vld [vmem:[#allocation15 + $0x38] sm:$0xff] }
 0x147   :  { %v793_v9 = vld [vmem:[#allocation15 + $0x58] sm:$0xff] }
 0x149   :  { %2076 = vmatpush3.bf16.msra.mxu0 %v2075_v12 }
 0x14c   :  { %1815 = vmatmul.mubr.f32.vlgmr.msra.gmra.mrb[2].mxu0 %v541_v13  ;;  %v661_v13 = vld [vmem:[#allocation14 + $0x10] sm:$0xff] }
 0x14d   :  { %1024 = vmatprep.mubr.f32.mxu0 %v2624_v1 }
 0x1df   :  { %v314_v17 = vpop.f32.mrb[0].mxu0 }
 0x1e0   :  { %v315_v19 = vadd.f32 %v1518_v16, %v314_v17  ;;  %v1711_v20 = vpop.f32.mrb[1].mxu0  ;;  %v2081_v16 = vpack.c.bf16 %v662_v15, %v661_v13  ;;  %v663_v17 = vld [vmem:[#allocation14 + $0x20] sm:$0xff]  ;;  %v797_v13 = vld [vmem:[#allocation15 + $0x78] sm:$0xff] }
 0x1e2   :  { %v320_v21 = vmul.f32 %v2979_v18, %v315_v19 }
 0x1e4   :  { %321 = vadd.xlane.f32.xlu0 %v320_v21  ;;  %v665_v21 = vld [vmem:[#allocation14 + $0x30] sm:$0xff] }
 0x21f   :  { %v624_v23 = vpop.f32.mrb[2].mxu0 }
 0x220   :  { %v2237_v24 = vadd.f32 %v1523_v22, %v624_v23  ;;  %v1816_v25 = vpop.f32.mrb[3].mxu0  ;;  %v666_v22 = vld [vmem:[#allocation14 + $0x38] sm:$0xff] }
 0x221   :  { %v2087_v23 = vpack.c.bf16 %v666_v22, %v665_v21  ;;  %v668_v25 = vld [vmem:[#allocation14 + $0x48] sm:$0xff] }
 0x222   :  { %v631_v26 = vmul.f32 %v2237_v24, %v2979_v18  ;;  %v799_v22 = vld [vmem:[#allocation15 + $0x88] sm:$0xff] }
 0x224   :  { %632 = vadd.xlane.f32.xlu0 %v631_v26 }
 0x271   :  { %v322_v34 = vpop.xlane.xlu0 %321 }
 0x272   :  { %v323_v35 = vmul.f32 0.03125, %v322_v34  ;;  %v673_v34 = vld [vmem:[#allocation14 + $0x70] sm:$0xff] }
 0x274   :  { %v324_v36 = vsub.f32 %v315_v19, %v323_v35  ;;  %v664_v19 = vld [vmem:[#allocation14 + $0x28] sm:$0xff]  ;;  %v674_v35 = vld [vmem:[#allocation14 + $0x78] sm:$0xff] }
 0x275   :  { %v2084_v20 = vpack.c.bf16 %v664_v19, %v663_v17  ;;  %v795_v17 = vld [vmem:[#allocation15 + $0x68] sm:$0xff]  ;;  %v800_v19 = vld [vmem:[#allocation15 + $0x90] sm:$0xff] }
 0x276   :  { %v325_v37 = vmul.f32 %v2979_v18, %v324_v36  ;;  %v2137_v21 = vpack.c.bf16 %v800_v19, %v795_v17  ;;  %v843_v17 = vld [vmem:[#allocation15 + $0x1e8] sm:$0xff] }
 0x278   :  { %v326_v38 = vmul.f32 %v325_v37, %v325_v37 }
 0x27a   :  { %327 = vadd.xlane.f32.xlu1 %v326_v38 }
 0x2b1   :  { %v633_v57 = vpop.xlane.xlu0 %632 }
 0x2b2   :  { %v634_v58 = vmul.f32 0.03125, %v633_v57 }
 0x2b4   :  { %v635_v59 = vsub.f32 %v2237_v24, %v634_v58  ;;  %v667_v24 = vld [vmem:[#allocation14 + $0x40] sm:$0xff] }
 0x2b5   :  { %v2090_v26 = vpack.c.bf16 %v668_v25, %v667_v24  ;;  %v808_v24 = vld [vmem:[#allocation15 + $0xd0] sm:$0xff] }
 0x2b6   :  { %v636_v60 = vmul.f32 %v2979_v18, %v635_v59 }
 0x2b8   :  { %v637_v61 = vmul.f32 %v636_v60, %v636_v60  ;;  %v783_v60 = vld [vmem:[#allocation15 + $0x8] sm:$0xff] }
 0x2ba   :  { %638 = vadd.xlane.f32.xlu1 %v637_v61  ;;  %v788_v61 = vld [vmem:[#allocation15 + $0x30] sm:$0xff] }
 0x307   :  { %v328_v62 = vpop.xlane.xlu1 %327 }
 0x308   :  { %v329_v63 = vmul.f32 0.03125, %v328_v62  ;;  %v782_v62 = vld [vmem:[#allocation15] sm:$0xff] }
 0x30a   :  { %v330_v2 = vadd.f32 1e-05, %v329_v63  ;;  %v2101_v63 = vpack.c.bf16 %v788_v61, %v783_v60  ;;  %v825_v60 = vld [vmem:[#allocation15 + $0x158] sm:$0xff] }
 0x30c   :  { %2261 = vrsqrt.f32 %v330_v2  ;;  %v787_v2 = vld [vmem:[#allocation15 + $0x28] sm:$0xff] }
 0x316   :  { %v2262_v3 = vpop.eup %2261 }
 0x317   :  { %v332_v5 = vmul.f32 %v2262_v3, %v324_v36  ;;  %v2099_v36 = vpack.c.bf16 %v674_v35, %v673_v34  ;;  %v785_v3 = vld [vmem:[#allocation15 + $0x18] sm:$0xff] }
 0x319   :  { %v339_v7 = vmul.f32 %v1519_v4, %v332_v5  ;;  %v790_v4 = vld [vmem:[#allocation15 + $0x40] sm:$0xff]  ;;  %v2103_v5 = vpack.c.bf16 %v787_v2, %v782_v62  ;;  %v829_v2 = vld [vmem:[#allocation15 + $0x178] sm:$0xff] }
 0x31a   :  { %v830_v62 = vld [vmem:[#allocation15 + $0x180] sm:$0xff] }
 0x31b   :  { %v346_v10 = vadd.f32 %v1520_v6, %v339_v7  ;;  %v2133_v6 = vpack.c.bf16 %v790_v4, %v785_v3  ;;  %v784_v7 = vld [vmem:[#allocation15 + $0x10] sm:$0xff]  ;;  %v2149_v3 = vpack.c.bf16 %v830_v62, %v825_v60  ;;  %v801_v62 = vld [vmem:[#allocation15 + $0x98] sm:$0xff] }
 0x31d   :  { %v347_v12 = vmax.f32 %v346_v10, 0.0  ;;  %v2135_v10 = vpack.c.bf16 %v789_v8, %v784_v7  ;;  %2134 = vmatprep.subr.bf16.mxu0 %v2133_v6  ;;  %v838_v6 = vld [vmem:[#allocation15 + $0x1c0] sm:$0xff]  ;;  %v832_v7 = vld [vmem:[#allocation15 + $0x190] sm:$0xff] }
 0x31f   :  { %1745 = vmatmul.mubr.f32.vlgmr.msra.gmra.mrb[0].mxu1 %v347_v12  ;;  %v792_v12 = vld [vmem:[#allocation15 + $0x50] sm:$0xff]  ;;  %2136 = vmatpush1.bf16.msra.mxu0 %v2135_v10  ;;  %v835_v10 = vld [vmem:[#allocation15 + $0x1a8] sm:$0xff] }
 0x320   :  { %2079 = vmatpush3.bf16.msra.mxu1 %v2078_v11  ;;  %1849 = vmatprep.mubr.msk.f32.mxu1 %vm2623_vm0, %v2624_v1  ;;  %v798_v11 = vld [vmem:[#allocation15 + $0x80] sm:$0xff] }
 0x321   :  { %2080 = vmatprep.subr.bf16.mxu1 %v2622_v0  ;;  %v2105_v15 = vpack.c.bf16 %v798_v11, %v793_v9  ;;  %2138 = vmatprep.subr.bf16.mxu0 %v2137_v21  ;;  %v837_v9 = vld [vmem:[#allocation15 + $0x1b8] sm:$0xff]  ;;  %v840_v11 = vld [vmem:[#allocation15 + $0x1d0] sm:$0xff]  ;;  %v842_v21 = vld [vmem:[#allocation15 + $0x1e0] sm:$0xff] }
 0x324   :  { %2082 = vmatpush3.bf16.msra.mxu1 %v2081_v16  ;;  %v2107_v16 = vpack.c.bf16 %v797_v13, %v792_v12  ;;  %v2123_v12 = vpack.c.bf16 %v837_v9, %v832_v7  ;;  %v2153_v13 = vpack.c.bf16 %v840_v11, %v835_v10  ;;  %v1135_v7 = vld [vmem:[#allocation17 + $0x20] sm:$0xff]  ;;  %v816_v10 = vld [vmem:[#allocation15 + $0x110] sm:$0xff]  ;;  %v821_v11 = vld [vmem:[#allocation15 + $0x138] sm:$0xff] }
 0x325   :  { %2083 = vmatprep.subr.bf16.mxu1 %v2622_v0 }
 0x328   :  { %2085 = vmatpush3.bf16.msra.mxu1 %v2084_v20  ;;  %v794_v20 = vld [vmem:[#allocation15 + $0x60] sm:$0xff] }
 0x329   :  { %2086 = vmatprep.subr.bf16.mxu1 %v2622_v0  ;;  %v2139_v25 = vpack.c.bf16 %v799_v22, %v794_v20  ;;  %v848_v20 = vld [vmem:[#allocation15 + $0x210] sm:$0xff]  ;;  %v847_v22 = vld [vmem:[#allocation15 + $0x208] sm:$0xff] }
 0x32a   :  { %v2127_v27 = vpack.c.bf16 %v847_v22, %v842_v21  ;;  %v1139_v21 = vld [vmem:[#allocation17 + $0x40] sm:$0xff]  ;;  %v1140_v22 = vld [vmem:[#allocation17 + $0x48] sm:$0xff] }
 0x32b   :  { %2140 = vmatpush1.bf16.msra.mxu0 %v2139_v25  ;;  %v850_v25 = vld [vmem:[#allocation15 + $0x220] sm:$0xff] }
 0x32c   :  { %2088 = vmatpush3.bf16.msra.mxu1 %v2087_v23  ;;  %v803_v23 = vld [vmem:[#allocation15 + $0xa8] sm:$0xff] }
 0x32d   :  { %2089 = vmatprep.subr.bf16.mxu1 %v2622_v0 }
 0x330   :  { %2091 = vmatpush3.bf16.msra.mxu1 %v2090_v26  ;;  %v2109_v26 = vpack.c.bf16 %v808_v24, %v803_v23  ;;  %v2125_v23 = vpack.c.bf16 %v848_v20, %v843_v17  ;;  %v845_v24 = vld [vmem:[#allocation15 + $0x1f8] sm:$0xff]  ;;  %v826_v17 = vld [vmem:[#allocation15 + $0x160] sm:$0xff] }
 0x331   :  { %2092 = vmatprep.subr.bf16.mxu1 %v2622_v0  ;;  %v2157_v29 = vpack.c.bf16 %v850_v25, %v845_v24  ;;  %v836_v24 = vld [vmem:[#allocation15 + $0x1b0] sm:$0xff]  ;;  %v841_v25 = vld [vmem:[#allocation15 + $0x1d8] sm:$0xff] }
 0x334   :  { %2094 = vmatpush3.bf16.msra.mxu1 %v2093_v30  ;;  %v805_v30 = vld [vmem:[#allocation15 + $0xb8] sm:$0xff] }
 0x335   :  { %2095 = vmatprep.subr.bf16.mxu1 %v2622_v0 }
 0x338   :  { %2097 = vmatpush3.bf16.msra.mxu1 %v2096_v33  ;;  %v2141_v33 = vpack.c.bf16 %v810_v31, %v805_v30  ;;  %v849_v30 = vld [vmem:[#allocation15 + $0x218] sm:$0xff] }
 0x339   :  { %2098 = vmatprep.subr.bf16.mxu1 %v2622_v0  ;;  %v853_v31 = vld [vmem:[#allocation15 + $0x238] sm:$0xff] }
 0x33a   :  { %2142 = vmatprep.subr.bf16.mxu0 %v2141_v33 }
 0x33c   :  { %2100 = vmatpush3.bf16.msra.mxu1 %v2099_v36 }
 0x33d   :  { %2102 = vmatprep.subr.bf16.mxu1 %v2101_v63  ;;  %v824_v63 = vld [vmem:[#allocation15 + $0x150] sm:$0xff] }
 0x33e   :  { %v2151_v4 = vpack.c.bf16 %v829_v2, %v824_v63  ;;  %v1133_v2 = vld [vmem:[#allocation17 + $0x10] sm:$0xff] }
 0x347   :  { %v639_v37 = vpop.xlane.xlu1 %638 }
 0x348   :  { %v640_v38 = vmul.f32 0.03125, %v639_v37 }
 0x34a   :  { %v641_v39 = vadd.f32 1e-05, %v640_v38 }
 0x34c   :  { %2263 = vrsqrt.f32 %v641_v39  ;;  %v804_v39 = vld [vmem:[#allocation15 + $0xb0] sm:$0xff] }
 0x356   :  { %v2264_v40 = vpop.eup %2263 }
 0x357   :  { %v643_v42 = vmul.f32 %v2264_v40, %v635_v59  ;;  %v809_v40 = vld [vmem:[#allocation15 + $0xd8] sm:$0xff] }
 0x359   :  { %v650_v44 = vmul.f32 %v1524_v41, %v643_v42  ;;  %v2143_v41 = vpack.c.bf16 %v809_v40, %v804_v39  ;;  %v813_v42 = vld [vmem:[#allocation15 + $0xf8] sm:$0xff]  ;;  %v860_v39 = vld [vmem:[#allocation15 + $0x270] sm:$0xff] }
 0x35b   :  { %v657_v45 = vadd.f32 %v1525_v43, %v650_v44  ;;  %v818_v43 = vld [vmem:[#allocation15 + $0x120] sm:$0xff]  ;;  %2144 = vmatpush1.bf16.msra.mxu0 %v2143_v41 }
 0x35c   :  { %v2113_v44 = vpack.c.bf16 %v818_v43, %v813_v42  ;;  %v854_v41 = vld [vmem:[#allocation15 + $0x240] sm:$0xff]  ;;  %v859_v42 = vld [vmem:[#allocation15 + $0x268] sm:$0xff] }
 0x35d   :  { %v658_v46 = vmax.f32 %v657_v45, 0.0  ;;  %v812_v45 = vld [vmem:[#allocation15 + $0xf0] sm:$0xff] }
 0x35f   :  { %1850 = vmatmul.mubr.f32.vlgmr.msra.gmra.mrb[2].mxu1 %v658_v46  ;;  %v817_v46 = vld [vmem:[#allocation15 + $0x118] sm:$0xff] }
 0x360   :  { %953 = vmatprep.mubr.f32.mxu1 %v2624_v1  ;;  %2104 = vmatpush1.bf16.msra.mxu1 %v2103_v5  ;;  %v833_v5 = vld [vmem:[#allocation15 + $0x198] sm:$0xff] }
 0x361   :  { %2106 = vmatprep.subr.bf16.mxu1 %v2105_v15  ;;  %v2121_v8 = vpack.c.bf16 %v838_v6, %v833_v5  ;;  %v834_v15 = vld [vmem:[#allocation15 + $0x1a0] sm:$0xff]  ;;  %v811_v5 = vld [vmem:[#allocation15 + $0xe8] sm:$0xff] }
 0x364   :  { %2108 = vmatpush1.bf16.msra.mxu1 %v2107_v16  ;;  %v839_v16 = vld [vmem:[#allocation15 + $0x1c8] sm:$0xff] }
 0x365   :  { %2110 = vmatprep.subr.bf16.mxu1 %v2109_v26  ;;  %v2155_v19 = vpack.c.bf16 %v839_v16, %v834_v15  ;;  %v844_v26 = vld [vmem:[#allocation15 + $0x1f0] sm:$0xff]  ;;  %v1138_v15 = vld [vmem:[#allocation17 + $0x38] sm:$0xff]  ;;  %v2175_v16 = vpack.c.bf16 %v821_v11, %v816_v10 }
 0x368   :  { %2112 = vmatpush1.bf16.msra.mxu1 %v2111_v32  ;;  %v858_v32 = vld [vmem:[#allocation15 + $0x260] sm:$0xff] }
 0x369   :  { %2114 = vmatprep.subr.bf16.mxu1 %v2113_v44  ;;  %v2129_v33 = vpack.c.bf16 %v858_v32, %v853_v31  ;;  %v2163_v44 = vpack.c.bf16 %v859_v42, %v854_v41  ;;  %v846_v31 = vld [vmem:[#allocation15 + $0x200] sm:$0xff]  ;;  %v851_v32 = vld [vmem:[#allocation15 + $0x228] sm:$0xff]  ;;  %v1145_v42 = vld [vmem:[#allocation17 + $0x70] sm:$0xff] }
 0x3f2   :  { %v437_v48 = vpop.f32.mrb[0].mxu1 }
 0x3f3   :  { %v438_v49 = vadd.f32 %v1521_v47, %v437_v48  ;;  %v1746_v50 = vpop.f32.mrb[1].mxu1  ;;  %v815_v47 = vld [vmem:[#allocation15 + $0x108] sm:$0xff]  ;;  %v2115_v48 = vpack.c.bf16 %v817_v46, %v812_v45 }
 0x3f4   :  { %v814_v50 = vld [vmem:[#allocation15 + $0x100] sm:$0xff] }
 0x3f5   :  { %v1522_v51 = vmul.f32 -1.442695, %v438_v49  ;;  %v820_v49 = vld [vmem:[#allocation15 + $0x130] sm:$0xff]  ;;  %2116 = vmatpush1.bf16.msra.mxu1 %v2115_v48 }
 0x3f7   :  { %2265 = vpow2.f32 %v1522_v51  ;;  %v819_v51 = vld [vmem:[#allocation15 + $0x128] sm:$0xff] }
 0x401   :  { %v2266_v52 = vpop.eup %2265 }
 0x402   :  { %v444_v53 = vadd.f32 1.0, %v2266_v52  ;;  %v2145_v52 = vpack.c.bf16 %v820_v49, %v815_v47  ;;  %v1527_v49 = vld [vmem:[%s3208_s15] ss:$0 sm:$0xff] }
 0x404   :  { %2267 = vrcp.f32 %v444_v53  ;;  %v2147_v53 = vpack.c.bf16 %v819_v51, %v814_v50  ;;  %2146 = vmatprep.subr.bf16.mxu0 %v2145_v52  ;;  %v1528_v51 = vld [vmem:[%s3209_s16] ss:$0 sm:$0xff] }
 0x406   :  { %2148 = vmatpush1.bf16.msra.mxu0 %v2147_v53  ;;  %v786_v53 = vld [vmem:[#allocation15 + $0x20] sm:$0xff] }
 0x407   :  { %2150 = vmatprep.subr.bf16.mxu0 %v2149_v3  ;;  %v1134_v3 = vld [vmem:[#allocation17 + $0x18] sm:$0xff] }
 0x408   :  { %v2193_v6 = vpack.c.bf16 %v1134_v3, %v1133_v2 }
 0x40a   :  { %2152 = vmatpush1.bf16.msra.mxu0 %v2151_v4  ;;  %v806_v4 = vld [vmem:[#allocation15 + $0xc0] sm:$0xff] }
 0x40b   :  { %2154 = vmatprep.subr.bf16.mxu0 %v2153_v13  ;;  %v2172_v9 = vpack.c.bf16 %v811_v5, %v806_v4  ;;  %v1137_v13 = vld [vmem:[#allocation17 + $0x30] sm:$0xff] }
 0x40c   :  { %v2199_v20 = vpack.c.bf16 %v1138_v15, %v1137_v13  ;;  %v2281_v13 = vld [vmem:[#allocation3] sm:$0xff] }
 0x40e   :  { %v3021_v54 = vpop.eup %2267  ;;  %2156 = vmatpush1.bf16.msra.mxu0 %v2155_v19  ;;  %v831_v19 = vld [vmem:[#allocation15 + $0x188] sm:$0xff] }
 0x40f   :  { %447 = vst [vmem:[#allocation20] sm:$0xff] %v3021_v54  ;;  %2158 = vmatprep.subr.bf16.mxu0 %v2157_v29  ;;  %v1142_v29 = vld [vmem:[#allocation17 + $0x58] sm:$0xff] }
 0x432   :  { %v748_v56 = vpop.f32.mrb[2].mxu1 }
 0x433   :  { %v749_v57 = vadd.f32 %v1526_v55, %v748_v56  ;;  %v1851_v58 = vpop.f32.mrb[3].mxu1  ;;  %v823_v55 = vld [vmem:[#allocation15 + $0x148] sm:$0xff]  ;;  %v828_v56 = vld [vmem:[#allocation15 + $0x170] sm:$0xff] }
 0x434   :  { %v822_v58 = vld [vmem:[#allocation15 + $0x140] sm:$0xff] }
 0x435   :  { %v754_v59 = vmul.f32 %v2979_v18, %v749_v57 }
 0x437   :  { %755 = vadd.xlane.f32.xlu0 %v754_v59  ;;  %v827_v59 = vld [vmem:[#allocation15 + $0x168] sm:$0xff] }
 0x438   :  { %v2119_v61 = vpack.c.bf16 %v827_v59, %v822_v58 }
 0x4c4   :  { %v756_v34 = vpop.xlane.xlu0 %755 }
 0x4c5   :  { %v757_v35 = vmul.f32 0.03125, %v756_v34  ;;  %v852_v34 = vld [vmem:[#allocation15 + $0x230] sm:$0xff] }
 0x4c7   :  { %v3028_v36 = vsub.f32 %v749_v57, %v757_v35  ;;  %v2117_v57 = vpack.c.bf16 %v828_v56, %v823_v55  ;;  %v857_v35 = vld [vmem:[#allocation15 + $0x258] sm:$0xff]  ;;  %v791_v55 = vld [vmem:[#allocation15 + $0x48] sm:$0xff]  ;;  %v1131_v56 = vld [vmem:[#allocation17] sm:$0xff] }
 0x4c8   :  { %v2131_v43 = vpack.c.bf16 %v857_v35, %v852_v34  ;;  %v2166_v59 = vpack.c.bf16 %v791_v55, %v786_v53  ;;  %v2184_v34 = vpack.c.bf16 %v851_v32, %v846_v31  ;;  %v856_v35 = vld [vmem:[#allocation15 + $0x250] sm:$0xff] }
 0x4c9   :  { %v759_v37 = vmul.f32 %v2979_v18, %v3028_v36  ;;  %2118 = vmatprep.subr.bf16.mxu1 %v2117_v57  ;;  %v1132_v57 = vld [vmem:[#allocation17 + $0x8] sm:$0xff] }
 0x4ca   :  { %2120 = vmatpush1.bf16.msra.mxu1 %v2119_v61  ;;  %v796_v61 = vld [vmem:[#allocation15 + $0x70] sm:$0xff]  ;;  %v2190_v63 = vpack.c.bf16 %v1132_v57, %v1131_v56 }
 0x4cb   :  { %v760_v38 = vmul.f32 %v759_v37, %v759_v37  ;;  %2122 = vmatprep.subr.bf16.mxu1 %v2121_v8  ;;  %v855_v37 = vld [vmem:[#allocation15 + $0x248] sm:$0xff] }
 0x4cc   :  { %v2161_v40 = vpack.c.bf16 %v860_v39, %v855_v37  ;;  %v1136_v8 = vld [vmem:[#allocation17 + $0x28] sm:$0xff]  ;;  %v861_v37 = vld [vmem:[#allocation15 + $0x278] sm:$0xff]  ;;  %v1143_v39 = vld [vmem:[#allocation17 + $0x60] sm:$0xff] }
 0x4cd   :  { %761 = vadd.xlane.f32.xlu1 %v760_v38  ;;  %v2159_v38 = vpack.c.bf16 %v849_v30, %v844_v26  ;;  %v2202_v26 = vpack.c.bf16 %v1140_v22, %v1139_v21  ;;  %v2181_v30 = vpack.c.bf16 %v841_v25, %v836_v24 }
 0x4ce   :  { %2124 = vmatpush1.bf16.msra.mxu1 %v2123_v12  ;;  %v2196_v12 = vpack.c.bf16 %v1136_v8, %v1135_v7 }
 0x4cf   :  { %2126 = vmatprep.subr.bf16.mxu1 %v2125_v23  ;;  %2160 = vmatpush1.bf16.msra.mxu0 %v2159_v38  ;;  %v2178_v23 = vpack.c.bf16 %v831_v19, %v826_v17  ;;  %v2187_v38 = vpack.c.bf16 %v861_v37, %v856_v35 }
 0x4d0   :  { %2162 = vmatprep.subr.bf16.mxu0 %v2161_v40  ;;  %v1144_v40 = vld [vmem:[#allocation17 + $0x68] sm:$0xff] }
 0x4d1   :  { %v2208_v41 = vpack.c.bf16 %v1144_v40, %v1143_v39  ;;  %v1338_v39 = vld [vmem:[#allocation18] sm:$0xff]  ;;  %v1339_v40 = vld [vmem:[#allocation18 + $0x8] sm:$0xff] }
 0x4d2   :  { %2128 = vmatpush1.bf16.msra.mxu1 %v2127_v27  ;;  %v1141_v27 = vld [vmem:[#allocation17 + $0x50] sm:$0xff] }
 0x4d3   :  { %2130 = vmatprep.subr.bf16.mxu1 %v2129_v33  ;;  %2164 = vmatpush1.bf16.msra.mxu0 %v2163_v44  ;;  %v2205_v33 = vpack.c.bf16 %v1142_v29, %v1141_v27 }
 0x4d4   :  { %2189 = vmatprep.subr.bf16.mxu0 %v2622_v0 }
 0x4d6   :  { %2132 = vmatpush1.bf16.msra.mxu1 %v2131_v43  ;;  %v1146_v43 = vld [vmem:[#allocation17 + $0x78] sm:$0xff] }
 0x4d7   :  { %2165 = vmatprep.subr.bf16.mxu1 %v2622_v0  ;;  %v2211_v44 = vpack.c.bf16 %v1146_v43, %v1145_v42  ;;  %v2214_v42 = vpack.c.bf16 %v1339_v40, %v1338_v39  ;;  %v1341_v43 = vld [vmem:[#allocation18 + $0x18] sm:$0xff]  ;;  %v1531_v40 = vld [vmem:[%s3215_s22] ss:$0 sm:$0xff] }
 0x55a   :  { %v762_v45 = vpop.xlane.xlu1 %761 }
 0x55b   :  { %v763_v46 = vmul.f32 0.03125, %v762_v45  ;;  %v865_v45 = vshrl.u32 %v220_v14, 7 }
 0x55d   :  { %v764_v47 = vadd.f32 1e-05, %v763_v46  ;;  %v866_v46 = vsub.s32 0, %v865_v45 }
 0x55f   :  { %2269 = vrsqrt.f32 %v764_v47  ;;  %v874_v47 = vsub.s32 2, %v865_v45 }
 0x569   :  { %v2270_v48 = vpop.eup %2269 }
 0x56a   :  { %v766_v50 = vmul.f32 %v2270_v48, %v3028_v36  ;;  %v2169_v36 = vpack.c.bf16 %v801_v62, %v796_v61  ;;  %v862_v48 = vld [vmem:[%s3211_s18] sm:$0x1f] }
 0x56c   :  { %v773_v52 = vmul.f32 %v1527_v49, %v766_v50  ;;  %v870_v49 = vsub.s32 1, %v865_v45  ;;  %v878_v50 = vsub.s32 3, %v865_v45 }
 0x56e   :  { %v780_v58 = vadd.f32 %v1528_v51, %v773_v52  ;;  %v867_v51 = vrot.slane %v862_v48, %v866_v46  ;;  %v875_v52 = vrot.slane %v862_v48, %v874_v47  ;;  %v871_v53 = vrot.slane %v862_v48, %v870_v49 }
 0x56f   :  { %v879_v55 = vrot.slane %v862_v48, %v878_v50 }
 0x570   :  { %v3041_v60 = vmax.f32 %v780_v58, 0.0 }
 0x572   :  { %954 = vmatmul.mubr.f32.vlgmr.msra.gmra.mrb[4].mxu1 %v3041_v60  ;;  %1025 = vmatmul.mubr.f32.vlgmr.msra.gmra.mrb[4].mxu0 %v3041_v60 }
 0x573   :  { %2167 = vmatpush3.bf16.msra.mxu1 %v2166_v59  ;;  %1884 = vmatprep.mubr.msk.f32.mxu1 %vm2623_vm0, %v2624_v1 }
 0x574   :  { %2168 = vmatprep.subr.bf16.mxu1 %v2622_v0  ;;  %2191 = vmatpush3.bf16.msra.mxu0 %v2190_v63 }
 0x575   :  { %2192 = vmatprep.subr.bf16.mxu0 %v2622_v0  ;;  %1919 = vmatprep.mubr.msk.f32.mxu0 %vm2623_vm0, %v2624_v1 }
 0x577   :  { %2170 = vmatpush3.bf16.msra.mxu1 %v2169_v36 }
 0x578   :  { %2171 = vmatprep.subr.bf16.mxu1 %v2622_v0  ;;  %2194 = vmatpush3.bf16.msra.mxu0 %v2193_v6 }
 0x579   :  { %2195 = vmatprep.subr.bf16.mxu0 %v2622_v0 }
 0x57b   :  { %2173 = vmatpush3.bf16.msra.mxu1 %v2172_v9 }
 0x57c   :  { %2174 = vmatprep.subr.bf16.mxu1 %v2622_v0  ;;  %2197 = vmatpush3.bf16.msra.mxu0 %v2196_v12 }
 0x57d   :  { %2198 = vmatprep.subr.bf16.mxu0 %v2622_v0 }
 0x57f   :  { %2176 = vmatpush3.bf16.msra.mxu1 %v2175_v16  ;;  %v1529_v16 = vld [vmem:[%s3213_s20] ss:$0 sm:$0xff] }
 0x580   :  { %2177 = vmatprep.subr.bf16.mxu1 %v2622_v0  ;;  %2200 = vmatpush3.bf16.msra.mxu0 %v2199_v20 }
 0x581   :  { %2201 = vmatprep.subr.bf16.mxu0 %v2622_v0 }
 0x583   :  { %2179 = vmatpush3.bf16.msra.mxu1 %v2178_v23 }
 0x584   :  { %2180 = vmatprep.subr.bf16.mxu1 %v2622_v0  ;;  %2203 = vmatpush3.bf16.msra.mxu0 %v2202_v26 }
 0x585   :  { %2204 = vmatprep.subr.bf16.mxu0 %v2622_v0 }
 0x587   :  { %2182 = vmatpush3.bf16.msra.mxu1 %v2181_v30 }
 0x588   :  { %2183 = vmatprep.subr.bf16.mxu1 %v2622_v0  ;;  %2206 = vmatpush3.bf16.msra.mxu0 %v2205_v33 }
 0x589   :  { %2207 = vmatprep.subr.bf16.mxu0 %v2622_v0 }
 0x58b   :  { %2185 = vmatpush3.bf16.msra.mxu1 %v2184_v34 }
 0x58c   :  { %2186 = vmatprep.subr.bf16.mxu1 %v2622_v0  ;;  %2209 = vmatpush3.bf16.msra.mxu0 %v2208_v41  ;;  %v1340_v41 = vld [vmem:[#allocation18 + $0x10] sm:$0xff] }
 0x58d   :  { %2210 = vmatprep.subr.bf16.mxu0 %v2622_v0 }
 0x58f   :  { %2188 = vmatpush3.bf16.msra.mxu1 %v2187_v38 }
 0x590   :  { %2213 = vmatprep.subr.bf16.mxu1 %v2622_v0  ;;  %2212 = vmatpush3.bf16.msra.mxu0 %v2211_v44  ;;  %v2217_v44 = vpack.c.bf16 %v1341_v43, %v1340_v41 }
 0x592   :  { %1885 = vmatmul.mubr.f32.vlgmr.msra.gmra.mrb[6].mxu1 %v3041_v60 }
 0x593   :  { %1966 = vmatprep.mubr.msk.f32.mxu1 %vm2623_vm0, %v2624_v1  ;;  %2215 = vmatpush3.bf16.msra.mxu1 %v2214_v42 }
 0x594   :  { %2216 = vmatprep.subr.bf16.mxu1 %v2622_v0 }
 0x597   :  { %2218 = vmatpush3.bf16.msra.mxu1 %v2217_v44 }
 0x598   :  { %2219 = vmatprep.subr.bf16.mxu1 %v2622_v0 }
 0x645   :  { %v955_v56 = vpop.f32.mrb[4].mxu1  ;;  %v1026_v57 = vpop.f32.mrb[4].mxu0 }
 0x646   :  { %v956_v58 = vadd.f32 %v955_v56, %v867_v51  ;;  %v1027_v59 = vadd.f32 %v1026_v57, %v875_v52  ;;  %v957_v60 = vpop.f32.mrb[5].mxu1  ;;  %v1028_v61 = vpop.f32.mrb[5].mxu0 }
 0x647   :  { %v958_v62 = vadd.f32 %v957_v60, %v871_v53  ;;  %v1029_v14 = vadd.f32 %v1028_v61, %v879_v55 }
 0x648   :  { %1101 = vst [vmem:[#allocation21] sm:$0xff] %v956_v58  ;;  %v1106_v63 = vmul.f32 %v3021_v54, %v956_v58  ;;  %1103 = vst [vmem:[#allocation21 + $0x10] sm:$0xff] %v1027_v59  ;;  %v1114_v2 = vmul.f32 %v3021_v54, %v1027_v59 }
 0x649   :  { %1102 = vst [vmem:[#allocation21 + $0x8] sm:$0xff] %v958_v62  ;;  %v1110_v3 = vmul.f32 %v3021_v54, %v958_v62  ;;  %1104 = vst [vmem:[#allocation21 + $0x18] sm:$0xff] %v1029_v14  ;;  %v1118_v36 = vmul.f32 %v3021_v54, %v1029_v14 }
 0x64a   :  { %v1107_v4 = vadd.f32 %v1106_v63, %v2949_v28  ;;  %v1115_v5 = vadd.f32 %v1114_v2, %v2949_v28 }
 0x64b   :  { %v1111_v6 = vadd.f32 %v1110_v3, %v2949_v28  ;;  %v1119_v7 = vadd.f32 %v1118_v36, %v2949_v28  ;;  %v882_v28 = vsub.s32 4, %v865_v45  ;;  %v1342_v3 = vld [vmem:[#allocation18 + $0x20] sm:$0xff]  ;;  %v1343_v36 = vld [vmem:[#allocation18 + $0x28] sm:$0xff] }
 0x64c   :  { %1108 = vst [vmem:[#allocation23] sm:$0xff] %v1107_v4  ;;  %1920 = vmatmul.mubr.f32.vlgmr.msra.gmra.mrb[6].mxu0 %v1107_v4  ;;  %1116 = vst [vmem:[#allocation23 + $0x10] sm:$0xff] %v1115_v5  ;;  %v2220_v4 = vpack.c.bf16 %v1343_v36, %v1342_v3 }
 0x64d   :  { %1922 = vmatprep.mubr.msk.f32.mxu0 %vm2623_vm0, %v2624_v1  ;;  %1112 = vst [vmem:[#allocation23 + $0x8] sm:$0xff] %v1111_v6  ;;  %1120 = vst [vmem:[#allocation23 + $0x18] sm:$0xff] %v1119_v7  ;;  %v883_v8 = vrot.slane %v862_v48, %v882_v28  ;;  %v1346_v28 = vld [vmem:[#allocation18 + $0x40] sm:$0xff] }
 0x64e   :  { %2221 = vmatpush3.bf16.msra.mxu1 %v2220_v4 }
 0x64f   :  { %2222 = vmatprep.subr.bf16.mxu1 %v2622_v0 }
 0x650   :  { %1923 = vmatmul.mubr.f32.gmra.mrb[8].mxu0 %v1111_v6  ;;  %v1345_v6 = vld [vmem:[#allocation18 + $0x38] sm:$0xff] }
 0x651   :  { %1925 = vmatprep.mubr.msk.f32.mxu0 %vm2623_vm0, %v2624_v1 }
 0x654   :  { %1926 = vmatmul.mubr.f32.gmra.mrb[10].mxu0 %v1115_v5  ;;  %v1344_v5 = vld [vmem:[#allocation18 + $0x30] sm:$0xff] }
 0x655   :  { %1928 = vmatprep.mubr.msk.f32.mxu0 %vm2623_vm0, %v2624_v1 }
 0x658   :  { %1929 = vmatmul.mubr.f32.gmra.mrb[12].mxu0 %v1119_v7  ;;  %v2223_v7 = vpack.c.bf16 %v1345_v6, %v1344_v5 }
 0x659   :  { %1931 = vmatprep.mubr.msk.f32.mxu0 %vm2623_vm0, %v2624_v1 }
 0x65a   :  { %2224 = vmatpush3.bf16.msra.mxu1 %v2223_v7 }
 0x65b   :  { %2225 = vmatprep.subr.bf16.mxu1 %v2622_v0 }
 0x665   :  { %v1097_v9 = vpop.f32.mrb[6].mxu1 }
 0x666   :  { %v1098_v10 = vadd.f32 %v1097_v9, %v883_v8  ;;  %v1886_v11 = vpop.f32.mrb[7].mxu1  ;;  %v1347_v8 = vld [vmem:[#allocation18 + $0x48] sm:$0xff] }
 0x667   :  { %v2226_v9 = vpack.c.bf16 %v1347_v8, %v1346_v28 }
 0x668   :  { %1105 = vst [vmem:[#allocation21 + $0x20] sm:$0xff] %v1098_v10  ;;  %v1122_v12 = vmul.f32 %v3021_v54, %v1098_v10 }
 0x669   :  { %2227 = vmatpush3.bf16.msra.mxu1 %v2226_v9 }
 0x66a   :  { %v1123_v15 = vadd.f32 %v2281_v13, %v1122_v12  ;;  %2228 = vmatprep.subr.bf16.mxu1 %v2622_v0  ;;  %v1348_v12 = vld [vmem:[#allocation18 + $0x50] sm:$0xff]  ;;  %v1349_v13 = vld [vmem:[#allocation18 + $0x58] sm:$0xff] }
 0x66c   :  { %1124 = vst [vmem:[#allocation23 + $0x20] sm:$0xff] %v1123_v15  ;;  %1932 = vmatmul.mubr.f32.gmra.mrb[14].mxu0 %v1123_v15  ;;  %v2229_v15 = vpack.c.bf16 %v1349_v13, %v1348_v12 }
 0x66e   :  { %2230 = vmatpush3.bf16.msra.mxu1 %v2229_v15 }
 0x66f   :  { %2231 = vmatprep.subr.bf16.mxu1 %v2622_v0 }
 0x71f   :  { %v1220_v17 = vpop.f32.mrb[6].mxu0 }
 0x720   :  { %v1221_v19 = vadd.f32 %v1529_v16, %v1220_v17  ;;  %v1921_v20 = vpop.f32.mrb[7].mxu0 }
 0x721   :  { %v1351_v20 = vld [vmem:[#allocation18 + $0x68] sm:$0xff] }
 0x722   :  { %v1246_v21 = vmul.f32 %v2979_v18, %v1221_v19 }
 0x723   :  { %v1225_v22 = vpop.f32.mrb[8].mxu0 }
 0x724   :  { %v1226_v23 = vadd.f32 %v1529_v16, %v1225_v22  ;;  %1251 = vadd.xlane.f32.xlu0 %v1246_v21  ;;  %v1924_v24 = vpop.f32.mrb[9].mxu0 }
 0x725   :  { %v1353_v24 = vld [vmem:[#allocation18 + $0x78] sm:$0xff] }
 0x726   :  { %v1247_v25 = vmul.f32 %v2979_v18, %v1226_v23 }
 0x727   :  { %v1230_v54 = vpop.f32.mrb[10].mxu0 }
 0x728   :  { %v1231_v26 = vadd.f32 %v1529_v16, %v1230_v54  ;;  %1253 = vadd.xlane.f32.xlu1 %v1247_v25  ;;  %v1927_v27 = vpop.f32.mrb[11].mxu0 }
 0x72a   :  { %v1248_v29 = vmul.f32 %v2979_v18, %v1231_v26 }
 0x72b   :  { %v1235_v30 = vpop.f32.mrb[12].mxu0 }
 0x72c   :  { %v1236_v31 = vadd.f32 %v1529_v16, %v1235_v30  ;;  %1255 = vadd.xlane.f32.xlu0 %v1248_v29  ;;  %v1930_v32 = vpop.f32.mrb[13].mxu0 }
 0x72e   :  { %v1249_v33 = vmul.f32 %v2979_v18, %v1236_v31 }
 0x730   :  { %1257 = vadd.xlane.f32.xlu1 %v1249_v33 }
 0x73f   :  { %v1240_v34 = vpop.f32.mrb[14].mxu0 }
 0x740   :  { %v1241_v35 = vadd.f32 %v1529_v16, %v1240_v34  ;;  %v1933_v37 = vpop.f32.mrb[15].mxu0 }
 0x742   :  { %v1250_v38 = vmul.f32 %v2979_v18, %v1241_v35 }
 0x744   :  { %1259 = vadd.xlane.f32.xlu0 %v1250_v38 }
 0x7b1   :  { %v1252_v45 = vpop.xlane.xlu0 %1251 }
 0x7b2   :  { %v1261_v46 = vmul.f32 0.03125, %v1252_v45 }
 0x7b4   :  { %v3098_v47 = vsub.f32 %v1221_v19, %v1261_v46  ;;  %v1350_v19 = vld [vmem:[#allocation18 + $0x60] sm:$0xff] }
 0x7b5   :  { %v1254_v48 = vpop.xlane.xlu1 %1253  ;;  %v2232_v21 = vpack.c.bf16 %v1351_v20, %v1350_v19 }
 0x7b6   :  { %v1262_v49 = vmul.f32 0.03125, %v1254_v48  ;;  %v1271_v50 = vmul.f32 %v2979_v18, %v3098_v47 }
 0x7b7   :  { %2233 = vmatpush3.bf16.msra.mxu1 %v2232_v21 }
 0x7b8   :  { %v3102_v51 = vsub.f32 %v1226_v23, %v1262_v49  ;;  %v1276_v52 = vmul.f32 %v1271_v50, %v1271_v50  ;;  %v1352_v23 = vld [vmem:[#allocation18 + $0x70] sm:$0xff]  ;;  %2234 = vmatprep.subr.bf16.mxu1 %v2622_v0 }
 0x7b9   :  { %v1256_v53 = vpop.xlane.xlu0 %1255  ;;  %v2235_v25 = vpack.c.bf16 %v1353_v24, %v1352_v23  ;;  %v1530_v0 = vld [vmem:[%s3214_s21] ss:$0 sm:$0xff]  ;;  %s2625_s21 = smov [#allocation21]  }
 0x7ba   :  { %v1263_v55 = vmul.f32 0.03125, %v1256_v53  ;;  %1281 = vadd.xlane.f32.xlu1 %v1276_v52  ;;  %v1272_v56 = vmul.f32 %v2979_v18, %v3102_v51  ;;  %s1472_s22 = sshll.u32 %s2625_s21, 4  ;;  %s1473_s22 = int_to_ptr.vmem [resolvable:$true] %s1472_s22 }
 0x7bb   :  { %2236 = vmatpush3.bf16.msra.mxu1 %v2235_v25  ;;  %s2502_s7 = scalar_lea.vmem %s1473_s22, 640  ;;  %p2507_p11 = scmp.lt.s32.totalorder %s1473_s22, %s1473_s22 }
 0x7bc   :  { %v3106_v57 = vsub.f32 %v1231_v26, %v1263_v55  ;;  %v1277_v58 = vmul.f32 %v1272_v56, %v1272_v56  ;;  %p2503_p10 = scmp.ne.s32.totalorder %s1473_s22, %s2502_s7  ;;  %p2508_p12 = scmp.lt.s32.totalorder %s2502_s7, %s2502_s7 }
 0x7bd   :  { %v1258_v59 = vpop.xlane.xlu1 %1257 }
 0x7be   :  { %v1264_v60 = vmul.f32 0.03125, %v1258_v59  ;;  %1283 = vadd.xlane.f32.xlu0 %v1277_v58  ;;  %v1273_v61 = vmul.f32 %v2979_v18, %v3106_v57  ;;  %p2509_p13 = por %p2508_p12, %p2507_p11 }
 0x7c0   :  { %v3110_v62 = vsub.f32 %v1236_v31, %v1264_v60  ;;  %v1278_v14 = vmul.f32 %v1273_v61, %v1273_v61  ;;  %p2510_p0 = pnand %p2509_p13, %p2503_p10 }
 0x7c2   :  { %1285 = vadd.xlane.f32.xlu1 %v1278_v14  ;;  %v1274_v63 = vmul.f32 %v2979_v18, %v3110_v62 }
 0x7c4   :  { %v1279_v2 = vmul.f32 %v1274_v63, %v1274_v63 }
 0x7c6   :  { %1287 = vadd.xlane.f32.xlu0 %v1279_v2 }
 0x7d1   :  { %v1260_v10 = vpop.xlane.xlu0 %1259 }
 0x7d2   :  { %v1265_v11 = vmul.f32 0.03125, %v1260_v10 }
 0x7d4   :  { %v3117_v16 = vsub.f32 %v1241_v35, %v1265_v11 }
 0x7d6   :  { %v1275_v17 = vmul.f32 %v2979_v18, %v3117_v16 }
 0x7d8   :  { %v1280_v22 = vmul.f32 %v1275_v17, %v1275_v17 }
 0x7da   :  { %1289 = vadd.xlane.f32.xlu1 %v1280_v22 }
 0x847   :  { %v1282_v54 = vpop.xlane.xlu1 %1281 }
 0x848   :  { %v1291_v26 = vmul.f32 0.03125, %v1282_v54 }
 0x84a   :  { %v1296_v27 = vadd.f32 1e-05, %v1291_v26 }
 0x84b   :  { %v1284_v29 = vpop.xlane.xlu0 %1283 }
 0x84c   :  { %2271 = vrsqrt.f32 %v1296_v27  ;;  %v1292_v18 = vmul.f32 0.03125, %v1284_v29 }
 0x84e   :  { %v1297_v30 = vadd.f32 1e-05, %v1292_v18 }
 0x84f   :  { %v1286_v31 = vpop.xlane.xlu1 %1285 }
 0x850   :  { %2273 = vrsqrt.f32 %v1297_v30  ;;  %v1293_v32 = vmul.f32 0.03125, %v1286_v31 }
 0x852   :  { %v1298_v33 = vadd.f32 1e-05, %v1293_v32 }
 0x853   :  { %v1288_v34 = vpop.xlane.xlu0 %1287 }
 0x854   :  { %2275 = vrsqrt.f32 %v1298_v33  ;;  %v1294_v35 = vmul.f32 0.03125, %v1288_v34 }
 0x856   :  { %v2272_v37 = vpop.eup %2271  ;;  %v1299_v38 = vadd.f32 1e-05, %v1294_v35 }
 0x857   :  { %v1306_v39 = vmul.f32 %v2272_v37, %v3098_v47 }
 0x858   :  { %2277 = vrsqrt.f32 %v1299_v38 }
 0x859   :  { %v1317_v41 = vmul.f32 %v1530_v0, %v1306_v39 }
 0x85a   :  { %v2274_v42 = vpop.eup %2273 }
 0x85b   :  { %v1328_v43 = vadd.f32 %v1531_v40, %v1317_v41  ;;  %v1307_v44 = vmul.f32 %v2274_v42, %v3102_v51 }
 0x85d   :  { %v1333_v45 = vmax.f32 %v1328_v43, 0.0  ;;  %v1318_v46 = vmul.f32 %v1530_v0, %v1307_v44 }
 0x85e   :  { %v2276_v48 = vpop.eup %2275 }
 0x85f   :  { %1967 = vmatmul.mubr.f32.vlgmr.msra.gmra.mrb[8].mxu1 %v1333_v45  ;;  %v1329_v49 = vadd.f32 %v1531_v40, %v1318_v46  ;;  %v1308_v50 = vmul.f32 %v2276_v48, %v3106_v57 }
 0x860   :  { %1969 = vmatprep.mubr.msk.f32.mxu1 %vm2623_vm0, %v2624_v1 }
 0x861   :  { %v1334_v47 = vmax.f32 %v1329_v49, 0.0  ;;  %v1319_v52 = vmul.f32 %v1530_v0, %v1308_v50 }
 0x862   :  { %v2278_v53 = vpop.eup %2277 }
 0x863   :  { %1970 = vmatmul.mubr.f32.gmra.mrb[10].mxu1 %v1334_v47  ;;  %v1330_v55 = vadd.f32 %v1531_v40, %v1319_v52  ;;  %v1309_v56 = vmul.f32 %v2278_v53, %v3110_v62 }
 0x864   :  { %1972 = vmatprep.mubr.msk.f32.mxu1 %vm2623_vm0, %v2624_v1 }
 0x865   :  { %v1335_v51 = vmax.f32 %v1330_v55, 0.0  ;;  %v1320_v58 = vmul.f32 %v1530_v0, %v1309_v56 }
 0x867   :  { %v1290_v59 = vpop.xlane.xlu1 %1289  ;;  %1973 = vmatmul.mubr.f32.gmra.mrb[12].mxu1 %v1335_v51  ;;  %v1331_v60 = vadd.f32 %v1531_v40, %v1320_v58 }
 0x868   :  { %v1295_v61 = vmul.f32 0.03125, %v1290_v59  ;;  %1975 = vmatprep.mubr.msk.f32.mxu1 %vm2623_vm0, %v2624_v1 }
 0x869   :  { %v1336_v57 = vmax.f32 %v1331_v60, 0.0 }
 0x86a   :  { %v1300_v14 = vadd.f32 1e-05, %v1295_v61 }
 0x86b   :  { %1976 = vmatmul.mubr.f32.gmra.mrb[14].mxu1 %v1336_v57 }
 0x86c   :  { %2279 = vrsqrt.f32 %v1300_v14  ;;  %1978 = vmatprep.mubr.msk.f32.mxu1 %vm2623_vm0, %v2624_v1 }
 0x876   :  { %v2280_v62 = vpop.eup %2279 }
 0x877   :  { %v1310_v63 = vmul.f32 %v2280_v62, %v3117_v16 }
 0x879   :  { %v1321_v2 = vmul.f32 %v1530_v0, %v1310_v63 }
 0x87b   :  { %v1332_v3 = vadd.f32 %v1531_v40, %v1321_v2 }
 0x87d   :  { %v1337_v36 = vmax.f32 %v1332_v3, 0.0 }
 0x87f   :  { %1979 = vmatmul.mubr.f32.gmra.mrb[16].mxu1 %v1337_v36 }
 0x880   :  { %2513 = shalt.err (!%p2510_p0)
}
 0x881   :  { %s2514_s8 = scalar_lea.hbm %s3219_s26, 640 }
 0x882   :  { %p2515_p1 = scmp.ne.s32.totalorder %s3219_s26, %s2514_s8  ;;  %p2518_p2 = scmp.lt.u32.totalorder %s2514_s8, %s3219_s26 }
 0x884   :  { %p2520_p3 = pnand %p2518_p2, %p2515_p1 }
 0x886   :  { %2523 = shalt.err (!%p2520_p3)
}
 0x887   :  { %1475 = dma.vmem_to_hbm [thread:$0]  %s1473_s22, 640, %s3219_s26, [#allocation22]  }
 0x888   :  { %s2524_s23 = scalar_lea.vmem %s1463_s24, 128  ;;  %p2529_p5 = scmp.lt.s32.totalorder %s1463_s24, %s1463_s24 }
 0x889   :  { %p2525_p4 = scmp.ne.s32.totalorder %s1463_s24, %s2524_s23  ;;  %p2530_p6 = scmp.lt.s32.totalorder %s2524_s23, %s2524_s23 }
 0x88b   :  { %p2531_p7 = por %p2530_p6, %p2529_p5 }
 0x88d   :  { %p2532_p8 = pnand %p2531_p7, %p2525_p4 }
 0x88f   :  { %2535 = shalt.err (!%p2532_p8)
}
 0x890   :  { %s2536_s11 = scalar_lea.hbm %s3218_s25, 128 }
 0x891   :  { %p2537_p9 = scmp.ne.s32.totalorder %s3218_s25, %s2536_s11  ;;  %p2540_p10 = scmp.lt.u32.totalorder %s2536_s11, %s3218_s25 }
 0x893   :  { %p2542_p11 = pnand %p2540_p10, %p2537_p9 }
 0x895   :  { %2545 = shalt.err (!%p2542_p11)
}
 0x896   :  { %1465 = dma.vmem_to_hbm [thread:$0]  %s1463_s24, 128, %s3218_s25, [#allocation5]  }
 0x897   :  { %s2627_s30 = smov [#allocation23]  }
 0x898   :  { %s1482_s20 = sshll.u32 %s2627_s30, 4  ;;  %s1483_s20 = int_to_ptr.vmem [resolvable:$true] %s1482_s20 }
 0x899   :  { %s2546_s3 = scalar_lea.vmem %s1483_s20, 640  ;;  %p2551_p13 = scmp.lt.s32.totalorder %s1483_s20, %s1483_s20 }
 0x89a   :  { %p2547_p12 = scmp.ne.s32.totalorder %s1483_s20, %s2546_s3  ;;  %p2552_p0 = scmp.lt.s32.totalorder %s2546_s3, %s2546_s3 }
 0x89c   :  { %p2553_p1 = por %p2552_p0, %p2551_p13 }
 0x89e   :  { %p2554_p2 = pnand %p2553_p1, %p2547_p12 }
 0x8a0   :  { %2557 = shalt.err (!%p2554_p2)
}
 0x8a1   :  { %s2558_s21 = scalar_lea.hbm %s3220_s27, 640 }
 0x8a2   :  { %p2559_p3 = scmp.ne.s32.totalorder %s3220_s27, %s2558_s21  ;;  %p2562_p4 = scmp.lt.u32.totalorder %s2558_s21, %s3220_s27 }
 0x8a4   :  { %p2564_p5 = pnand %p2562_p4, %p2559_p3 }
 0x8a6   :  { %2567 = shalt.err (!%p2564_p5)
}
 0x8a7   :  { %1485 = dma.vmem_to_hbm [thread:$0]  %s1483_s20, 640, %s3220_s27, [#allocation22]  }
 0x8a8   :  { %s3263_s0 = sld [smem:[#allocation48_spill]]  ;;  %s2628_s27 = smov [#allocation24]  }
 0x8a9   :  { %s1492_s29 = sshll.u32 %s2628_s27, 4  ;;  %s1493_s29 = int_to_ptr.vmem [resolvable:$true] %s1492_s29 }
 0x8aa   :  { %s2568_s2 = scalar_lea.vmem %s1493_s29, 640  ;;  %p2573_p7 = scmp.lt.s32.totalorder %s1493_s29, %s1493_s29 }
 0x8ab   :  { %p2569_p6 = scmp.ne.s32.totalorder %s1493_s29, %s2568_s2  ;;  %p2574_p8 = scmp.lt.s32.totalorder %s2568_s2, %s2568_s2 }
 0x8ad   :  { %p2575_p9 = por %p2574_p8, %p2573_p7 }
 0x8ae   :  { %v1532_v1 = vld [vmem:[%s3263_s0] ss:$0 sm:$0xff] }
 0x8af   :  { %p2576_p10 = pnand %p2575_p9, %p2569_p6 }
 0x932   :  { %v1427_v4 = vpop.f32.mrb[8].mxu1 }
 0x933   :  { %v1428_v5 = vadd.f32 %v1532_v1, %v1427_v4  ;;  %v1968_v6 = vpop.f32.mrb[9].mxu1 }
 0x935   :  { %1451 = vst [vmem:[#allocation24] sm:$0xff] %v1428_v5 }
 0x936   :  { %v1432_v7 = vpop.f32.mrb[10].mxu1 }
 0x937   :  { %v1433_v28 = vadd.f32 %v1532_v1, %v1432_v7  ;;  %v1971_v8 = vpop.f32.mrb[11].mxu1 }
 0x939   :  { %1452 = vst [vmem:[#allocation24 + $0x8] sm:$0xff] %v1433_v28 }
 0x93a   :  { %v1437_v9 = vpop.f32.mrb[12].mxu1 }
 0x93b   :  { %v1438_v10 = vadd.f32 %v1532_v1, %v1437_v9  ;;  %v1974_v11 = vpop.f32.mrb[13].mxu1 }
 0x93d   :  { %1453 = vst [vmem:[#allocation24 + $0x10] sm:$0xff] %v1438_v10 }
 0x93e   :  { %v1442_v12 = vpop.f32.mrb[14].mxu1 }
 0x93f   :  { %v1443_v13 = vadd.f32 %v1532_v1, %v1442_v12  ;;  %v1977_v15 = vpop.f32.mrb[15].mxu1 }
 0x941   :  { %1454 = vst [vmem:[#allocation24 + $0x18] sm:$0xff] %v1443_v13 }
 0x952   :  { %v1447_v16 = vpop.f32.mrb[16].mxu1 }
 0x953   :  { %v1448_v17 = vadd.f32 %v1532_v1, %v1447_v16  ;;  %v1980_v19 = vpop.f32.mrb[17].mxu1 }
 0x955   :  { %1455 = vst [vmem:[#allocation24 + $0x20] sm:$0xff] %v1448_v17 }
 0x956   :  { %2579 = shalt.err (!%p2576_p10)
}
 0x957   :  { %s3264_s6 = sld [smem:[#allocation49_spill]] }
 0x95d   :  { %s2580_s23 = scalar_lea.hbm %s3264_s6, 640 }
 0x95e   :  { %p2581_p11 = scmp.ne.s32.totalorder %s3264_s6, %s2580_s23  ;;  %p2584_p12 = scmp.lt.u32.totalorder %s2580_s23, %s3264_s6 }
 0x960   :  { %p2586_p13 = pnand %p2584_p12, %p2581_p11 }
 0x962   :  { %2589 = shalt.err (!%p2586_p13)
}
 0x963   :  { %1495 = dma.vmem_to_hbm [thread:$0]  %s1493_s29, 640, %s3264_s6, [#allocation25]  }
 0x964   :  { %2602 = dma.done.wait [#allocation5], 128  }
 0x965   :  { %2603 = vsyncadd [#allocation5], 4294967168 }
 0x966   :  { %2604 = dma.done.wait [#allocation22], 1280  }
 0x967   :  { %2605 = vsyncadd [#allocation22], 4294966016 }
 0x968   :  { %2606 = dma.done.wait [#allocation25], 640  }
 0x969   :  { %2607 = vsyncadd [#allocation25], 4294966656 }
 0x96a   :  { %1508 = vsyncpa [#allocation4], 1 }
 0x96b   :  { %1509 = vsyncpa [#allocation7], 1 }
 0x96c   :  { %1510 = vsyncpa [#allocation10], 1 }
 0x96d   :  { %1511 = vsyncpa [#allocation13], 1 }
 0x96e   :  { %1512 = vsyncpa [#allocation16], 1 }
 0x96f   :  { %1513 = vsyncpa [#allocation19], 1 }
 0x970   :  { %1514 = vsyncpa [#allocation5], 1 }
 0x971   :  { %1515 = vsyncpa [#allocation22], 1 }
 0x972   :  { %1516 = vsyncpa [#allocation25], 1 }

</bundles_post_ra>
